<compile_context>
chip_gen: v7x
topology: tpu7x:2x2x1
jax: 0.10.0
libtpu: 0.0.40
codegen_flags: <defaults>
</compile_context>

<pallas_src>
import jax
import jax.numpy as jnp
import numpy as np
from jax.experimental import pallas as pl

V_PAD = 128    # decoder vocab padded to one full lane tile (48 -> 128)
IV_PAD = 128   # encoder vocab padded to one full lane tile (50 -> 128)


def _dot(a, b):
    return jnp.dot(a, b, preferred_element_type=jnp.float32)


def _gru_gates(gi, gh, h, H):
    """PyTorch GRU cell from pre-activations gi = x@W_ih + b_ih, gh = h@W_hh + b_hh."""
    r = jax.nn.sigmoid(gi[:, :H] + gh[:, :H])
    z = jax.nn.sigmoid(gi[:, H:2 * H] + gh[:, H:2 * H])
    n = jnp.tanh(gi[:, 2 * H:] + r * gh[:, 2 * H:])
    return (1.0 - z) * n + z * h


# ----------------------------------------------------------------------------
# Fused Pallas kernel: encoder GRU + decoder loop + argmax/teacher-forcing
# ----------------------------------------------------------------------------
def seq2seq_kernel(src_oh_ref, trg_oh_ref, tf_ref,
                   w_enc_in_ref, enc_whh_ref, enc_bih_ref, enc_bhh_ref,
                   w_dec_in_ref, wic_ref, wh_ref, bi_ref, bh_ref,
                   wfch_ref, wfcc_ref, bfc_ref,
                   out_ref):
    trg_len, B, Vp = out_ref.shape
    H = enc_whh_ref.shape[0]
    S = src_oh_ref.shape[0] // B
    gpad = w_dec_in_ref.shape[1] - Vp      # lane-aligned offset of the fc_out columns

    # ---------------- Encoder (GRU) ----------------
    # Input-side projection for ALL timesteps in one matmul (embedding folded in);
    # only h @ W_hh stays on the serial recurrence.
    gi_all = _dot(src_oh_ref[...], w_enc_in_ref[...]) + enc_bih_ref[...]   # (S*B, 3H)
    enc_bhh = enc_bhh_ref[...]
    h = jnp.zeros((B, H), jnp.float32)
    for t in range(S):                                  # static unroll
        gi = gi_all[t * B:(t + 1) * B, :]
        gh = _dot(h, enc_whh_ref[...]) + enc_bhh
        h = _gru_gates(gi, gh, h, H)
    context = h                                         # (B, H), stays in vregs

    # ---------------- Decoder (GRU + fc_out + next-input select) ----------------
    # Loop-invariant context contributions, computed once.
    gic = _dot(context, wic_ref[...]) + bi_ref[...]     # (B, 3H)
    fcc = _dot(context, wfcc_ref[...]) + bfc_ref[...]   # (B, Vp); padded cols = -1e30
    bh = bh_ref[...]
    col = jax.lax.broadcasted_iota(jnp.int32, (B, Vp), 1)

    out_ref[0] = jnp.zeros((B, Vp), jnp.float32)        # outputs[0] stays zero
    h_dec = context                                     # hidden <- context
    inp_oh = trg_oh_ref[0]                              # input  <- trg[0]
    for t in range(1, trg_len):                         # static unroll; carries in vregs
        # One fused input-side matmul: [gate columns | fc_out columns].
        g_in = _dot(inp_oh, w_dec_in_ref[...])          # (B, gpad + Vp)
        gi = g_in[:, :3 * H] + gic
        gh = _dot(h_dec, wh_ref[...]) + bh
        h_dec = _gru_gates(gi, gh, h_dec, H)
        pred = g_in[:, gpad:] + _dot(h_dec, wfch_ref[...]) + fcc   # (B, Vp) lane-dense
        out_ref[t] = pred

        if t < trg_len - 1:                             # last next-input is never used
            # Greedy argmax (first max index, matching jnp.argmax); padded logits
            # are already -1e30 via the bias, so no mask is needed.
            maxv = jnp.max(pred, axis=1, keepdims=True)
            idx = jnp.where(pred == maxv, col, jnp.int32(Vp))
            top1 = jnp.min(idx, axis=1, keepdims=True)
            top1_oh = (col == top1).astype(jnp.float32)
            m = tf_ref[t]                               # (1,) teacher-forcing flag
            inp_oh = m * trg_oh_ref[t] + (1.0 - m) * top1_oh


# ----------------------------------------------------------------------------
# Wrapper
# ----------------------------------------------------------------------------
def seq2seq_forward(kp, src, trg, tf_mask, out_dim):
    """Mirrors Seq2Seq.forward; tf_mask[t] replaces random.random() < ratio."""
    S, B = src.shape
    trg_len = trg.shape[0]
    IVp = kp["w_enc_in"].shape[0]
    Vp = kp["wfcc"].shape[1]
    # Tiny one-hot / cast glue (a few KB of DMA); all compute runs in the kernel.
    src_oh = jax.nn.one_hot(src.reshape(S * B), IVp, dtype=jnp.float32)   # (S*B, IVp)
    trg_oh = jax.nn.one_hot(trg, Vp, dtype=jnp.float32)                   # (T, B, Vp)
    tf = tf_mask.astype(jnp.float32).reshape(trg_len, 1)

    out = pl.pallas_call(
        seq2seq_kernel,
        out_shape=jax.ShapeDtypeStruct((trg_len, B, Vp), jnp.float32),
    )(src_oh, trg_oh, tf,
      kp["w_enc_in"], kp["enc_whh"], kp["enc_bih"], kp["enc_bhh"],
      kp["w_dec_in"], kp["wic"], kp["wh"], kp["bi"], kp["bh"],
      kp["wfch"], kp["wfcc"], kp["bfc"])
    return out[:, :, :out_dim]


# ----------------------------------------------------------------------------
# Parameter init (PyTorch-equivalent shapes, gate order r,z,n) + kernel prep
# ----------------------------------------------------------------------------
def init_params(key, input_dim, output_dim, emb_dim, hid_dim):
    E, H, V = emb_dim, hid_dim, output_dim
    ks = jax.random.split(key, 12)
    s = 0.1
    nrm = lambda k, shp: (s * jax.random.normal(k, shp)).astype(jnp.float32)
    return {
        "enc_emb": nrm(ks[0], (input_dim, E)),
        "dec_emb": nrm(ks[1], (V, E)),
        "enc_wih": nrm(ks[2], (3 * H, E)),
        "enc_whh": nrm(ks[3], (3 * H, H)),
        "enc_bih": nrm(ks[4], (3 * H,)),
        "enc_bhh": nrm(ks[5], (3 * H,)),
        "dec_wih": nrm(ks[6], (3 * H, E + H)),   # rnn input = concat(embedded, context)
        "dec_whh": nrm(ks[7], (3 * H, H)),
        "dec_bih": nrm(ks[8], (3 * H,)),
        "dec_bhh": nrm(ks[9], (3 * H,)),
        "fc_w": nrm(ks[10], (V, E + 2 * H)),     # fc on concat(embedded, hidden, context)
        "fc_b": nrm(ks[11], (V,)),
    }


def prepare_kernel_params(raw, input_dim, output_dim, v_pad=V_PAD, iv_pad=IV_PAD):
    """One-time (outside the forward pass): pad vocab dims to lane-dense widths and
    fold the embedding tables into downstream weights: onehot @ (emb @ W) == emb[id] @ W."""
    E = raw["enc_emb"].shape[1]
    H = raw["enc_whh"].shape[1]
    V = output_dim

    enc_emb_p = jnp.pad(raw["enc_emb"], ((0, iv_pad - input_dim), (0, 0)))  # (IVp, E)
    dec_emb_p = jnp.pad(raw["dec_emb"], ((0, v_pad - V), (0, 0)))           # (Vp, E)

    wie = raw["dec_wih"][:, :E].T          # (E, 3H)  embedded part of W_ih
    wic = raw["dec_wih"][:, E:].T          # (H, 3H)  context part of W_ih
    wfce = raw["fc_w"][:, :E].T            # (E, V)   embedded part of fc_out
    wfch = raw["fc_w"][:, E:E + H].T       # (H, V)   hidden part
    wfcc = raw["fc_w"][:, E + H:].T        # (H, V)   context part

    pad_cols = lambda w: jnp.pad(w, ((0, 0), (0, v_pad - V)))

    w_enc_in = enc_emb_p @ raw["enc_wih"].T                    # (IVp, 3H)
    wie_f = dec_emb_p @ wie                                    # (Vp, 3H)
    wfce_f = dec_emb_p @ pad_cols(wfce)                        # (Vp, Vp)
    gpad = 128 * pl.cdiv(3 * H, 128)                           # lane-align the gate part
    w_dec_in = jnp.concatenate(
        [jnp.pad(wie_f, ((0, 0), (0, gpad - 3 * H))), wfce_f], axis=1)   # (Vp, gpad+Vp)

    # Padded fc_out bias columns get -1e30 so the in-kernel argmax needs no mask.
    bfc = jnp.pad(raw["fc_b"][None, :], ((0, 0), (0, v_pad - V)),
                  constant_values=-1e30)

    return {
        "w_enc_in": w_enc_in,                  # (IVp, 3H)
        "enc_whh": raw["enc_whh"].T,           # (H, 3H)
        "enc_bih": raw["enc_bih"][None, :],    # (1, 3H)
        "enc_bhh": raw["enc_bhh"][None, :],    # (1, 3H)
        "w_dec_in": w_dec_in,                  # (Vp, gpad+Vp)
        "wic": wic,                            # (H, 3H)
        "wh": raw["dec_whh"].T,                # (H, 3H)
        "bi": raw["dec_bih"][None, :],         # (1, 3H)
        "bh": raw["dec_bhh"][None, :],         # (1, 3H)
        "wfch": pad_cols(wfch),                # (H, Vp)
        "wfcc": pad_cols(wfcc),                # (H, Vp)
        "bfc": bfc,                            # (1, Vp), padded cols = -1e30
    }


# ----------------------------------------------------------------------------
# Pure-JAX reference (same math as the PyTorch module) for correctness check
# ----------------------------------------------------------------------------
def seq2seq_ref(raw, src, trg, tf_mask, out_dim):
    H = raw["enc_whh"].shape[1]
    trg_len, B = trg.shape
    V = out_dim

    emb_src = jnp.take(raw["enc_emb"], src, axis=0)            # (S, B, E)
    h = jnp.zeros((B, H), jnp.float32)
    for t in range(src.shape[0]):
        gi = emb_src[t] @ raw["enc_wih"].T + raw["enc_bih"]
        gh = h @ raw["enc_whh"].T + raw["enc_bhh"]
        h = _gru_gates(gi, gh, h, H)
    context = h
    hidden = context

    outputs = [jnp.zeros((B, V), jnp.float32)]
    inp = trg[0]
    for t in range(1, trg_len):
        e = jnp.take(raw["dec_emb"], inp, axis=0)
        gi = jnp.concatenate([e, context], axis=1) @ raw["dec_wih"].T + raw["dec_bih"]
        gh = hidden @ raw["dec_whh"].T + raw["dec_bhh"]
        hidden = _gru_gates(gi, gh, hidden, H)
        pred = (jnp.concatenate([e, hidden, context], axis=1) @ raw["fc_w"].T
                + raw["fc_b"])
        outputs.append(pred)
        top1 = jnp.argmax(pred, axis=1).astype(trg.dtype)
        inp = jnp.where(tf_mask[t], trg[t], top1)
    return jnp.stack(outputs, axis=0)


# ----------------------------------------------------------------------------
if __name__ == "__main__":
    INPUT_DIM, OUTPUT_DIM = 50, 48
    EMB_DIM, HID_DIM = 32, 32
    SRC_LEN, TRG_LEN, BATCH = 7, 8, 2

    root = jax.random.PRNGKey(0)
    k_par, k_src, k_trg, k_tf = jax.random.split(root, 4)

    raw_params = init_params(k_par, INPUT_DIM, OUTPUT_DIM, EMB_DIM, HID_DIM)
    kernel_params = prepare_kernel_params(raw_params, INPUT_DIM, OUTPUT_DIM)

    src = jax.random.randint(k_src, (SRC_LEN, BATCH), 0, INPUT_DIM, dtype=jnp.int32)
    trg = jax.random.randint(k_trg, (TRG_LEN, BATCH), 0, OUTPUT_DIM, dtype=jnp.int32)
    # Deterministic stand-in for `random.random() < teacher_forcing_ratio`.
    tf_mask = jax.random.uniform(k_tf, (TRG_LEN,)) < 0.5
    # TODO(synk): nn.Dropout inside encoder/decoder is identity here (inference semantics).

    out = jax.block_until_ready(
        seq2seq_forward(kernel_params, src, trg, tf_mask, OUTPUT_DIM))
    assert out.shape == (TRG_LEN, BATCH, OUTPUT_DIM)

    ref = jax.block_until_ready(
        seq2seq_ref(raw_params, src, trg, tf_mask, OUTPUT_DIM))
    np.testing.assert_allclose(np.asarray(out), np.asarray(ref), rtol=1e-2, atol=1e-2)

    print("KERNEL_OK")
</pallas_src>

<mosaic_0001>
module attributes {stable_mosaic.version = 11 : i64} {
  func.func @seq2seq_kernel(%arg0: memref<14x128xf32, #tpu.memory_space<vmem>>, %arg1: memref<8x2x128xf32, #tpu.memory_space<vmem>>, %arg2: memref<8x1xf32, #tpu.memory_space<vmem>>, %arg3: memref<128x96xf32, #tpu.memory_space<vmem>>, %arg4: memref<32x96xf32, #tpu.memory_space<vmem>>, %arg5: memref<1x96xf32, #tpu.memory_space<vmem>>, %arg6: memref<1x96xf32, #tpu.memory_space<vmem>>, %arg7: memref<128x256xf32, #tpu.memory_space<vmem>>, %arg8: memref<32x96xf32, #tpu.memory_space<vmem>>, %arg9: memref<32x96xf32, #tpu.memory_space<vmem>>, %arg10: memref<1x96xf32, #tpu.memory_space<vmem>>, %arg11: memref<1x96xf32, #tpu.memory_space<vmem>>, %arg12: memref<32x128xf32, #tpu.memory_space<vmem>>, %arg13: memref<32x128xf32, #tpu.memory_space<vmem>>, %arg14: memref<1x128xf32, #tpu.memory_space<vmem>>, %arg15: memref<8x2x128xf32, #tpu.memory_space<vmem>>) attributes {dimension_semantics = [], scalar_prefetch = 0 : i64, scratch_operands = 0 : i64, tpu.core_type = #tpu.core_type<tc>} {
    %c0 = arith.constant 0 : index
    %c0_0 = arith.constant 0 : index
    %0 = vector.load %arg0[%c0, %c0_0] : memref<14x128xf32, #tpu.memory_space<vmem>>, vector<14x128xf32>
    %c0_1 = arith.constant 0 : index
    %c0_2 = arith.constant 0 : index
    %1 = vector.load %arg3[%c0_1, %c0_2] : memref<128x96xf32, #tpu.memory_space<vmem>>, vector<128x96xf32>
    %cst = arith.constant dense<0.000000e+00> : vector<14x96xf32>
    %2 = tpu.matmul %0, %1, %cst {dimension_numbers = #tpu.dot_dimension_numbers<[1], [0], [0], [1], [0, 0, 1, 1], [], []>} : vector<14x128xf32>, vector<128x96xf32>, vector<14x96xf32> -> vector<14x96xf32>
    %c0_3 = arith.constant 0 : index
    %c0_4 = arith.constant 0 : index
    %3 = vector.load %arg5[%c0_3, %c0_4] : memref<1x96xf32, #tpu.memory_space<vmem>>, vector<1x96xf32>
    %4 = vector.broadcast %3 : vector<1x96xf32> to vector<14x96xf32>
    %5 = arith.addf %2, %4 : vector<14x96xf32>
    %c0_5 = arith.constant 0 : index
    %c0_6 = arith.constant 0 : index
    %6 = vector.load %arg6[%c0_5, %c0_6] : memref<1x96xf32, #tpu.memory_space<vmem>>, vector<1x96xf32>
    %cst_7 = arith.constant 0.000000e+00 : f32
    %7 = vector.broadcast %cst_7 : f32 to vector<2x32xf32>
    %8 = vector.extract_strided_slice %5 {offsets = [0, 0], sizes = [2, 96], strides = [1, 1]} : vector<14x96xf32> to vector<2x96xf32>
    %c0_8 = arith.constant 0 : index
    %c0_9 = arith.constant 0 : index
    %9 = vector.load %arg4[%c0_8, %c0_9] : memref<32x96xf32, #tpu.memory_space<vmem>>, vector<32x96xf32>
    %cst_10 = arith.constant dense<0.000000e+00> : vector<2x96xf32>
    %10 = tpu.matmul %7, %9, %cst_10 {dimension_numbers = #tpu.dot_dimension_numbers<[1], [0], [0], [1], [0, 0, 1, 1], [], []>} : vector<2x32xf32>, vector<32x96xf32>, vector<2x96xf32> -> vector<2x96xf32>
    %11 = vector.broadcast %6 : vector<1x96xf32> to vector<2x96xf32>
    %12 = arith.addf %10, %11 : vector<2x96xf32>
    %13 = vector.extract_strided_slice %8 {offsets = [0, 0], sizes = [2, 32], strides = [1, 1]} : vector<2x96xf32> to vector<2x32xf32>
    %14 = vector.extract_strided_slice %12 {offsets = [0, 0], sizes = [2, 32], strides = [1, 1]} : vector<2x96xf32> to vector<2x32xf32>
    %15 = arith.addf %13, %14 : vector<2x32xf32>
    %16 = arith.negf %15 : vector<2x32xf32>
    %17 = math.exp %16 : vector<2x32xf32>
    %cst_11 = arith.constant 1.000000e+00 : f32
    %18 = vector.broadcast %cst_11 : f32 to vector<2x32xf32>
    %19 = arith.addf %18, %17 : vector<2x32xf32>
    %20 = arith.divf %18, %19 : vector<2x32xf32>
    %21 = vector.extract_strided_slice %8 {offsets = [0, 32], sizes = [2, 32], strides = [1, 1]} : vector<2x96xf32> to vector<2x32xf32>
    %22 = vector.extract_strided_slice %12 {offsets = [0, 32], sizes = [2, 32], strides = [1, 1]} : vector<2x96xf32> to vector<2x32xf32>
    %23 = arith.addf %21, %22 : vector<2x32xf32>
    %24 = arith.negf %23 : vector<2x32xf32>
    %25 = math.exp %24 : vector<2x32xf32>
    %cst_12 = arith.constant 1.000000e+00 : f32
    %26 = vector.broadcast %cst_12 : f32 to vector<2x32xf32>
    %27 = arith.addf %26, %25 : vector<2x32xf32>
    %28 = arith.divf %26, %27 : vector<2x32xf32>
    %29 = vector.extract_strided_slice %8 {offsets = [0, 64], sizes = [2, 32], strides = [1, 1]} : vector<2x96xf32> to vector<2x32xf32>
    %30 = vector.extract_strided_slice %12 {offsets = [0, 64], sizes = [2, 32], strides = [1, 1]} : vector<2x96xf32> to vector<2x32xf32>
    %31 = arith.mulf %20, %30 : vector<2x32xf32>
    %32 = arith.addf %29, %31 : vector<2x32xf32>
    %33 = math.tanh %32 : vector<2x32xf32>
    %cst_13 = arith.constant 1.000000e+00 : f32
    %34 = vector.broadcast %cst_13 : f32 to vector<2x32xf32>
    %35 = arith.subf %34, %28 : vector<2x32xf32>
    %36 = arith.mulf %35, %33 : vector<2x32xf32>
    %37 = arith.mulf %28, %7 : vector<2x32xf32>
    %38 = arith.addf %36, %37 : vector<2x32xf32>
    %39 = vector.extract_strided_slice %5 {offsets = [2, 0], sizes = [2, 96], strides = [1, 1]} : vector<14x96xf32> to vector<2x96xf32>
    %c0_14 = arith.constant 0 : index
    %c0_15 = arith.constant 0 : index
    %40 = vector.load %arg4[%c0_14, %c0_15] : memref<32x96xf32, #tpu.memory_space<vmem>>, vector<32x96xf32>
    %cst_16 = arith.constant dense<0.000000e+00> : vector<2x96xf32>
    %41 = tpu.matmul %38, %40, %cst_16 {dimension_numbers = #tpu.dot_dimension_numbers<[1], [0], [0], [1], [0, 0, 1, 1], [], []>} : vector<2x32xf32>, vector<32x96xf32>, vector<2x96xf32> -> vector<2x96xf32>
    %42 = vector.broadcast %6 : vector<1x96xf32> to vector<2x96xf32>
    %43 = arith.addf %41, %42 : vector<2x96xf32>
    %44 = vector.extract_strided_slice %39 {offsets = [0, 0], sizes = [2, 32], strides = [1, 1]} : vector<2x96xf32> to vector<2x32xf32>
    %45 = vector.extract_strided_slice %43 {offsets = [0, 0], sizes = [2, 32], strides = [1, 1]} : vector<2x96xf32> to vector<2x32xf32>
    %46 = arith.addf %44, %45 : vector<2x32xf32>
    %47 = arith.negf %46 : vector<2x32xf32>
    %48 = math.exp %47 : vector<2x32xf32>
    %cst_17 = arith.constant 1.000000e+00 : f32
    %49 = vector.broadcast %cst_17 : f32 to vector<2x32xf32>
    %50 = arith.addf %49, %48 : vector<2x32xf32>
    %51 = arith.divf %49, %50 : vector<2x32xf32>
    %52 = vector.extract_strided_slice %39 {offsets = [0, 32], sizes = [2, 32], strides = [1, 1]} : vector<2x96xf32> to vector<2x32xf32>
    %53 = vector.extract_strided_slice %43 {offsets = [0, 32], sizes = [2, 32], strides = [1, 1]} : vector<2x96xf32> to vector<2x32xf32>
    %54 = arith.addf %52, %53 : vector<2x32xf32>
    %55 = arith.negf %54 : vector<2x32xf32>
    %56 = math.exp %55 : vector<2x32xf32>
    %cst_18 = arith.constant 1.000000e+00 : f32
    %57 = vector.broadcast %cst_18 : f32 to vector<2x32xf32>
    %58 = arith.addf %57, %56 : vector<2x32xf32>
    %59 = arith.divf %57, %58 : vector<2x32xf32>
    %60 = vector.extract_strided_slice %39 {offsets = [0, 64], sizes = [2, 32], strides = [1, 1]} : vector<2x96xf32> to vector<2x32xf32>
    %61 = vector.extract_strided_slice %43 {offsets = [0, 64], sizes = [2, 32], strides = [1, 1]} : vector<2x96xf32> to vector<2x32xf32>
    %62 = arith.mulf %51, %61 : vector<2x32xf32>
    %63 = arith.addf %60, %62 : vector<2x32xf32>
    %64 = math.tanh %63 : vector<2x32xf32>
    %cst_19 = arith.constant 1.000000e+00 : f32
    %65 = vector.broadcast %cst_19 : f32 to vector<2x32xf32>
    %66 = arith.subf %65, %59 : vector<2x32xf32>
    %67 = arith.mulf %66, %64 : vector<2x32xf32>
    %68 = arith.mulf %59, %38 : vector<2x32xf32>
    %69 = arith.addf %67, %68 : vector<2x32xf32>
    %70 = vector.extract_strided_slice %5 {offsets = [4, 0], sizes = [2, 96], strides = [1, 1]} : vector<14x96xf32> to vector<2x96xf32>
    %c0_20 = arith.constant 0 : index
    %c0_21 = arith.constant 0 : index
    %71 = vector.load %arg4[%c0_20, %c0_21] : memref<32x96xf32, #tpu.memory_space<vmem>>, vector<32x96xf32>
    %cst_22 = arith.constant dense<0.000000e+00> : vector<2x96xf32>
    %72 = tpu.matmul %69, %71, %cst_22 {dimension_numbers = #tpu.dot_dimension_numbers<[1], [0], [0], [1], [0, 0, 1, 1], [], []>} : vector<2x32xf32>, vector<32x96xf32>, vector<2x96xf32> -> vector<2x96xf32>
    %73 = vector.broadcast %6 : vector<1x96xf32> to vector<2x96xf32>
    %74 = arith.addf %72, %73 : vector<2x96xf32>
    %75 = vector.extract_strided_slice %70 {offsets = [0, 0], sizes = [2, 32], strides = [1, 1]} : vector<2x96xf32> to vector<2x32xf32>
    %76 = vector.extract_strided_slice %74 {offsets = [0, 0], sizes = [2, 32], strides = [1, 1]} : vector<2x96xf32> to vector<2x32xf32>
    %77 = arith.addf %75, %76 : vector<2x32xf32>
    %78 = arith.negf %77 : vector<2x32xf32>
    %79 = math.exp %78 : vector<2x32xf32>
    %cst_23 = arith.constant 1.000000e+00 : f32
    %80 = vector.broadcast %cst_23 : f32 to vector<2x32xf32>
    %81 = arith.addf %80, %79 : vector<2x32xf32>
    %82 = arith.divf %80, %81 : vector<2x32xf32>
    %83 = vector.extract_strided_slice %70 {offsets = [0, 32], sizes = [2, 32], strides = [1, 1]} : vector<2x96xf32> to vector<2x32xf32>
    %84 = vector.extract_strided_slice %74 {offsets = [0, 32], sizes = [2, 32], strides = [1, 1]} : vector<2x96xf32> to vector<2x32xf32>
    %85 = arith.addf %83, %84 : vector<2x32xf32>
    %86 = arith.negf %85 : vector<2x32xf32>
    %87 = math.exp %86 : vector<2x32xf32>
    %cst_24 = arith.constant 1.000000e+00 : f32
    %88 = vector.broadcast %cst_24 : f32 to vector<2x32xf32>
    %89 = arith.addf %88, %87 : vector<2x32xf32>
    %90 = arith.divf %88, %89 : vector<2x32xf32>
    %91 = vector.extract_strided_slice %70 {offsets = [0, 64], sizes = [2, 32], strides = [1, 1]} : vector<2x96xf32> to vector<2x32xf32>
    %92 = vector.extract_strided_slice %74 {offsets = [0, 64], sizes = [2, 32], strides = [1, 1]} : vector<2x96xf32> to vector<2x32xf32>
    %93 = arith.mulf %82, %92 : vector<2x32xf32>
    %94 = arith.addf %91, %93 : vector<2x32xf32>
    %95 = math.tanh %94 : vector<2x32xf32>
    %cst_25 = arith.constant 1.000000e+00 : f32
    %96 = vector.broadcast %cst_25 : f32 to vector<2x32xf32>
    %97 = arith.subf %96, %90 : vector<2x32xf32>
    %98 = arith.mulf %97, %95 : vector<2x32xf32>
    %99 = arith.mulf %90, %69 : vector<2x32xf32>
    %100 = arith.addf %98, %99 : vector<2x32xf32>
    %101 = vector.extract_strided_slice %5 {offsets = [6, 0], sizes = [2, 96], strides = [1, 1]} : vector<14x96xf32> to vector<2x96xf32>
    %c0_26 = arith.constant 0 : index
    %c0_27 = arith.constant 0 : index
    %102 = vector.load %arg4[%c0_26, %c0_27] : memref<32x96xf32, #tpu.memory_space<vmem>>, vector<32x96xf32>
    %cst_28 = arith.constant dense<0.000000e+00> : vector<2x96xf32>
    %103 = tpu.matmul %100, %102, %cst_28 {dimension_numbers = #tpu.dot_dimension_numbers<[1], [0], [0], [1], [0, 0, 1, 1], [], []>} : vector<2x32xf32>, vector<32x96xf32>, vector<2x96xf32> -> vector<2x96xf32>
    %104 = vector.broadcast %6 : vector<1x96xf32> to vector<2x96xf32>
    %105 = arith.addf %103, %104 : vector<2x96xf32>
    %106 = vector.extract_strided_slice %101 {offsets = [0, 0], sizes = [2, 32], strides = [1, 1]} : vector<2x96xf32> to vector<2x32xf32>
    %107 = vector.extract_strided_slice %105 {offsets = [0, 0], sizes = [2, 32], strides = [1, 1]} : vector<2x96xf32> to vector<2x32xf32>
    %108 = arith.addf %106, %107 : vector<2x32xf32>
    %109 = arith.negf %108 : vector<2x32xf32>
    %110 = math.exp %109 : vector<2x32xf32>
    %cst_29 = arith.constant 1.000000e+00 : f32
    %111 = vector.broadcast %cst_29 : f32 to vector<2x32xf32>
    %112 = arith.addf %111, %110 : vector<2x32xf32>
    %113 = arith.divf %111, %112 : vector<2x32xf32>
    %114 = vector.extract_strided_slice %101 {offsets = [0, 32], sizes = [2, 32], strides = [1, 1]} : vector<2x96xf32> to vector<2x32xf32>
    %115 = vector.extract_strided_slice %105 {offsets = [0, 32], sizes = [2, 32], strides = [1, 1]} : vector<2x96xf32> to vector<2x32xf32>
    %116 = arith.addf %114, %115 : vector<2x32xf32>
    %117 = arith.negf %116 : vector<2x32xf32>
    %118 = math.exp %117 : vector<2x32xf32>
    %cst_30 = arith.constant 1.000000e+00 : f32
    %119 = vector.broadcast %cst_30 : f32 to vector<2x32xf32>
    %120 = arith.addf %119, %118 : vector<2x32xf32>
    %121 = arith.divf %119, %120 : vector<2x32xf32>
    %122 = vector.extract_strided_slice %101 {offsets = [0, 64], sizes = [2, 32], strides = [1, 1]} : vector<2x96xf32> to vector<2x32xf32>
    %123 = vector.extract_strided_slice %105 {offsets = [0, 64], sizes = [2, 32], strides = [1, 1]} : vector<2x96xf32> to vector<2x32xf32>
    %124 = arith.mulf %113, %123 : vector<2x32xf32>
    %125 = arith.addf %122, %124 : vector<2x32xf32>
    %126 = math.tanh %125 : vector<2x32xf32>
    %cst_31 = arith.constant 1.000000e+00 : f32
    %127 = vector.broadcast %cst_31 : f32 to vector<2x32xf32>
    %128 = arith.subf %127, %121 : vector<2x32xf32>
    %129 = arith.mulf %128, %126 : vector<2x32xf32>
    %130 = arith.mulf %121, %100 : vector<2x32xf32>
    %131 = arith.addf %129, %130 : vector<2x32xf32>
    %132 = vector.extract_strided_slice %5 {offsets = [8, 0], sizes = [2, 96], strides = [1, 1]} : vector<14x96xf32> to vector<2x96xf32>
    %c0_32 = arith.constant 0 : index
    %c0_33 = arith.constant 0 : index
    %133 = vector.load %arg4[%c0_32, %c0_33] : memref<32x96xf32, #tpu.memory_space<vmem>>, vector<32x96xf32>
    %cst_34 = arith.constant dense<0.000000e+00> : vector<2x96xf32>
    %134 = tpu.matmul %131, %133, %cst_34 {dimension_numbers = #tpu.dot_dimension_numbers<[1], [0], [0], [1], [0, 0, 1, 1], [], []>} : vector<2x32xf32>, vector<32x96xf32>, vector<2x96xf32> -> vector<2x96xf32>
    %135 = vector.broadcast %6 : vector<1x96xf32> to vector<2x96xf32>
    %136 = arith.addf %134, %135 : vector<2x96xf32>
    %137 = vector.extract_strided_slice %132 {offsets = [0, 0], sizes = [2, 32], strides = [1, 1]} : vector<2x96xf32> to vector<2x32xf32>
    %138 = vector.extract_strided_slice %136 {offsets = [0, 0], sizes = [2, 32], strides = [1, 1]} : vector<2x96xf32> to vector<2x32xf32>
    %139 = arith.addf %137, %138 : vector<2x32xf32>
    %140 = arith.negf %139 : vector<2x32xf32>
    %141 = math.exp %140 : vector<2x32xf32>
    %cst_35 = arith.constant 1.000000e+00 : f32
    %142 = vector.broadcast %cst_35 : f32 to vector<2x32xf32>
    %143 = arith.addf %142, %141 : vector<2x32xf32>
    %144 = arith.divf %142, %143 : vector<2x32xf32>
    %145 = vector.extract_strided_slice %132 {offsets = [0, 32], sizes = [2, 32], strides = [1, 1]} : vector<2x96xf32> to vector<2x32xf32>
    %146 = vector.extract_strided_slice %136 {offsets = [0, 32], sizes = [2, 32], strides = [1, 1]} : vector<2x96xf32> to vector<2x32xf32>
    %147 = arith.addf %145, %146 : vector<2x32xf32>
    %148 = arith.negf %147 : vector<2x32xf32>
    %149 = math.exp %148 : vector<2x32xf32>
    %cst_36 = arith.constant 1.000000e+00 : f32
    %150 = vector.broadcast %cst_36 : f32 to vector<2x32xf32>
    %151 = arith.addf %150, %149 : vector<2x32xf32>
    %152 = arith.divf %150, %151 : vector<2x32xf32>
    %153 = vector.extract_strided_slice %132 {offsets = [0, 64], sizes = [2, 32], strides = [1, 1]} : vector<2x96xf32> to vector<2x32xf32>
    %154 = vector.extract_strided_slice %136 {offsets = [0, 64], sizes = [2, 32], strides = [1, 1]} : vector<2x96xf32> to vector<2x32xf32>
    %155 = arith.mulf %144, %154 : vector<2x32xf32>
    %156 = arith.addf %153, %155 : vector<2x32xf32>
    %157 = math.tanh %156 : vector<2x32xf32>
    %cst_37 = arith.constant 1.000000e+00 : f32
    %158 = vector.broadcast %cst_37 : f32 to vector<2x32xf32>
    %159 = arith.subf %158, %152 : vector<2x32xf32>
    %160 = arith.mulf %159, %157 : vector<2x32xf32>
    %161 = arith.mulf %152, %131 : vector<2x32xf32>
    %162 = arith.addf %160, %161 : vector<2x32xf32>
    %163 = vector.extract_strided_slice %5 {offsets = [10, 0], sizes = [2, 96], strides = [1, 1]} : vector<14x96xf32> to vector<2x96xf32>
    %c0_38 = arith.constant 0 : index
    %c0_39 = arith.constant 0 : index
    %164 = vector.load %arg4[%c0_38, %c0_39] : memref<32x96xf32, #tpu.memory_space<vmem>>, vector<32x96xf32>
    %cst_40 = arith.constant dense<0.000000e+00> : vector<2x96xf32>
    %165 = tpu.matmul %162, %164, %cst_40 {dimension_numbers = #tpu.dot_dimension_numbers<[1], [0], [0], [1], [0, 0, 1, 1], [], []>} : vector<2x32xf32>, vector<32x96xf32>, vector<2x96xf32> -> vector<2x96xf32>
    %166 = vector.broadcast %6 : vector<1x96xf32> to vector<2x96xf32>
    %167 = arith.addf %165, %166 : vector<2x96xf32>
    %168 = vector.extract_strided_slice %163 {offsets = [0, 0], sizes = [2, 32], strides = [1, 1]} : vector<2x96xf32> to vector<2x32xf32>
    %169 = vector.extract_strided_slice %167 {offsets = [0, 0], sizes = [2, 32], strides = [1, 1]} : vector<2x96xf32> to vector<2x32xf32>
    %170 = arith.addf %168, %169 : vector<2x32xf32>
    %171 = arith.negf %170 : vector<2x32xf32>
    %172 = math.exp %171 : vector<2x32xf32>
    %cst_41 = arith.constant 1.000000e+00 : f32
    %173 = vector.broadcast %cst_41 : f32 to vector<2x32xf32>
    %174 = arith.addf %173, %172 : vector<2x32xf32>
    %175 = arith.divf %173, %174 : vector<2x32xf32>
    %176 = vector.extract_strided_slice %163 {offsets = [0, 32], sizes = [2, 32], strides = [1, 1]} : vector<2x96xf32> to vector<2x32xf32>
    %177 = vector.extract_strided_slice %167 {offsets = [0, 32], sizes = [2, 32], strides = [1, 1]} : vector<2x96xf32> to vector<2x32xf32>
    %178 = arith.addf %176, %177 : vector<2x32xf32>
    %179 = arith.negf %178 : vector<2x32xf32>
    %180 = math.exp %179 : vector<2x32xf32>
    %cst_42 = arith.constant 1.000000e+00 : f32
    %181 = vector.broadcast %cst_42 : f32 to vector<2x32xf32>
    %182 = arith.addf %181, %180 : vector<2x32xf32>
    %183 = arith.divf %181, %182 : vector<2x32xf32>
    %184 = vector.extract_strided_slice %163 {offsets = [0, 64], sizes = [2, 32], strides = [1, 1]} : vector<2x96xf32> to vector<2x32xf32>
    %185 = vector.extract_strided_slice %167 {offsets = [0, 64], sizes = [2, 32], strides = [1, 1]} : vector<2x96xf32> to vector<2x32xf32>
    %186 = arith.mulf %175, %185 : vector<2x32xf32>
    %187 = arith.addf %184, %186 : vector<2x32xf32>
    %188 = math.tanh %187 : vector<2x32xf32>
    %cst_43 = arith.constant 1.000000e+00 : f32
    %189 = vector.broadcast %cst_43 : f32 to vector<2x32xf32>
    %190 = arith.subf %189, %183 : vector<2x32xf32>
    %191 = arith.mulf %190, %188 : vector<2x32xf32>
    %192 = arith.mulf %183, %162 : vector<2x32xf32>
    %193 = arith.addf %191, %192 : vector<2x32xf32>
    %194 = vector.extract_strided_slice %5 {offsets = [12, 0], sizes = [2, 96], strides = [1, 1]} : vector<14x96xf32> to vector<2x96xf32>
    %c0_44 = arith.constant 0 : index
    %c0_45 = arith.constant 0 : index
    %195 = vector.load %arg4[%c0_44, %c0_45] : memref<32x96xf32, #tpu.memory_space<vmem>>, vector<32x96xf32>
    %cst_46 = arith.constant dense<0.000000e+00> : vector<2x96xf32>
    %196 = tpu.matmul %193, %195, %cst_46 {dimension_numbers = #tpu.dot_dimension_numbers<[1], [0], [0], [1], [0, 0, 1, 1], [], []>} : vector<2x32xf32>, vector<32x96xf32>, vector<2x96xf32> -> vector<2x96xf32>
    %197 = vector.broadcast %6 : vector<1x96xf32> to vector<2x96xf32>
    %198 = arith.addf %196, %197 : vector<2x96xf32>
    %199 = vector.extract_strided_slice %194 {offsets = [0, 0], sizes = [2, 32], strides = [1, 1]} : vector<2x96xf32> to vector<2x32xf32>
    %200 = vector.extract_strided_slice %198 {offsets = [0, 0], sizes = [2, 32], strides = [1, 1]} : vector<2x96xf32> to vector<2x32xf32>
    %201 = arith.addf %199, %200 : vector<2x32xf32>
    %202 = arith.negf %201 : vector<2x32xf32>
    %203 = math.exp %202 : vector<2x32xf32>
    %cst_47 = arith.constant 1.000000e+00 : f32
    %204 = vector.broadcast %cst_47 : f32 to vector<2x32xf32>
    %205 = arith.addf %204, %203 : vector<2x32xf32>
    %206 = arith.divf %204, %205 : vector<2x32xf32>
    %207 = vector.extract_strided_slice %194 {offsets = [0, 32], sizes = [2, 32], strides = [1, 1]} : vector<2x96xf32> to vector<2x32xf32>
    %208 = vector.extract_strided_slice %198 {offsets = [0, 32], sizes = [2, 32], strides = [1, 1]} : vector<2x96xf32> to vector<2x32xf32>
    %209 = arith.addf %207, %208 : vector<2x32xf32>
    %210 = arith.negf %209 : vector<2x32xf32>
    %211 = math.exp %210 : vector<2x32xf32>
    %cst_48 = arith.constant 1.000000e+00 : f32
    %212 = vector.broadcast %cst_48 : f32 to vector<2x32xf32>
    %213 = arith.addf %212, %211 : vector<2x32xf32>
    %214 = arith.divf %212, %213 : vector<2x32xf32>
    %215 = vector.extract_strided_slice %194 {offsets = [0, 64], sizes = [2, 32], strides = [1, 1]} : vector<2x96xf32> to vector<2x32xf32>
    %216 = vector.extract_strided_slice %198 {offsets = [0, 64], sizes = [2, 32], strides = [1, 1]} : vector<2x96xf32> to vector<2x32xf32>
    %217 = arith.mulf %206, %216 : vector<2x32xf32>
    %218 = arith.addf %215, %217 : vector<2x32xf32>
    %219 = math.tanh %218 : vector<2x32xf32>
    %cst_49 = arith.constant 1.000000e+00 : f32
    %220 = vector.broadcast %cst_49 : f32 to vector<2x32xf32>
    %221 = arith.subf %220, %214 : vector<2x32xf32>
    %222 = arith.mulf %221, %219 : vector<2x32xf32>
    %223 = arith.mulf %214, %193 : vector<2x32xf32>
    %224 = arith.addf %222, %223 : vector<2x32xf32>
    %c0_50 = arith.constant 0 : index
    %c0_51 = arith.constant 0 : index
    %225 = vector.load %arg8[%c0_50, %c0_51] : memref<32x96xf32, #tpu.memory_space<vmem>>, vector<32x96xf32>
    %cst_52 = arith.constant dense<0.000000e+00> : vector<2x96xf32>
    %226 = tpu.matmul %224, %225, %cst_52 {dimension_numbers = #tpu.dot_dimension_numbers<[1], [0], [0], [1], [0, 0, 1, 1], [], []>} : vector<2x32xf32>, vector<32x96xf32>, vector<2x96xf32> -> vector<2x96xf32>
    %c0_53 = arith.constant 0 : index
    %c0_54 = arith.constant 0 : index
    %227 = vector.load %arg10[%c0_53, %c0_54] : memref<1x96xf32, #tpu.memory_space<vmem>>, vector<1x96xf32>
    %228 = vector.broadcast %227 : vector<1x96xf32> to vector<2x96xf32>
    %229 = arith.addf %226, %228 : vector<2x96xf32>
    %c0_55 = arith.constant 0 : index
    %c0_56 = arith.constant 0 : index
    %230 = vector.load %arg13[%c0_55, %c0_56] : memref<32x128xf32, #tpu.memory_space<vmem>>, vector<32x128xf32>
    %cst_57 = arith.constant dense<0.000000e+00> : vector<2x128xf32>
    %231 = tpu.matmul %224, %230, %cst_57 {dimension_numbers = #tpu.dot_dimension_numbers<[1], [0], [0], [1], [0, 0, 1, 1], [], []>} : vector<2x32xf32>, vector<32x128xf32>, vector<2x128xf32> -> vector<2x128xf32>
    %c0_58 = arith.constant 0 : index
    %c0_59 = arith.constant 0 : index
    %232 = vector.load %arg14[%c0_58, %c0_59] : memref<1x128xf32, #tpu.memory_space<vmem>>, vector<1x128xf32>
    %233 = vector.broadcast %232 : vector<1x128xf32> to vector<2x128xf32>
    %234 = arith.addf %231, %233 : vector<2x128xf32>
    %c0_60 = arith.constant 0 : index
    %c0_61 = arith.constant 0 : index
    %235 = vector.load %arg11[%c0_60, %c0_61] : memref<1x96xf32, #tpu.memory_space<vmem>>, vector<1x96xf32>
    %236 = tpu.iota {dimensions = array<i32: 1>} : vector<2x128xi32>
    %cst_62 = arith.constant 0.000000e+00 : f32
    %237 = vector.broadcast %cst_62 : f32 to vector<2x128xf32>
    %c0_63 = arith.constant 0 : index
    %c0_64 = arith.constant 0 : index
    %c0_65 = arith.constant 0 : index
    %238 = vector.load %arg15[%c0_63, %c0_64, %c0_65] : memref<8x2x128xf32, #tpu.memory_space<vmem>>, vector<1x2x128xf32>
    %239 = vector.shape_cast %238 : vector<1x2x128xf32> to vector<2x128xf32>
    %240 = vector.shape_cast %237 : vector<2x128xf32> to vector<1x2x128xf32>
    tpu.vector_store %arg15[%c0_63, %c0_64, %c0_65], %240 {strides = array<i32>} : memref<8x2x128xf32, #tpu.memory_space<vmem>>, vector<1x2x128xf32>,
    %c0_66 = arith.constant 0 : index
    %c0_67 = arith.constant 0 : index
    %c0_68 = arith.constant 0 : index
    %241 = vector.load %arg1[%c0_66, %c0_67, %c0_68] : memref<8x2x128xf32, #tpu.memory_space<vmem>>, vector<1x2x128xf32>
    %242 = vector.shape_cast %241 : vector<1x2x128xf32> to vector<2x128xf32>
    %c0_69 = arith.constant 0 : index
    %c0_70 = arith.constant 0 : index
    %243 = vector.load %arg7[%c0_69, %c0_70] : memref<128x256xf32, #tpu.memory_space<vmem>>, vector<128x256xf32>
    %cst_71 = arith.constant dense<0.000000e+00> : vector<2x256xf32>
    %244 = tpu.matmul %242, %243, %cst_71 {dimension_numbers = #tpu.dot_dimension_numbers<[1], [0], [0], [1], [0, 0, 1, 1], [], []>} : vector<2x128xf32>, vector<128x256xf32>, vector<2x256xf32> -> vector<2x256xf32>
    %245 = vector.extract_strided_slice %244 {offsets = [0, 0], sizes = [2, 96], strides = [1, 1]} : vector<2x256xf32> to vector<2x96xf32>
    %246 = arith.addf %245, %229 : vector<2x96xf32>
    %c0_72 = arith.constant 0 : index
    %c0_73 = arith.constant 0 : index
    %247 = vector.load %arg9[%c0_72, %c0_73] : memref<32x96xf32, #tpu.memory_space<vmem>>, vector<32x96xf32>
    %cst_74 = arith.constant dense<0.000000e+00> : vector<2x96xf32>
    %248 = tpu.matmul %224, %247, %cst_74 {dimension_numbers = #tpu.dot_dimension_numbers<[1], [0], [0], [1], [0, 0, 1, 1], [], []>} : vector<2x32xf32>, vector<32x96xf32>, vector<2x96xf32> -> vector<2x96xf32>
    %249 = vector.broadcast %235 : vector<1x96xf32> to vector<2x96xf32>
    %250 = arith.addf %248, %249 : vector<2x96xf32>
    %251 = vector.extract_strided_slice %246 {offsets = [0, 0], sizes = [2, 32], strides = [1, 1]} : vector<2x96xf32> to vector<2x32xf32>
    %252 = vector.extract_strided_slice %250 {offsets = [0, 0], sizes = [2, 32], strides = [1, 1]} : vector<2x96xf32> to vector<2x32xf32>
    %253 = arith.addf %251, %252 : vector<2x32xf32>
    %254 = arith.negf %253 : vector<2x32xf32>
    %255 = math.exp %254 : vector<2x32xf32>
    %cst_75 = arith.constant 1.000000e+00 : f32
    %256 = vector.broadcast %cst_75 : f32 to vector<2x32xf32>
    %257 = arith.addf %256, %255 : vector<2x32xf32>
    %258 = arith.divf %256, %257 : vector<2x32xf32>
    %259 = vector.extract_strided_slice %246 {offsets = [0, 32], sizes = [2, 32], strides = [1, 1]} : vector<2x96xf32> to vector<2x32xf32>
    %260 = vector.extract_strided_slice %250 {offsets = [0, 32], sizes = [2, 32], strides = [1, 1]} : vector<2x96xf32> to vector<2x32xf32>
    %261 = arith.addf %259, %260 : vector<2x32xf32>
    %262 = arith.negf %261 : vector<2x32xf32>
    %263 = math.exp %262 : vector<2x32xf32>
    %cst_76 = arith.constant 1.000000e+00 : f32
    %264 = vector.broadcast %cst_76 : f32 to vector<2x32xf32>
    %265 = arith.addf %264, %263 : vector<2x32xf32>
    %266 = arith.divf %264, %265 : vector<2x32xf32>
    %267 = vector.extract_strided_slice %246 {offsets = [0, 64], sizes = [2, 32], strides = [1, 1]} : vector<2x96xf32> to vector<2x32xf32>
    %268 = vector.extract_strided_slice %250 {offsets = [0, 64], sizes = [2, 32], strides = [1, 1]} : vector<2x96xf32> to vector<2x32xf32>
    %269 = arith.mulf %258, %268 : vector<2x32xf32>
    %270 = arith.addf %267, %269 : vector<2x32xf32>
    %271 = math.tanh %270 : vector<2x32xf32>
    %cst_77 = arith.constant 1.000000e+00 : f32
    %272 = vector.broadcast %cst_77 : f32 to vector<2x32xf32>
    %273 = arith.subf %272, %266 : vector<2x32xf32>
    %274 = arith.mulf %273, %271 : vector<2x32xf32>
    %275 = arith.mulf %266, %224 : vector<2x32xf32>
    %276 = arith.addf %274, %275 : vector<2x32xf32>
    %277 = vector.extract_strided_slice %244 {offsets = [0, 128], sizes = [2, 128], strides = [1, 1]} : vector<2x256xf32> to vector<2x128xf32>
    %c0_78 = arith.constant 0 : index
    %c0_79 = arith.constant 0 : index
    %278 = vector.load %arg12[%c0_78, %c0_79] : memref<32x128xf32, #tpu.memory_space<vmem>>, vector<32x128xf32>
    %cst_80 = arith.constant dense<0.000000e+00> : vector<2x128xf32>
    %279 = tpu.matmul %276, %278, %cst_80 {dimension_numbers = #tpu.dot_dimension_numbers<[1], [0], [0], [1], [0, 0, 1, 1], [], []>} : vector<2x32xf32>, vector<32x128xf32>, vector<2x128xf32> -> vector<2x128xf32>
    %280 = arith.addf %277, %279 : vector<2x128xf32>
    %281 = arith.addf %280, %234 : vector<2x128xf32>
    %c1 = arith.constant 1 : index
    %c0_81 = arith.constant 0 : index
    %c0_82 = arith.constant 0 : index
    %282 = vector.load %arg15[%c1, %c0_81, %c0_82] : memref<8x2x128xf32, #tpu.memory_space<vmem>>, vector<1x2x128xf32>
    %283 = vector.shape_cast %282 : vector<1x2x128xf32> to vector<2x128xf32>
    %284 = vector.shape_cast %281 : vector<2x128xf32> to vector<1x2x128xf32>
    tpu.vector_store %arg15[%c1, %c0_81, %c0_82], %284 {strides = array<i32>} : memref<8x2x128xf32, #tpu.memory_space<vmem>>, vector<1x2x128xf32>,
    %cst_83 = arith.constant dense<0xFF800000> : vector<2xf32>
    %285 = vector.multi_reduction <maximumf>, %281, %cst_83 [1] : vector<2x128xf32> to vector<2xf32>
    %286 = vector.shape_cast %285 : vector<2xf32> to vector<2x1xf32>
    %287 = vector.broadcast %286 : vector<2x1xf32> to vector<2x128xf32>
    %288 = arith.cmpf oeq, %281, %287 : vector<2x128xf32>
    %c128_i32 = arith.constant 128 : i32
    %289 = vector.broadcast %c128_i32 : i32 to vector<2x128xi32>
    %290 = arith.select %288, %236, %289 : vector<2x128xi1>, vector<2x128xi32>
    %cst_84 = arith.constant dense<2147483647> : vector<2xi32>
    %291 = vector.multi_reduction <minsi>, %290, %cst_84 [1] : vector<2x128xi32> to vector<2xi32>
    %292 = vector.shape_cast %291 : vector<2xi32> to vector<2x1xi32>
    %293 = vector.broadcast %292 : vector<2x1xi32> to vector<2x128xi32>
    %294 = arith.cmpi eq, %236, %293 : vector<2x128xi32>
    %295 = arith.extui %294 : vector<2x128xi1> to vector<2x128xi32>
    %296 = arith.sitofp %295 : vector<2x128xi32> to vector<2x128xf32>
    %c1_85 = arith.constant 1 : index
    %c0_86 = arith.constant 0 : index
    %297 = vector.load %arg2[%c1_85, %c0_86] : memref<8x1xf32, #tpu.memory_space<vmem>>, vector<1x1xf32>
    %298 = vector.shape_cast %297 : vector<1x1xf32> to vector<1xf32>
    %c1_87 = arith.constant 1 : index
    %c0_88 = arith.constant 0 : index
    %c0_89 = arith.constant 0 : index
    %299 = vector.load %arg1[%c1_87, %c0_88, %c0_89] : memref<8x2x128xf32, #tpu.memory_space<vmem>>, vector<1x2x128xf32>
    %300 = vector.shape_cast %299 : vector<1x2x128xf32> to vector<2x128xf32>
    %301 = vector.shape_cast %298 : vector<1xf32> to vector<1x1xf32>
    %302 = vector.broadcast %301 : vector<1x1xf32> to vector<2x128xf32>
    %303 = arith.mulf %302, %300 : vector<2x128xf32>
    %cst_90 = arith.constant 1.000000e+00 : f32
    %304 = vector.broadcast %cst_90 : f32 to vector<1xf32>
    %305 = arith.subf %304, %298 : vector<1xf32>
    %306 = vector.shape_cast %305 : vector<1xf32> to vector<1x1xf32>
    %307 = vector.broadcast %306 : vector<1x1xf32> to vector<2x128xf32>
    %308 = arith.mulf %307, %296 : vector<2x128xf32>
    %309 = arith.addf %303, %308 : vector<2x128xf32>
    %c0_91 = arith.constant 0 : index
    %c0_92 = arith.constant 0 : index
    %310 = vector.load %arg7[%c0_91, %c0_92] : memref<128x256xf32, #tpu.memory_space<vmem>>, vector<128x256xf32>
    %cst_93 = arith.constant dense<0.000000e+00> : vector<2x256xf32>
    %311 = tpu.matmul %309, %310, %cst_93 {dimension_numbers = #tpu.dot_dimension_numbers<[1], [0], [0], [1], [0, 0, 1, 1], [], []>} : vector<2x128xf32>, vector<128x256xf32>, vector<2x256xf32> -> vector<2x256xf32>
    %312 = vector.extract_strided_slice %311 {offsets = [0, 0], sizes = [2, 96], strides = [1, 1]} : vector<2x256xf32> to vector<2x96xf32>
    %313 = arith.addf %312, %229 : vector<2x96xf32>
    %c0_94 = arith.constant 0 : index
    %c0_95 = arith.constant 0 : index
    %314 = vector.load %arg9[%c0_94, %c0_95] : memref<32x96xf32, #tpu.memory_space<vmem>>, vector<32x96xf32>
    %cst_96 = arith.constant dense<0.000000e+00> : vector<2x96xf32>
    %315 = tpu.matmul %276, %314, %cst_96 {dimension_numbers = #tpu.dot_dimension_numbers<[1], [0], [0], [1], [0, 0, 1, 1], [], []>} : vector<2x32xf32>, vector<32x96xf32>, vector<2x96xf32> -> vector<2x96xf32>
    %316 = vector.broadcast %235 : vector<1x96xf32> to vector<2x96xf32>
    %317 = arith.addf %315, %316 : vector<2x96xf32>
    %318 = vector.extract_strided_slice %313 {offsets = [0, 0], sizes = [2, 32], strides = [1, 1]} : vector<2x96xf32> to vector<2x32xf32>
    %319 = vector.extract_strided_slice %317 {offsets = [0, 0], sizes = [2, 32], strides = [1, 1]} : vector<2x96xf32> to vector<2x32xf32>
    %320 = arith.addf %318, %319 : vector<2x32xf32>
    %321 = arith.negf %320 : vector<2x32xf32>
    %322 = math.exp %321 : vector<2x32xf32>
    %cst_97 = arith.constant 1.000000e+00 : f32
    %323 = vector.broadcast %cst_97 : f32 to vector<2x32xf32>
    %324 = arith.addf %323, %322 : vector<2x32xf32>
    %325 = arith.divf %323, %324 : vector<2x32xf32>
    %326 = vector.extract_strided_slice %313 {offsets = [0, 32], sizes = [2, 32], strides = [1, 1]} : vector<2x96xf32> to vector<2x32xf32>
    %327 = vector.extract_strided_slice %317 {offsets = [0, 32], sizes = [2, 32], strides = [1, 1]} : vector<2x96xf32> to vector<2x32xf32>
    %328 = arith.addf %326, %327 : vector<2x32xf32>
    %329 = arith.negf %328 : vector<2x32xf32>
    %330 = math.exp %329 : vector<2x32xf32>
    %cst_98 = arith.constant 1.000000e+00 : f32
    %331 = vector.broadcast %cst_98 : f32 to vector<2x32xf32>
    %332 = arith.addf %331, %330 : vector<2x32xf32>
    %333 = arith.divf %331, %332 : vector<2x32xf32>
    %334 = vector.extract_strided_slice %313 {offsets = [0, 64], sizes = [2, 32], strides = [1, 1]} : vector<2x96xf32> to vector<2x32xf32>
    %335 = vector.extract_strided_slice %317 {offsets = [0, 64], sizes = [2, 32], strides = [1, 1]} : vector<2x96xf32> to vector<2x32xf32>
    %336 = arith.mulf %325, %335 : vector<2x32xf32>
    %337 = arith.addf %334, %336 : vector<2x32xf32>
    %338 = math.tanh %337 : vector<2x32xf32>
    %cst_99 = arith.constant 1.000000e+00 : f32
    %339 = vector.broadcast %cst_99 : f32 to vector<2x32xf32>
    %340 = arith.subf %339, %333 : vector<2x32xf32>
    %341 = arith.mulf %340, %338 : vector<2x32xf32>
    %342 = arith.mulf %333, %276 : vector<2x32xf32>
    %343 = arith.addf %341, %342 : vector<2x32xf32>
    %344 = vector.extract_strided_slice %311 {offsets = [0, 128], sizes = [2, 128], strides = [1, 1]} : vector<2x256xf32> to vector<2x128xf32>
    %c0_100 = arith.constant 0 : index
    %c0_101 = arith.constant 0 : index
    %345 = vector.load %arg12[%c0_100, %c0_101] : memref<32x128xf32, #tpu.memory_space<vmem>>, vector<32x128xf32>
    %cst_102 = arith.constant dense<0.000000e+00> : vector<2x128xf32>
    %346 = tpu.matmul %343, %345, %cst_102 {dimension_numbers = #tpu.dot_dimension_numbers<[1], [0], [0], [1], [0, 0, 1, 1], [], []>} : vector<2x32xf32>, vector<32x128xf32>, vector<2x128xf32> -> vector<2x128xf32>
    %347 = arith.addf %344, %346 : vector<2x128xf32>
    %348 = arith.addf %347, %234 : vector<2x128xf32>
    %c2 = arith.constant 2 : index
    %c0_103 = arith.constant 0 : index
    %c0_104 = arith.constant 0 : index
    %349 = vector.load %arg15[%c2, %c0_103, %c0_104] : memref<8x2x128xf32, #tpu.memory_space<vmem>>, vector<1x2x128xf32>
    %350 = vector.shape_cast %349 : vector<1x2x128xf32> to vector<2x128xf32>
    %351 = vector.shape_cast %348 : vector<2x128xf32> to vector<1x2x128xf32>
    tpu.vector_store %arg15[%c2, %c0_103, %c0_104], %351 {strides = array<i32>} : memref<8x2x128xf32, #tpu.memory_space<vmem>>, vector<1x2x128xf32>,
    %cst_105 = arith.constant dense<0xFF800000> : vector<2xf32>
    %352 = vector.multi_reduction <maximumf>, %348, %cst_105 [1] : vector<2x128xf32> to vector<2xf32>
    %353 = vector.shape_cast %352 : vector<2xf32> to vector<2x1xf32>
    %354 = vector.broadcast %353 : vector<2x1xf32> to vector<2x128xf32>
    %355 = arith.cmpf oeq, %348, %354 : vector<2x128xf32>
    %c128_i32_106 = arith.constant 128 : i32
    %356 = vector.broadcast %c128_i32_106 : i32 to vector<2x128xi32>
    %357 = arith.select %355, %236, %356 : vector<2x128xi1>, vector<2x128xi32>
    %cst_107 = arith.constant dense<2147483647> : vector<2xi32>
    %358 = vector.multi_reduction <minsi>, %357, %cst_107 [1] : vector<2x128xi32> to vector<2xi32>
    %359 = vector.shape_cast %358 : vector<2xi32> to vector<2x1xi32>
    %360 = vector.broadcast %359 : vector<2x1xi32> to vector<2x128xi32>
    %361 = arith.cmpi eq, %236, %360 : vector<2x128xi32>
    %362 = arith.extui %361 : vector<2x128xi1> to vector<2x128xi32>
    %363 = arith.sitofp %362 : vector<2x128xi32> to vector<2x128xf32>
    %c2_108 = arith.constant 2 : index
    %c0_109 = arith.constant 0 : index
    %364 = vector.load %arg2[%c2_108, %c0_109] : memref<8x1xf32, #tpu.memory_space<vmem>>, vector<1x1xf32>
    %365 = vector.shape_cast %364 : vector<1x1xf32> to vector<1xf32>
    %c2_110 = arith.constant 2 : index
    %c0_111 = arith.constant 0 : index
    %c0_112 = arith.constant 0 : index
    %366 = vector.load %arg1[%c2_110, %c0_111, %c0_112] : memref<8x2x128xf32, #tpu.memory_space<vmem>>, vector<1x2x128xf32>
    %367 = vector.shape_cast %366 : vector<1x2x128xf32> to vector<2x128xf32>
    %368 = vector.shape_cast %365 : vector<1xf32> to vector<1x1xf32>
    %369 = vector.broadcast %368 : vector<1x1xf32> to vector<2x128xf32>
    %370 = arith.mulf %369, %367 : vector<2x128xf32>
    %cst_113 = arith.constant 1.000000e+00 : f32
    %371 = vector.broadcast %cst_113 : f32 to vector<1xf32>
    %372 = arith.subf %371, %365 : vector<1xf32>
    %373 = vector.shape_cast %372 : vector<1xf32> to vector<1x1xf32>
    %374 = vector.broadcast %373 : vector<1x1xf32> to vector<2x128xf32>
    %375 = arith.mulf %374, %363 : vector<2x128xf32>
    %376 = arith.addf %370, %375 : vector<2x128xf32>
    %c0_114 = arith.constant 0 : index
    %c0_115 = arith.constant 0 : index
    %377 = vector.load %arg7[%c0_114, %c0_115] : memref<128x256xf32, #tpu.memory_space<vmem>>, vector<128x256xf32>
    %cst_116 = arith.constant dense<0.000000e+00> : vector<2x256xf32>
    %378 = tpu.matmul %376, %377, %cst_116 {dimension_numbers = #tpu.dot_dimension_numbers<[1], [0], [0], [1], [0, 0, 1, 1], [], []>} : vector<2x128xf32>, vector<128x256xf32>, vector<2x256xf32> -> vector<2x256xf32>
    %379 = vector.extract_strided_slice %378 {offsets = [0, 0], sizes = [2, 96], strides = [1, 1]} : vector<2x256xf32> to vector<2x96xf32>
    %380 = arith.addf %379, %229 : vector<2x96xf32>
    %c0_117 = arith.constant 0 : index
    %c0_118 = arith.constant 0 : index
    %381 = vector.load %arg9[%c0_117, %c0_118] : memref<32x96xf32, #tpu.memory_space<vmem>>, vector<32x96xf32>
    %cst_119 = arith.constant dense<0.000000e+00> : vector<2x96xf32>
    %382 = tpu.matmul %343, %381, %cst_119 {dimension_numbers = #tpu.dot_dimension_numbers<[1], [0], [0], [1], [0, 0, 1, 1], [], []>} : vector<2x32xf32>, vector<32x96xf32>, vector<2x96xf32> -> vector<2x96xf32>
    %383 = vector.broadcast %235 : vector<1x96xf32> to vector<2x96xf32>
    %384 = arith.addf %382, %383 : vector<2x96xf32>
    %385 = vector.extract_strided_slice %380 {offsets = [0, 0], sizes = [2, 32], strides = [1, 1]} : vector<2x96xf32> to vector<2x32xf32>
    %386 = vector.extract_strided_slice %384 {offsets = [0, 0], sizes = [2, 32], strides = [1, 1]} : vector<2x96xf32> to vector<2x32xf32>
    %387 = arith.addf %385, %386 : vector<2x32xf32>
    %388 = arith.negf %387 : vector<2x32xf32>
    %389 = math.exp %388 : vector<2x32xf32>
    %cst_120 = arith.constant 1.000000e+00 : f32
    %390 = vector.broadcast %cst_120 : f32 to vector<2x32xf32>
    %391 = arith.addf %390, %389 : vector<2x32xf32>
    %392 = arith.divf %390, %391 : vector<2x32xf32>
    %393 = vector.extract_strided_slice %380 {offsets = [0, 32], sizes = [2, 32], strides = [1, 1]} : vector<2x96xf32> to vector<2x32xf32>
    %394 = vector.extract_strided_slice %384 {offsets = [0, 32], sizes = [2, 32], strides = [1, 1]} : vector<2x96xf32> to vector<2x32xf32>
    %395 = arith.addf %393, %394 : vector<2x32xf32>
    %396 = arith.negf %395 : vector<2x32xf32>
    %397 = math.exp %396 : vector<2x32xf32>
    %cst_121 = arith.constant 1.000000e+00 : f32
    %398 = vector.broadcast %cst_121 : f32 to vector<2x32xf32>
    %399 = arith.addf %398, %397 : vector<2x32xf32>
    %400 = arith.divf %398, %399 : vector<2x32xf32>
    %401 = vector.extract_strided_slice %380 {offsets = [0, 64], sizes = [2, 32], strides = [1, 1]} : vector<2x96xf32> to vector<2x32xf32>
    %402 = vector.extract_strided_slice %384 {offsets = [0, 64], sizes = [2, 32], strides = [1, 1]} : vector<2x96xf32> to vector<2x32xf32>
    %403 = arith.mulf %392, %402 : vector<2x32xf32>
    %404 = arith.addf %401, %403 : vector<2x32xf32>
    %405 = math.tanh %404 : vector<2x32xf32>
    %cst_122 = arith.constant 1.000000e+00 : f32
    %406 = vector.broadcast %cst_122 : f32 to vector<2x32xf32>
    %407 = arith.subf %406, %400 : vector<2x32xf32>
    %408 = arith.mulf %407, %405 : vector<2x32xf32>
    %409 = arith.mulf %400, %343 : vector<2x32xf32>
    %410 = arith.addf %408, %409 : vector<2x32xf32>
    %411 = vector.extract_strided_slice %378 {offsets = [0, 128], sizes = [2, 128], strides = [1, 1]} : vector<2x256xf32> to vector<2x128xf32>
    %c0_123 = arith.constant 0 : index
    %c0_124 = arith.constant 0 : index
    %412 = vector.load %arg12[%c0_123, %c0_124] : memref<32x128xf32, #tpu.memory_space<vmem>>, vector<32x128xf32>
    %cst_125 = arith.constant dense<0.000000e+00> : vector<2x128xf32>
    %413 = tpu.matmul %410, %412, %cst_125 {dimension_numbers = #tpu.dot_dimension_numbers<[1], [0], [0], [1], [0, 0, 1, 1], [], []>} : vector<2x32xf32>, vector<32x128xf32>, vector<2x128xf32> -> vector<2x128xf32>
    %414 = arith.addf %411, %413 : vector<2x128xf32>
    %415 = arith.addf %414, %234 : vector<2x128xf32>
    %c3 = arith.constant 3 : index
    %c0_126 = arith.constant 0 : index
    %c0_127 = arith.constant 0 : index
    %416 = vector.load %arg15[%c3, %c0_126, %c0_127] : memref<8x2x128xf32, #tpu.memory_space<vmem>>, vector<1x2x128xf32>
    %417 = vector.shape_cast %416 : vector<1x2x128xf32> to vector<2x128xf32>
    %418 = vector.shape_cast %415 : vector<2x128xf32> to vector<1x2x128xf32>
    tpu.vector_store %arg15[%c3, %c0_126, %c0_127], %418 {strides = array<i32>} : memref<8x2x128xf32, #tpu.memory_space<vmem>>, vector<1x2x128xf32>,
    %cst_128 = arith.constant dense<0xFF800000> : vector<2xf32>
    %419 = vector.multi_reduction <maximumf>, %415, %cst_128 [1] : vector<2x128xf32> to vector<2xf32>
    %420 = vector.shape_cast %419 : vector<2xf32> to vector<2x1xf32>
    %421 = vector.broadcast %420 : vector<2x1xf32> to vector<2x128xf32>
    %422 = arith.cmpf oeq, %415, %421 : vector<2x128xf32>
    %c128_i32_129 = arith.constant 128 : i32
    %423 = vector.broadcast %c128_i32_129 : i32 to vector<2x128xi32>
    %424 = arith.select %422, %236, %423 : vector<2x128xi1>, vector<2x128xi32>
    %cst_130 = arith.constant dense<2147483647> : vector<2xi32>
    %425 = vector.multi_reduction <minsi>, %424, %cst_130 [1] : vector<2x128xi32> to vector<2xi32>
    %426 = vector.shape_cast %425 : vector<2xi32> to vector<2x1xi32>
    %427 = vector.broadcast %426 : vector<2x1xi32> to vector<2x128xi32>
    %428 = arith.cmpi eq, %236, %427 : vector<2x128xi32>
    %429 = arith.extui %428 : vector<2x128xi1> to vector<2x128xi32>
    %430 = arith.sitofp %429 : vector<2x128xi32> to vector<2x128xf32>
    %c3_131 = arith.constant 3 : index
    %c0_132 = arith.constant 0 : index
    %431 = vector.load %arg2[%c3_131, %c0_132] : memref<8x1xf32, #tpu.memory_space<vmem>>, vector<1x1xf32>
    %432 = vector.shape_cast %431 : vector<1x1xf32> to vector<1xf32>
    %c3_133 = arith.constant 3 : index
    %c0_134 = arith.constant 0 : index
    %c0_135 = arith.constant 0 : index
    %433 = vector.load %arg1[%c3_133, %c0_134, %c0_135] : memref<8x2x128xf32, #tpu.memory_space<vmem>>, vector<1x2x128xf32>
    %434 = vector.shape_cast %433 : vector<1x2x128xf32> to vector<2x128xf32>
    %435 = vector.shape_cast %432 : vector<1xf32> to vector<1x1xf32>
    %436 = vector.broadcast %435 : vector<1x1xf32> to vector<2x128xf32>
    %437 = arith.mulf %436, %434 : vector<2x128xf32>
    %cst_136 = arith.constant 1.000000e+00 : f32
    %438 = vector.broadcast %cst_136 : f32 to vector<1xf32>
    %439 = arith.subf %438, %432 : vector<1xf32>
    %440 = vector.shape_cast %439 : vector<1xf32> to vector<1x1xf32>
    %441 = vector.broadcast %440 : vector<1x1xf32> to vector<2x128xf32>
    %442 = arith.mulf %441, %430 : vector<2x128xf32>
    %443 = arith.addf %437, %442 : vector<2x128xf32>
    %c0_137 = arith.constant 0 : index
    %c0_138 = arith.constant 0 : index
    %444 = vector.load %arg7[%c0_137, %c0_138] : memref<128x256xf32, #tpu.memory_space<vmem>>, vector<128x256xf32>
    %cst_139 = arith.constant dense<0.000000e+00> : vector<2x256xf32>
    %445 = tpu.matmul %443, %444, %cst_139 {dimension_numbers = #tpu.dot_dimension_numbers<[1], [0], [0], [1], [0, 0, 1, 1], [], []>} : vector<2x128xf32>, vector<128x256xf32>, vector<2x256xf32> -> vector<2x256xf32>
    %446 = vector.extract_strided_slice %445 {offsets = [0, 0], sizes = [2, 96], strides = [1, 1]} : vector<2x256xf32> to vector<2x96xf32>
    %447 = arith.addf %446, %229 : vector<2x96xf32>
    %c0_140 = arith.constant 0 : index
    %c0_141 = arith.constant 0 : index
    %448 = vector.load %arg9[%c0_140, %c0_141] : memref<32x96xf32, #tpu.memory_space<vmem>>, vector<32x96xf32>
    %cst_142 = arith.constant dense<0.000000e+00> : vector<2x96xf32>
    %449 = tpu.matmul %410, %448, %cst_142 {dimension_numbers = #tpu.dot_dimension_numbers<[1], [0], [0], [1], [0, 0, 1, 1], [], []>} : vector<2x32xf32>, vector<32x96xf32>, vector<2x96xf32> -> vector<2x96xf32>
    %450 = vector.broadcast %235 : vector<1x96xf32> to vector<2x96xf32>
    %451 = arith.addf %449, %450 : vector<2x96xf32>
    %452 = vector.extract_strided_slice %447 {offsets = [0, 0], sizes = [2, 32], strides = [1, 1]} : vector<2x96xf32> to vector<2x32xf32>
    %453 = vector.extract_strided_slice %451 {offsets = [0, 0], sizes = [2, 32], strides = [1, 1]} : vector<2x96xf32> to vector<2x32xf32>
    %454 = arith.addf %452, %453 : vector<2x32xf32>
    %455 = arith.negf %454 : vector<2x32xf32>
    %456 = math.exp %455 : vector<2x32xf32>
    %cst_143 = arith.constant 1.000000e+00 : f32
    %457 = vector.broadcast %cst_143 : f32 to vector<2x32xf32>
    %458 = arith.addf %457, %456 : vector<2x32xf32>
    %459 = arith.divf %457, %458 : vector<2x32xf32>
    %460 = vector.extract_strided_slice %447 {offsets = [0, 32], sizes = [2, 32], strides = [1, 1]} : vector<2x96xf32> to vector<2x32xf32>
    %461 = vector.extract_strided_slice %451 {offsets = [0, 32], sizes = [2, 32], strides = [1, 1]} : vector<2x96xf32> to vector<2x32xf32>
    %462 = arith.addf %460, %461 : vector<2x32xf32>
    %463 = arith.negf %462 : vector<2x32xf32>
    %464 = math.exp %463 : vector<2x32xf32>
    %cst_144 = arith.constant 1.000000e+00 : f32
    %465 = vector.broadcast %cst_144 : f32 to vector<2x32xf32>
    %466 = arith.addf %465, %464 : vector<2x32xf32>
    %467 = arith.divf %465, %466 : vector<2x32xf32>
    %468 = vector.extract_strided_slice %447 {offsets = [0, 64], sizes = [2, 32], strides = [1, 1]} : vector<2x96xf32> to vector<2x32xf32>
    %469 = vector.extract_strided_slice %451 {offsets = [0, 64], sizes = [2, 32], strides = [1, 1]} : vector<2x96xf32> to vector<2x32xf32>
    %470 = arith.mulf %459, %469 : vector<2x32xf32>
    %471 = arith.addf %468, %470 : vector<2x32xf32>
    %472 = math.tanh %471 : vector<2x32xf32>
    %cst_145 = arith.constant 1.000000e+00 : f32
    %473 = vector.broadcast %cst_145 : f32 to vector<2x32xf32>
    %474 = arith.subf %473, %467 : vector<2x32xf32>
    %475 = arith.mulf %474, %472 : vector<2x32xf32>
    %476 = arith.mulf %467, %410 : vector<2x32xf32>
    %477 = arith.addf %475, %476 : vector<2x32xf32>
    %478 = vector.extract_strided_slice %445 {offsets = [0, 128], sizes = [2, 128], strides = [1, 1]} : vector<2x256xf32> to vector<2x128xf32>
    %c0_146 = arith.constant 0 : index
    %c0_147 = arith.constant 0 : index
    %479 = vector.load %arg12[%c0_146, %c0_147] : memref<32x128xf32, #tpu.memory_space<vmem>>, vector<32x128xf32>
    %cst_148 = arith.constant dense<0.000000e+00> : vector<2x128xf32>
    %480 = tpu.matmul %477, %479, %cst_148 {dimension_numbers = #tpu.dot_dimension_numbers<[1], [0], [0], [1], [0, 0, 1, 1], [], []>} : vector<2x32xf32>, vector<32x128xf32>, vector<2x128xf32> -> vector<2x128xf32>
    %481 = arith.addf %478, %480 : vector<2x128xf32>
    %482 = arith.addf %481, %234 : vector<2x128xf32>
    %c4 = arith.constant 4 : index
    %c0_149 = arith.constant 0 : index
    %c0_150 = arith.constant 0 : index
    %483 = vector.load %arg15[%c4, %c0_149, %c0_150] : memref<8x2x128xf32, #tpu.memory_space<vmem>>, vector<1x2x128xf32>
    %484 = vector.shape_cast %483 : vector<1x2x128xf32> to vector<2x128xf32>
    %485 = vector.shape_cast %482 : vector<2x128xf32> to vector<1x2x128xf32>
    tpu.vector_store %arg15[%c4, %c0_149, %c0_150], %485 {strides = array<i32>} : memref<8x2x128xf32, #tpu.memory_space<vmem>>, vector<1x2x128xf32>,
    %cst_151 = arith.constant dense<0xFF800000> : vector<2xf32>
    %486 = vector.multi_reduction <maximumf>, %482, %cst_151 [1] : vector<2x128xf32> to vector<2xf32>
    %487 = vector.shape_cast %486 : vector<2xf32> to vector<2x1xf32>
    %488 = vector.broadcast %487 : vector<2x1xf32> to vector<2x128xf32>
    %489 = arith.cmpf oeq, %482, %488 : vector<2x128xf32>
    %c128_i32_152 = arith.constant 128 : i32
    %490 = vector.broadcast %c128_i32_152 : i32 to vector<2x128xi32>
    %491 = arith.select %489, %236, %490 : vector<2x128xi1>, vector<2x128xi32>
    %cst_153 = arith.constant dense<2147483647> : vector<2xi32>
    %492 = vector.multi_reduction <minsi>, %491, %cst_153 [1] : vector<2x128xi32> to vector<2xi32>
    %493 = vector.shape_cast %492 : vector<2xi32> to vector<2x1xi32>
    %494 = vector.broadcast %493 : vector<2x1xi32> to vector<2x128xi32>
    %495 = arith.cmpi eq, %236, %494 : vector<2x128xi32>
    %496 = arith.extui %495 : vector<2x128xi1> to vector<2x128xi32>
    %497 = arith.sitofp %496 : vector<2x128xi32> to vector<2x128xf32>
    %c4_154 = arith.constant 4 : index
    %c0_155 = arith.constant 0 : index
    %498 = vector.load %arg2[%c4_154, %c0_155] : memref<8x1xf32, #tpu.memory_space<vmem>>, vector<1x1xf32>
    %499 = vector.shape_cast %498 : vector<1x1xf32> to vector<1xf32>
    %c4_156 = arith.constant 4 : index
    %c0_157 = arith.constant 0 : index
    %c0_158 = arith.constant 0 : index
    %500 = vector.load %arg1[%c4_156, %c0_157, %c0_158] : memref<8x2x128xf32, #tpu.memory_space<vmem>>, vector<1x2x128xf32>
    %501 = vector.shape_cast %500 : vector<1x2x128xf32> to vector<2x128xf32>
    %502 = vector.shape_cast %499 : vector<1xf32> to vector<1x1xf32>
    %503 = vector.broadcast %502 : vector<1x1xf32> to vector<2x128xf32>
    %504 = arith.mulf %503, %501 : vector<2x128xf32>
    %cst_159 = arith.constant 1.000000e+00 : f32
    %505 = vector.broadcast %cst_159 : f32 to vector<1xf32>
    %506 = arith.subf %505, %499 : vector<1xf32>
    %507 = vector.shape_cast %506 : vector<1xf32> to vector<1x1xf32>
    %508 = vector.broadcast %507 : vector<1x1xf32> to vector<2x128xf32>
    %509 = arith.mulf %508, %497 : vector<2x128xf32>
    %510 = arith.addf %504, %509 : vector<2x128xf32>
    %c0_160 = arith.constant 0 : index
    %c0_161 = arith.constant 0 : index
    %511 = vector.load %arg7[%c0_160, %c0_161] : memref<128x256xf32, #tpu.memory_space<vmem>>, vector<128x256xf32>
    %cst_162 = arith.constant dense<0.000000e+00> : vector<2x256xf32>
    %512 = tpu.matmul %510, %511, %cst_162 {dimension_numbers = #tpu.dot_dimension_numbers<[1], [0], [0], [1], [0, 0, 1, 1], [], []>} : vector<2x128xf32>, vector<128x256xf32>, vector<2x256xf32> -> vector<2x256xf32>
    %513 = vector.extract_strided_slice %512 {offsets = [0, 0], sizes = [2, 96], strides = [1, 1]} : vector<2x256xf32> to vector<2x96xf32>
    %514 = arith.addf %513, %229 : vector<2x96xf32>
    %c0_163 = arith.constant 0 : index
    %c0_164 = arith.constant 0 : index
    %515 = vector.load %arg9[%c0_163, %c0_164] : memref<32x96xf32, #tpu.memory_space<vmem>>, vector<32x96xf32>
    %cst_165 = arith.constant dense<0.000000e+00> : vector<2x96xf32>
    %516 = tpu.matmul %477, %515, %cst_165 {dimension_numbers = #tpu.dot_dimension_numbers<[1], [0], [0], [1], [0, 0, 1, 1], [], []>} : vector<2x32xf32>, vector<32x96xf32>, vector<2x96xf32> -> vector<2x96xf32>
    %517 = vector.broadcast %235 : vector<1x96xf32> to vector<2x96xf32>
    %518 = arith.addf %516, %517 : vector<2x96xf32>
    %519 = vector.extract_strided_slice %514 {offsets = [0, 0], sizes = [2, 32], strides = [1, 1]} : vector<2x96xf32> to vector<2x32xf32>
    %520 = vector.extract_strided_slice %518 {offsets = [0, 0], sizes = [2, 32], strides = [1, 1]} : vector<2x96xf32> to vector<2x32xf32>
    %521 = arith.addf %519, %520 : vector<2x32xf32>
    %522 = arith.negf %521 : vector<2x32xf32>
    %523 = math.exp %522 : vector<2x32xf32>
    %cst_166 = arith.constant 1.000000e+00 : f32
    %524 = vector.broadcast %cst_166 : f32 to vector<2x32xf32>
    %525 = arith.addf %524, %523 : vector<2x32xf32>
    %526 = arith.divf %524, %525 : vector<2x32xf32>
    %527 = vector.extract_strided_slice %514 {offsets = [0, 32], sizes = [2, 32], strides = [1, 1]} : vector<2x96xf32> to vector<2x32xf32>
    %528 = vector.extract_strided_slice %518 {offsets = [0, 32], sizes = [2, 32], strides = [1, 1]} : vector<2x96xf32> to vector<2x32xf32>
    %529 = arith.addf %527, %528 : vector<2x32xf32>
    %530 = arith.negf %529 : vector<2x32xf32>
    %531 = math.exp %530 : vector<2x32xf32>
    %cst_167 = arith.constant 1.000000e+00 : f32
    %532 = vector.broadcast %cst_167 : f32 to vector<2x32xf32>
    %533 = arith.addf %532, %531 : vector<2x32xf32>
    %534 = arith.divf %532, %533 : vector<2x32xf32>
    %535 = vector.extract_strided_slice %514 {offsets = [0, 64], sizes = [2, 32], strides = [1, 1]} : vector<2x96xf32> to vector<2x32xf32>
    %536 = vector.extract_strided_slice %518 {offsets = [0, 64], sizes = [2, 32], strides = [1, 1]} : vector<2x96xf32> to vector<2x32xf32>
    %537 = arith.mulf %526, %536 : vector<2x32xf32>
    %538 = arith.addf %535, %537 : vector<2x32xf32>
    %539 = math.tanh %538 : vector<2x32xf32>
    %cst_168 = arith.constant 1.000000e+00 : f32
    %540 = vector.broadcast %cst_168 : f32 to vector<2x32xf32>
    %541 = arith.subf %540, %534 : vector<2x32xf32>
    %542 = arith.mulf %541, %539 : vector<2x32xf32>
    %543 = arith.mulf %534, %477 : vector<2x32xf32>
    %544 = arith.addf %542, %543 : vector<2x32xf32>
    %545 = vector.extract_strided_slice %512 {offsets = [0, 128], sizes = [2, 128], strides = [1, 1]} : vector<2x256xf32> to vector<2x128xf32>
    %c0_169 = arith.constant 0 : index
    %c0_170 = arith.constant 0 : index
    %546 = vector.load %arg12[%c0_169, %c0_170] : memref<32x128xf32, #tpu.memory_space<vmem>>, vector<32x128xf32>
    %cst_171 = arith.constant dense<0.000000e+00> : vector<2x128xf32>
    %547 = tpu.matmul %544, %546, %cst_171 {dimension_numbers = #tpu.dot_dimension_numbers<[1], [0], [0], [1], [0, 0, 1, 1], [], []>} : vector<2x32xf32>, vector<32x128xf32>, vector<2x128xf32> -> vector<2x128xf32>
    %548 = arith.addf %545, %547 : vector<2x128xf32>
    %549 = arith.addf %548, %234 : vector<2x128xf32>
    %c5 = arith.constant 5 : index
    %c0_172 = arith.constant 0 : index
    %c0_173 = arith.constant 0 : index
    %550 = vector.load %arg15[%c5, %c0_172, %c0_173] : memref<8x2x128xf32, #tpu.memory_space<vmem>>, vector<1x2x128xf32>
    %551 = vector.shape_cast %550 : vector<1x2x128xf32> to vector<2x128xf32>
    %552 = vector.shape_cast %549 : vector<2x128xf32> to vector<1x2x128xf32>
    tpu.vector_store %arg15[%c5, %c0_172, %c0_173], %552 {strides = array<i32>} : memref<8x2x128xf32, #tpu.memory_space<vmem>>, vector<1x2x128xf32>,
    %cst_174 = arith.constant dense<0xFF800000> : vector<2xf32>
    %553 = vector.multi_reduction <maximumf>, %549, %cst_174 [1] : vector<2x128xf32> to vector<2xf32>
    %554 = vector.shape_cast %553 : vector<2xf32> to vector<2x1xf32>
    %555 = vector.broadcast %554 : vector<2x1xf32> to vector<2x128xf32>
    %556 = arith.cmpf oeq, %549, %555 : vector<2x128xf32>
    %c128_i32_175 = arith.constant 128 : i32
    %557 = vector.broadcast %c128_i32_175 : i32 to vector<2x128xi32>
    %558 = arith.select %556, %236, %557 : vector<2x128xi1>, vector<2x128xi32>
    %cst_176 = arith.constant dense<2147483647> : vector<2xi32>
    %559 = vector.multi_reduction <minsi>, %558, %cst_176 [1] : vector<2x128xi32> to vector<2xi32>
    %560 = vector.shape_cast %559 : vector<2xi32> to vector<2x1xi32>
    %561 = vector.broadcast %560 : vector<2x1xi32> to vector<2x128xi32>
    %562 = arith.cmpi eq, %236, %561 : vector<2x128xi32>
    %563 = arith.extui %562 : vector<2x128xi1> to vector<2x128xi32>
    %564 = arith.sitofp %563 : vector<2x128xi32> to vector<2x128xf32>
    %c5_177 = arith.constant 5 : index
    %c0_178 = arith.constant 0 : index
    %565 = vector.load %arg2[%c5_177, %c0_178] : memref<8x1xf32, #tpu.memory_space<vmem>>, vector<1x1xf32>
    %566 = vector.shape_cast %565 : vector<1x1xf32> to vector<1xf32>
    %c5_179 = arith.constant 5 : index
    %c0_180 = arith.constant 0 : index
    %c0_181 = arith.constant 0 : index
    %567 = vector.load %arg1[%c5_179, %c0_180, %c0_181] : memref<8x2x128xf32, #tpu.memory_space<vmem>>, vector<1x2x128xf32>
    %568 = vector.shape_cast %567 : vector<1x2x128xf32> to vector<2x128xf32>
    %569 = vector.shape_cast %566 : vector<1xf32> to vector<1x1xf32>
    %570 = vector.broadcast %569 : vector<1x1xf32> to vector<2x128xf32>
    %571 = arith.mulf %570, %568 : vector<2x128xf32>
    %cst_182 = arith.constant 1.000000e+00 : f32
    %572 = vector.broadcast %cst_182 : f32 to vector<1xf32>
    %573 = arith.subf %572, %566 : vector<1xf32>
    %574 = vector.shape_cast %573 : vector<1xf32> to vector<1x1xf32>
    %575 = vector.broadcast %574 : vector<1x1xf32> to vector<2x128xf32>
    %576 = arith.mulf %575, %564 : vector<2x128xf32>
    %577 = arith.addf %571, %576 : vector<2x128xf32>
    %c0_183 = arith.constant 0 : index
    %c0_184 = arith.constant 0 : index
    %578 = vector.load %arg7[%c0_183, %c0_184] : memref<128x256xf32, #tpu.memory_space<vmem>>, vector<128x256xf32>
    %cst_185 = arith.constant dense<0.000000e+00> : vector<2x256xf32>
    %579 = tpu.matmul %577, %578, %cst_185 {dimension_numbers = #tpu.dot_dimension_numbers<[1], [0], [0], [1], [0, 0, 1, 1], [], []>} : vector<2x128xf32>, vector<128x256xf32>, vector<2x256xf32> -> vector<2x256xf32>
    %580 = vector.extract_strided_slice %579 {offsets = [0, 0], sizes = [2, 96], strides = [1, 1]} : vector<2x256xf32> to vector<2x96xf32>
    %581 = arith.addf %580, %229 : vector<2x96xf32>
    %c0_186 = arith.constant 0 : index
    %c0_187 = arith.constant 0 : index
    %582 = vector.load %arg9[%c0_186, %c0_187] : memref<32x96xf32, #tpu.memory_space<vmem>>, vector<32x96xf32>
    %cst_188 = arith.constant dense<0.000000e+00> : vector<2x96xf32>
    %583 = tpu.matmul %544, %582, %cst_188 {dimension_numbers = #tpu.dot_dimension_numbers<[1], [0], [0], [1], [0, 0, 1, 1], [], []>} : vector<2x32xf32>, vector<32x96xf32>, vector<2x96xf32> -> vector<2x96xf32>
    %584 = vector.broadcast %235 : vector<1x96xf32> to vector<2x96xf32>
    %585 = arith.addf %583, %584 : vector<2x96xf32>
    %586 = vector.extract_strided_slice %581 {offsets = [0, 0], sizes = [2, 32], strides = [1, 1]} : vector<2x96xf32> to vector<2x32xf32>
    %587 = vector.extract_strided_slice %585 {offsets = [0, 0], sizes = [2, 32], strides = [1, 1]} : vector<2x96xf32> to vector<2x32xf32>
    %588 = arith.addf %586, %587 : vector<2x32xf32>
    %589 = arith.negf %588 : vector<2x32xf32>
    %590 = math.exp %589 : vector<2x32xf32>
    %cst_189 = arith.constant 1.000000e+00 : f32
    %591 = vector.broadcast %cst_189 : f32 to vector<2x32xf32>
    %592 = arith.addf %591, %590 : vector<2x32xf32>
    %593 = arith.divf %591, %592 : vector<2x32xf32>
    %594 = vector.extract_strided_slice %581 {offsets = [0, 32], sizes = [2, 32], strides = [1, 1]} : vector<2x96xf32> to vector<2x32xf32>
    %595 = vector.extract_strided_slice %585 {offsets = [0, 32], sizes = [2, 32], strides = [1, 1]} : vector<2x96xf32> to vector<2x32xf32>
    %596 = arith.addf %594, %595 : vector<2x32xf32>
    %597 = arith.negf %596 : vector<2x32xf32>
    %598 = math.exp %597 : vector<2x32xf32>
    %cst_190 = arith.constant 1.000000e+00 : f32
    %599 = vector.broadcast %cst_190 : f32 to vector<2x32xf32>
    %600 = arith.addf %599, %598 : vector<2x32xf32>
    %601 = arith.divf %599, %600 : vector<2x32xf32>
    %602 = vector.extract_strided_slice %581 {offsets = [0, 64], sizes = [2, 32], strides = [1, 1]} : vector<2x96xf32> to vector<2x32xf32>
    %603 = vector.extract_strided_slice %585 {offsets = [0, 64], sizes = [2, 32], strides = [1, 1]} : vector<2x96xf32> to vector<2x32xf32>
    %604 = arith.mulf %593, %603 : vector<2x32xf32>
    %605 = arith.addf %602, %604 : vector<2x32xf32>
    %606 = math.tanh %605 : vector<2x32xf32>
    %cst_191 = arith.constant 1.000000e+00 : f32
    %607 = vector.broadcast %cst_191 : f32 to vector<2x32xf32>
    %608 = arith.subf %607, %601 : vector<2x32xf32>
    %609 = arith.mulf %608, %606 : vector<2x32xf32>
    %610 = arith.mulf %601, %544 : vector<2x32xf32>
    %611 = arith.addf %609, %610 : vector<2x32xf32>
    %612 = vector.extract_strided_slice %579 {offsets = [0, 128], sizes = [2, 128], strides = [1, 1]} : vector<2x256xf32> to vector<2x128xf32>
    %c0_192 = arith.constant 0 : index
    %c0_193 = arith.constant 0 : index
    %613 = vector.load %arg12[%c0_192, %c0_193] : memref<32x128xf32, #tpu.memory_space<vmem>>, vector<32x128xf32>
    %cst_194 = arith.constant dense<0.000000e+00> : vector<2x128xf32>
    %614 = tpu.matmul %611, %613, %cst_194 {dimension_numbers = #tpu.dot_dimension_numbers<[1], [0], [0], [1], [0, 0, 1, 1], [], []>} : vector<2x32xf32>, vector<32x128xf32>, vector<2x128xf32> -> vector<2x128xf32>
    %615 = arith.addf %612, %614 : vector<2x128xf32>
    %616 = arith.addf %615, %234 : vector<2x128xf32>
    %c6 = arith.constant 6 : index
    %c0_195 = arith.constant 0 : index
    %c0_196 = arith.constant 0 : index
    %617 = vector.load %arg15[%c6, %c0_195, %c0_196] : memref<8x2x128xf32, #tpu.memory_space<vmem>>, vector<1x2x128xf32>
    %618 = vector.shape_cast %617 : vector<1x2x128xf32> to vector<2x128xf32>
    %619 = vector.shape_cast %616 : vector<2x128xf32> to vector<1x2x128xf32>
    tpu.vector_store %arg15[%c6, %c0_195, %c0_196], %619 {strides = array<i32>} : memref<8x2x128xf32, #tpu.memory_space<vmem>>, vector<1x2x128xf32>,
    %cst_197 = arith.constant dense<0xFF800000> : vector<2xf32>
    %620 = vector.multi_reduction <maximumf>, %616, %cst_197 [1] : vector<2x128xf32> to vector<2xf32>
    %621 = vector.shape_cast %620 : vector<2xf32> to vector<2x1xf32>
    %622 = vector.broadcast %621 : vector<2x1xf32> to vector<2x128xf32>
    %623 = arith.cmpf oeq, %616, %622 : vector<2x128xf32>
    %c128_i32_198 = arith.constant 128 : i32
    %624 = vector.broadcast %c128_i32_198 : i32 to vector<2x128xi32>
    %625 = arith.select %623, %236, %624 : vector<2x128xi1>, vector<2x128xi32>
    %cst_199 = arith.constant dense<2147483647> : vector<2xi32>
    %626 = vector.multi_reduction <minsi>, %625, %cst_199 [1] : vector<2x128xi32> to vector<2xi32>
    %627 = vector.shape_cast %626 : vector<2xi32> to vector<2x1xi32>
    %628 = vector.broadcast %627 : vector<2x1xi32> to vector<2x128xi32>
    %629 = arith.cmpi eq, %236, %628 : vector<2x128xi32>
    %630 = arith.extui %629 : vector<2x128xi1> to vector<2x128xi32>
    %631 = arith.sitofp %630 : vector<2x128xi32> to vector<2x128xf32>
    %c6_200 = arith.constant 6 : index
    %c0_201 = arith.constant 0 : index
    %632 = vector.load %arg2[%c6_200, %c0_201] : memref<8x1xf32, #tpu.memory_space<vmem>>, vector<1x1xf32>
    %633 = vector.shape_cast %632 : vector<1x1xf32> to vector<1xf32>
    %c6_202 = arith.constant 6 : index
    %c0_203 = arith.constant 0 : index
    %c0_204 = arith.constant 0 : index
    %634 = vector.load %arg1[%c6_202, %c0_203, %c0_204] : memref<8x2x128xf32, #tpu.memory_space<vmem>>, vector<1x2x128xf32>
    %635 = vector.shape_cast %634 : vector<1x2x128xf32> to vector<2x128xf32>
    %636 = vector.shape_cast %633 : vector<1xf32> to vector<1x1xf32>
    %637 = vector.broadcast %636 : vector<1x1xf32> to vector<2x128xf32>
    %638 = arith.mulf %637, %635 : vector<2x128xf32>
    %cst_205 = arith.constant 1.000000e+00 : f32
    %639 = vector.broadcast %cst_205 : f32 to vector<1xf32>
    %640 = arith.subf %639, %633 : vector<1xf32>
    %641 = vector.shape_cast %640 : vector<1xf32> to vector<1x1xf32>
    %642 = vector.broadcast %641 : vector<1x1xf32> to vector<2x128xf32>
    %643 = arith.mulf %642, %631 : vector<2x128xf32>
    %644 = arith.addf %638, %643 : vector<2x128xf32>
    %c0_206 = arith.constant 0 : index
    %c0_207 = arith.constant 0 : index
    %645 = vector.load %arg7[%c0_206, %c0_207] : memref<128x256xf32, #tpu.memory_space<vmem>>, vector<128x256xf32>
    %cst_208 = arith.constant dense<0.000000e+00> : vector<2x256xf32>
    %646 = tpu.matmul %644, %645, %cst_208 {dimension_numbers = #tpu.dot_dimension_numbers<[1], [0], [0], [1], [0, 0, 1, 1], [], []>} : vector<2x128xf32>, vector<128x256xf32>, vector<2x256xf32> -> vector<2x256xf32>
    %647 = vector.extract_strided_slice %646 {offsets = [0, 0], sizes = [2, 96], strides = [1, 1]} : vector<2x256xf32> to vector<2x96xf32>
    %648 = arith.addf %647, %229 : vector<2x96xf32>
    %c0_209 = arith.constant 0 : index
    %c0_210 = arith.constant 0 : index
    %649 = vector.load %arg9[%c0_209, %c0_210] : memref<32x96xf32, #tpu.memory_space<vmem>>, vector<32x96xf32>
    %cst_211 = arith.constant dense<0.000000e+00> : vector<2x96xf32>
    %650 = tpu.matmul %611, %649, %cst_211 {dimension_numbers = #tpu.dot_dimension_numbers<[1], [0], [0], [1], [0, 0, 1, 1], [], []>} : vector<2x32xf32>, vector<32x96xf32>, vector<2x96xf32> -> vector<2x96xf32>
    %651 = vector.broadcast %235 : vector<1x96xf32> to vector<2x96xf32>
    %652 = arith.addf %650, %651 : vector<2x96xf32>
    %653 = vector.extract_strided_slice %648 {offsets = [0, 0], sizes = [2, 32], strides = [1, 1]} : vector<2x96xf32> to vector<2x32xf32>
    %654 = vector.extract_strided_slice %652 {offsets = [0, 0], sizes = [2, 32], strides = [1, 1]} : vector<2x96xf32> to vector<2x32xf32>
    %655 = arith.addf %653, %654 : vector<2x32xf32>
    %656 = arith.negf %655 : vector<2x32xf32>
    %657 = math.exp %656 : vector<2x32xf32>
    %cst_212 = arith.constant 1.000000e+00 : f32
    %658 = vector.broadcast %cst_212 : f32 to vector<2x32xf32>
    %659 = arith.addf %658, %657 : vector<2x32xf32>
    %660 = arith.divf %658, %659 : vector<2x32xf32>
    %661 = vector.extract_strided_slice %648 {offsets = [0, 32], sizes = [2, 32], strides = [1, 1]} : vector<2x96xf32> to vector<2x32xf32>
    %662 = vector.extract_strided_slice %652 {offsets = [0, 32], sizes = [2, 32], strides = [1, 1]} : vector<2x96xf32> to vector<2x32xf32>
    %663 = arith.addf %661, %662 : vector<2x32xf32>
    %664 = arith.negf %663 : vector<2x32xf32>
    %665 = math.exp %664 : vector<2x32xf32>
    %cst_213 = arith.constant 1.000000e+00 : f32
    %666 = vector.broadcast %cst_213 : f32 to vector<2x32xf32>
    %667 = arith.addf %666, %665 : vector<2x32xf32>
    %668 = arith.divf %666, %667 : vector<2x32xf32>
    %669 = vector.extract_strided_slice %648 {offsets = [0, 64], sizes = [2, 32], strides = [1, 1]} : vector<2x96xf32> to vector<2x32xf32>
    %670 = vector.extract_strided_slice %652 {offsets = [0, 64], sizes = [2, 32], strides = [1, 1]} : vector<2x96xf32> to vector<2x32xf32>
    %671 = arith.mulf %660, %670 : vector<2x32xf32>
    %672 = arith.addf %669, %671 : vector<2x32xf32>
    %673 = math.tanh %672 : vector<2x32xf32>
    %cst_214 = arith.constant 1.000000e+00 : f32
    %674 = vector.broadcast %cst_214 : f32 to vector<2x32xf32>
    %675 = arith.subf %674, %668 : vector<2x32xf32>
    %676 = arith.mulf %675, %673 : vector<2x32xf32>
    %677 = arith.mulf %668, %611 : vector<2x32xf32>
    %678 = arith.addf %676, %677 : vector<2x32xf32>
    %679 = vector.extract_strided_slice %646 {offsets = [0, 128], sizes = [2, 128], strides = [1, 1]} : vector<2x256xf32> to vector<2x128xf32>
    %c0_215 = arith.constant 0 : index
    %c0_216 = arith.constant 0 : index
    %680 = vector.load %arg12[%c0_215, %c0_216] : memref<32x128xf32, #tpu.memory_space<vmem>>, vector<32x128xf32>
    %cst_217 = arith.constant dense<0.000000e+00> : vector<2x128xf32>
    %681 = tpu.matmul %678, %680, %cst_217 {dimension_numbers = #tpu.dot_dimension_numbers<[1], [0], [0], [1], [0, 0, 1, 1], [], []>} : vector<2x32xf32>, vector<32x128xf32>, vector<2x128xf32> -> vector<2x128xf32>
    %682 = arith.addf %679, %681 : vector<2x128xf32>
    %683 = arith.addf %682, %234 : vector<2x128xf32>
    %c7 = arith.constant 7 : index
    %c0_218 = arith.constant 0 : index
    %c0_219 = arith.constant 0 : index
    %684 = vector.load %arg15[%c7, %c0_218, %c0_219] : memref<8x2x128xf32, #tpu.memory_space<vmem>>, vector<1x2x128xf32>
    %685 = vector.shape_cast %684 : vector<1x2x128xf32> to vector<2x128xf32>
    %686 = vector.shape_cast %683 : vector<2x128xf32> to vector<1x2x128xf32>
    tpu.vector_store %arg15[%c7, %c0_218, %c0_219], %686 {strides = array<i32>} : memref<8x2x128xf32, #tpu.memory_space<vmem>>, vector<1x2x128xf32>,
    return
  }
}

</mosaic_0001>

<bundles_post_ra>
// kernel: tpu_custom_call.1
= control target key start
LH: loop header
LB: loop body
LE: loop exit
PB: predicated region body
PF: predicated region fallthrough
CT: control target
= control target key end

     0   :  { %s5639_s0 = inlined_call_operand.hbm [shape: f32[14,128], index: 0, kind: input, shape index: {}]   ;;  %s5640_s1 = inlined_call_operand.hbm [shape: f32[8,2,128], index: 1, kind: input, shape index: {}]   ;;  %s5641_s2 = inlined_call_operand.vmem [shape: f32[8,1], index: 2, kind: input, shape index: {}]   ;;  %s5642_s3 = inlined_call_operand.vmem [shape: f32[128,96], index: 3, kind: input, shape index: {}]   ;;  %s5643_s4 = inlined_call_operand.hbm [shape: f32[32,96], index: 4, kind: input, shape index: {}]   ;;  %s5644_s5 = inlined_call_operand.vmem [shape: f32[1,96], index: 5, kind: input, shape index: {}]   ;;  %s5645_s6 = inlined_call_operand.vmem [shape: f32[1,96], index: 6, kind: input, shape index: {}]   ;;  %s5646_s7 = inlined_call_operand.vmem [shape: f32[128,256], index: 7, kind: input, shape index: {}]   ;;  %s5647_s8 = inlined_call_operand.hbm [shape: f32[32,96], index: 8, kind: input, shape index: {}]   ;;  %s5648_s9 = inlined_call_operand.hbm [shape: f32[32,96], index: 9, kind: input, shape index: {}]   ;;  %s5649_s10 = inlined_call_operand.vmem [shape: f32[1,96], index: 10, kind: input, shape index: {}]   ;;  %s5650_s11 = inlined_call_operand.vmem [shape: f32[1,96], index: 11, kind: input, shape index: {}]   ;;  %s5651_s12 = inlined_call_operand.hbm [shape: f32[32,128], index: 12, kind: input, shape index: {}]   ;;  %s5652_s13 = inlined_call_operand.hbm [shape: f32[32,128], index: 13, kind: input, shape index: {}]   ;;  %s5653_s14 = inlined_call_operand.vmem [shape: f32[1,128], index: 14, kind: input, shape index: {}]   ;;  %s5654_s15 = inlined_call_operand.hbm [shape: f32[8,2,128], index: 15, kind: output, shape index: {}]  }
   0x1   :  { %5656 = sst [smem:[#allocation20_spill]] %s5654_s15 }
   0x2   :  { %20 = vsyncpa [#allocation3], 0 }
   0x3   :  { %21 = vsyncpa [#allocation6], 0 }
   0x4   :  { %22 = vsyncpa [#allocation9], 0 }
   0x5   :  { %23 = vsyncpa [#allocation12], 0 }
   0x6   :  { %24 = vsyncpa [#allocation4], 0  ;;  %s4600_s18 = smov [#allocation5]   ;;  %s4414_s22 = scalar_lea.hbm %s5640_s1, 256 }
   0x7   :  { %s42_s19 = sshll.u32 %s4600_s18, 4  ;;  %p4415_p0 = scmp.ne.s32.totalorder %s5640_s1, %s4414_s22  ;;  %s43_s19 = int_to_ptr.vmem [resolvable:$true] %s42_s19 }
   0x8   :  { %p4418_p1 = scmp.lt.u32.totalorder %s4414_s22, %s5640_s1 }
   0xa   :  { %p4420_p2 = pnand %p4418_p1, %p4415_p0 }
   0xc   :  { %4423 = shalt.err (!%p4420_p2)
}
   0xd   :  { %s4424_s27 = scalar_lea.vmem %s43_s19, 256  ;;  %p4429_p4 = scmp.lt.s32.totalorder %s43_s19, %s43_s19 }
   0xe   :  { %p4425_p3 = scmp.ne.s32.totalorder %s43_s19, %s4424_s27  ;;  %p4430_p5 = scmp.lt.s32.totalorder %s4424_s27, %s4424_s27 }
  0x10   :  { %p4431_p6 = por %p4430_p5, %p4429_p4 }
  0x12   :  { %p4432_p7 = pnand %p4431_p6, %p4425_p3 }
  0x14   :  { %4435 = shalt.err (!%p4432_p7)
}
  0x15   :  { %s4601_s28 = smov 32   ;;  %s4602_s29 = smov 2  }
  0x16   :  { %48 = dma.hbm_to_vmem [thread:$0]  %s5640_s1, 256, %s43_s19, [#allocation6], %s4601_s28, %s4601_s28, %s4602_s29  }
  0x17   :  { %s4603_s17 = smov [#allocation8]   ;;  %s4604_s20 = smov [#allocation11]  }
  0x18   :  { %s76_s18 = sshll.u32 %s4603_s17, 4  ;;  %s104_s21 = sshll.u32 %s4604_s20, 4  ;;  %s77_s18 = int_to_ptr.vmem [resolvable:$true] %s76_s18  ;;  %s105_s21 = int_to_ptr.vmem [resolvable:$true] %s104_s21 }
  0x19   :  { %s4436_s24 = scalar_lea.hbm %s5647_s8, 512 }
  0x1a   :  { %p4437_p8 = scmp.ne.s32.totalorder %s5647_s8, %s4436_s24  ;;  %p4440_p9 = scmp.lt.u32.totalorder %s4436_s24, %s5647_s8 }
  0x1c   :  { %p4442_p10 = pnand %p4440_p9, %p4437_p8 }
  0x1e   :  { %4445 = shalt.err (!%p4442_p10)
}
  0x1f   :  { %s4446_s1 = scalar_lea.vmem %s77_s18, 512  ;;  %p4451_p12 = scmp.lt.s32.totalorder %s77_s18, %s77_s18 }
  0x20   :  { %p4447_p11 = scmp.ne.s32.totalorder %s77_s18, %s4446_s1  ;;  %p4452_p13 = scmp.lt.s32.totalorder %s4446_s1, %s4446_s1 }
  0x22   :  { %p4453_p0 = por %p4452_p13, %p4451_p12 }
  0x24   :  { %p4454_p1 = pnand %p4453_p0, %p4447_p11 }
  0x26   :  { %4457 = shalt.err (!%p4454_p1)
}
  0x27   :  { %s4605_s19 = smov 128   ;;  %s4606_s30 = smov 8  }
  0x28   :  { %82 = dma.hbm_to_vmem [thread:$0]  %s5647_s8, 512, %s77_s18, [#allocation9], %s4605_s19, %s4605_s19, %s4606_s30  }
  0x29   :  { %s4458_s22 = scalar_lea.hbm %s5651_s12, 512 }
  0x2a   :  { %p4459_p2 = scmp.ne.s32.totalorder %s5651_s12, %s4458_s22  ;;  %p4462_p3 = scmp.lt.u32.totalorder %s4458_s22, %s5651_s12 }
  0x2c   :  { %p4464_p4 = pnand %p4462_p3, %p4459_p2 }
  0x2e   :  { %4467 = shalt.err (!%p4464_p4)
}
  0x2f   :  { %s4468_s27 = scalar_lea.vmem %s105_s21, 512  ;;  %p4473_p6 = scmp.lt.s32.totalorder %s105_s21, %s105_s21 }
  0x30   :  { %p4469_p5 = scmp.ne.s32.totalorder %s105_s21, %s4468_s27  ;;  %p4474_p7 = scmp.lt.s32.totalorder %s4468_s27, %s4468_s27 }
  0x32   :  { %p4475_p8 = por %p4474_p7, %p4473_p6 }
  0x34   :  { %p4476_p9 = pnand %p4475_p8, %p4469_p5 }
  0x36   :  { %4479 = shalt.err (!%p4476_p9)
}
  0x37   :  { %110 = dma.hbm_to_vmem [thread:$0]  %s5651_s12, 512, %s105_s21, [#allocation12], %s4605_s19, %s4605_s19, %s4606_s30  }
  0x38   :  { %s4607_s1 = smov [#allocation2]   ;;  %s4608_s17 = smov [#allocation7]  }
  0x39   :  { %s30_s16 = sshll.u32 %s4607_s1, 4  ;;  %s58_s15 = sshll.u32 %s4608_s17, 4  ;;  %s31_s16 = int_to_ptr.vmem [resolvable:$true] %s30_s16  ;;  %s59_s15 = int_to_ptr.vmem [resolvable:$true] %s58_s15 }
  0x3a   :  { %s4480_s23 = scalar_lea.hbm %s5639_s0, 256 }
  0x3b   :  { %p4481_p10 = scmp.ne.s32.totalorder %s5639_s0, %s4480_s23  ;;  %p4484_p11 = scmp.lt.u32.totalorder %s4480_s23, %s5639_s0 }
  0x3d   :  { %p4486_p12 = pnand %p4484_p11, %p4481_p10 }
  0x3f   :  { %4489 = shalt.err (!%p4486_p12)
}
  0x40   :  { %s4490_s12 = scalar_lea.vmem %s31_s16, 256  ;;  %p4495_p0 = scmp.lt.s32.totalorder %s31_s16, %s31_s16 }
  0x41   :  { %p4491_p13 = scmp.ne.s32.totalorder %s31_s16, %s4490_s12  ;;  %p4496_p1 = scmp.lt.s32.totalorder %s4490_s12, %s4490_s12 }
  0x43   :  { %p4497_p2 = por %p4496_p1, %p4495_p0 }
  0x45   :  { %p4498_p3 = pnand %p4497_p2, %p4491_p13 }
  0x47   :  { %4501 = shalt.err (!%p4498_p3)
}
  0x48   :  { %36 = dma.hbm_to_vmem [thread:$0]  %s5639_s0, 256, %s31_s16, [#allocation3], %s4605_s19, %s4605_s19, %s4606_s30  }
  0x49   :  { %s4502_s17 = scalar_lea.hbm %s5643_s4, 512 }
  0x4a   :  { %p4503_p4 = scmp.ne.s32.totalorder %s5643_s4, %s4502_s17  ;;  %p4506_p5 = scmp.lt.u32.totalorder %s4502_s17, %s5643_s4 }
  0x4c   :  { %p4508_p6 = pnand %p4506_p5, %p4503_p4 }
  0x4e   :  { %4511 = shalt.err (!%p4508_p6)
}
  0x4f   :  { %s4512_s25 = scalar_lea.vmem %s59_s15, 512  ;;  %p4517_p8 = scmp.lt.s32.totalorder %s59_s15, %s59_s15 }
  0x50   :  { %p4513_p7 = scmp.ne.s32.totalorder %s59_s15, %s4512_s25  ;;  %p4518_p9 = scmp.lt.s32.totalorder %s4512_s25, %s4512_s25 }
  0x52   :  { %p4519_p10 = por %p4518_p9, %p4517_p8 }
  0x54   :  { %p4520_p11 = pnand %p4519_p10, %p4513_p7 }
  0x56   :  { %4523 = shalt.err (!%p4520_p11)
}
  0x57   :  { %64 = dma.hbm_to_vmem [thread:$0]  %s5643_s4, 512, %s59_s15, [#allocation6], %s4605_s19, %s4605_s19, %s4606_s30  }
  0x58   :  { %s4609_s26 = smov [#allocation10]   ;;  %s4610_s12 = smov [#allocation13]  }
  0x59   :  { %s88_s27 = sshll.u32 %s4609_s26, 4  ;;  %s116_s21 = sshll.u32 %s4610_s12, 4  ;;  %s89_s27 = int_to_ptr.vmem [resolvable:$true] %s88_s27  ;;  %s117_s21 = int_to_ptr.vmem [resolvable:$true] %s116_s21 }
  0x5a   :  { %s4524_s1 = scalar_lea.hbm %s5648_s9, 512 }
  0x5b   :  { %p4525_p12 = scmp.ne.s32.totalorder %s5648_s9, %s4524_s1  ;;  %p4528_p13 = scmp.lt.u32.totalorder %s4524_s1, %s5648_s9 }
  0x5d   :  { %p4530_p0 = pnand %p4528_p13, %p4525_p12 }
  0x5f   :  { %4533 = shalt.err (!%p4530_p0)
}
  0x60   :  { %s4534_s4 = scalar_lea.vmem %s89_s27, 512  ;;  %p4539_p2 = scmp.lt.s32.totalorder %s89_s27, %s89_s27 }
  0x61   :  { %p4535_p1 = scmp.ne.s32.totalorder %s89_s27, %s4534_s4  ;;  %p4540_p3 = scmp.lt.s32.totalorder %s4534_s4, %s4534_s4 }
  0x63   :  { %p4541_p4 = por %p4540_p3, %p4539_p2 }
  0x65   :  { %p4542_p5 = pnand %p4541_p4, %p4535_p1 }
  0x67   :  { %4545 = shalt.err (!%p4542_p5)
}
  0x68   :  { %94 = dma.hbm_to_vmem [thread:$0]  %s5648_s9, 512, %s89_s27, [#allocation9], %s4605_s19, %s4605_s19, %s4606_s30  }
  0x69   :  { %s4546_s16 = scalar_lea.hbm %s5652_s13, 512 }
  0x6a   :  { %p4547_p6 = scmp.ne.s32.totalorder %s5652_s13, %s4546_s16  ;;  %p4550_p7 = scmp.lt.u32.totalorder %s4546_s16, %s5652_s13 }
  0x6c   :  { %p4552_p8 = pnand %p4550_p7, %p4547_p6 }
  0x6e   :  { %4555 = shalt.err (!%p4552_p8)
}
  0x6f   :  { %s4556_s1 = scalar_lea.vmem %s117_s21, 512  ;;  %p4561_p10 = scmp.lt.s32.totalorder %s117_s21, %s117_s21 }
  0x70   :  { %p4557_p9 = scmp.ne.s32.totalorder %s117_s21, %s4556_s1  ;;  %p4562_p11 = scmp.lt.s32.totalorder %s4556_s1, %s4556_s1 }
  0x72   :  { %p4563_p12 = por %p4562_p11, %p4561_p10 }
  0x74   :  { %p4564_p13 = pnand %p4563_p12, %p4557_p9 }
  0x76   :  { %4567 = shalt.err (!%p4564_p13)
}
  0x77   :  { %122 = dma.hbm_to_vmem [thread:$0]  %s5652_s13, 512, %s117_s21, [#allocation12], %s4605_s19, %s4605_s19, %s4606_s30  }
  0x78   :  { %4590 = dma.done.wait [#allocation3], 256  }
  0x79   :  { %4591 = vsyncadd [#allocation3], 4294967040 }
  0x7a   :  { %4592 = dma.done.wait [#allocation6], 768  }
  0x7b   :  { %4593 = vsyncadd [#allocation6], 4294966528 }
  0x7c   :  { %4594 = dma.done.wait [#allocation9], 1024  }
  0x7d   :  { %4595 = vsyncadd [#allocation9], 4294966272 }
  0x7e   :  { %4596 = dma.done.wait [#allocation12], 1024  }
  0x7f   :  { %4597 = vsyncadd [#allocation12], 4294966272  ;;  %v4611_v0 = vmov 0.0|0.0   ;;  %vm4612_vm0 = vmmov 0   ;;  %v4613_v1 = vmov 0.0   ;;  %v148_v2 = vld [vmem:[%s5642_s3] sm:$0xff] }
  0x80   :  { %3926 = vmatprep.subr.bf16.mxu1 %v4611_v0  ;;  %3649 = vmatprep.mubr.msk.f32.mxu1 %vm4612_vm0, %v4613_v1  ;;  %1159 = vst [vmem:[#allocation14] sm:$0x3] %v4613_v1  ;;  %v149_v3 = vld [vmem:[%s5642_s3 + $0x8] sm:$0xff]  ;;  %v247_v4 = vld [vmem:[#allocation7] sm:$0xff]  ;;  %v150_v7 = vld [vmem:[%s5642_s3 + $0x10] sm:$0xff]  ;;  %s4614_s0 = smov 64  }
  0x81   :  { %v3894_v5 = vpack.c.bf16 %v149_v3, %v148_v2  ;;  %v248_v6 = vld [vmem:[#allocation7 + $0x8] sm:$0xff]  ;;  %v151_v8 = vld [vmem:[%s5642_s3 + $0x18] sm:$0xff]  ;;  %v249_v11 = vld [vmem:[#allocation7 + $0x10] sm:$0xff]  ;;  %vm257_vm1 = vcmask 261120   ;;  %vm1455_vm2 = vcmask 1041408  }
  0x82   :  { %v4818_v9 = vpack.c.bf16 %v248_v6, %v247_v4  ;;  %v3898_v10 = vpack.c.bf16 %v151_v8, %v150_v7  ;;  %v250_v12 = vld [vmem:[#allocation7 + $0x18] sm:$0xff]  ;;  %v152_v13 = vld [vmem:[%s5642_s3 + $0x20] sm:$0xff]  ;;  %v153_v14 = vld [vmem:[%s5642_s3 + $0x28] sm:$0xff] }
  0x83   :  { %3895 = vmatprep.subr.bf16.mxu0 %v3894_v5  ;;  %v4827_v15 = vpack.c.bf16 %v250_v12, %v249_v11  ;;  %v3902_v16 = vpack.c.bf16 %v153_v14, %v152_v13  ;;  %v154_v17 = vld [vmem:[%s5642_s3 + $0x30] sm:$0xff]  ;;  %v155_v18 = vld [vmem:[%s5642_s3 + $0x38] sm:$0xff]  ;;  %v146_v19 = vld [vmem:[#allocation2] sm:$0xff] }
  0x84   :  { %3928 = vmatpush3.bf16.msra.mxu1 %v4818_v9  ;;  %3897 = vmatpush3.bf16.msra.mxu0 %v3894_v5  ;;  %v3906_v20 = vpack.c.bf16 %v155_v18, %v154_v17  ;;  %v156_v21 = vld [vmem:[%s5642_s3 + $0x40] sm:$0xff]  ;;  %v157_v22 = vld [vmem:[%s5642_s3 + $0x48] sm:$0xff]  ;;  %v158_v24 = vld [vmem:[%s5642_s3 + $0x50] sm:$0xff] }
  0x85   :  { %3929 = vmatprep.subr.bf16.mxu1 %v4611_v0  ;;  %3899 = vmatprep.subr.bf16.mxu0 %v3898_v10  ;;  %v3910_v23 = vpack.c.bf16 %v157_v22, %v156_v21  ;;  %v159_v25 = vld [vmem:[%s5642_s3 + $0x58] sm:$0xff]  ;;  %v160_v27 = vld [vmem:[%s5642_s3 + $0x60] sm:$0xff]  ;;  %v161_v28 = vld [vmem:[%s5642_s3 + $0x68] sm:$0xff] }
  0x86   :  { %3638 = vmatprep.mubr.f32.mxu0 %v146_v19  ;;  %v3914_v26 = vpack.c.bf16 %v159_v25, %v158_v24  ;;  %v3918_v29 = vpack.c.bf16 %v161_v28, %v160_v27  ;;  %v162_v30 = vld [vmem:[%s5642_s3 + $0x70] sm:$0xff]  ;;  %v163_v31 = vld [vmem:[%s5642_s3 + $0x78] sm:$0xff]  ;;  %v147_v33 = vld [vmem:[#allocation2 + $0x8] sm:$0x3f] }
  0x87   :  { %v3922_v32 = vpack.c.bf16 %v163_v31, %v162_v30  ;;  %v4879_v34 = vld [vmem:[%s5645_s6] ss:$0 sm:$0xff] }
  0x88   :  { %3931 = vmatpush3.bf16.msra.mxu1 %v4827_v15  ;;  %3901 = vmatpush3.bf16.msra.mxu0 %v3898_v10  ;;  %v3426_v39 = vld [vmem:[%s5644_s5] ss:$0 sm:$0xff]  ;;  %s4615_s5 = smov 96  }
  0x89   :  { %3903 = vmatprep.subr.bf16.mxu0 %v3902_v16  ;;  %3932 = vmatprep.subr.bf16.mxu1 %v4611_v0 }
  0x8b   :  { %3650 = vmatmul.mubr.f32.vlgmr.msra.gmra.mrb[0].mxu1 %v4613_v1 }
  0x8c   :  { %3905 = vmatpush3.bf16.msra.mxu0 %v3902_v16  ;;  %3934 = vmatpush3.bf16.msra.mxu1 %v4818_v9 }
  0x8d   :  { %3907 = vmatprep.subr.bf16.mxu0 %v3906_v20  ;;  %3935 = vmatprep.subr.bf16.mxu1 %v4611_v0 }
  0x8e   :  { %3660 = vmatprep.mubr.msk.f32.mxu1 %vm4612_vm0, %v4613_v1 }
  0x90   :  { %3909 = vmatpush3.bf16.msra.mxu0 %v3906_v20  ;;  %3937 = vmatpush3.bf16.msra.mxu1 %v4827_v15 }
  0x91   :  { %3911 = vmatprep.subr.bf16.mxu0 %v3910_v23  ;;  %3938 = vmatprep.subr.bf16.mxu1 %v4611_v0 }
  0x94   :  { %3913 = vmatpush3.bf16.msra.mxu0 %v3910_v23 }
  0x95   :  { %3915 = vmatprep.subr.bf16.mxu0 %v3914_v26 }
  0x98   :  { %3917 = vmatpush3.bf16.msra.mxu0 %v3914_v26 }
  0x99   :  { %3919 = vmatprep.subr.bf16.mxu0 %v3918_v29 }
  0x9c   :  { %3921 = vmatpush3.bf16.msra.mxu0 %v3918_v29 }
  0x9d   :  { %3923 = vmatprep.subr.bf16.mxu0 %v3922_v32 }
  0xa0   :  { %3925 = vmatpush3.bf16.msra.mxu0 %v3922_v32 }
  0xa1   :  { %3950 = vmatprep.subr.bf16.mxu0 %v4611_v0 }
  0xa3   :  { %3639 = vmatmul.mubr.f32.vlgmr.msra.gmra.mrb[0].mxu0 %v147_v33 }
  0xa4   :  { %3952 = vmatpush3.bf16.msra.mxu0 %v4818_v9  ;;  %3693 = vmatprep.mubr.msk.f32.mxu0 %vm4612_vm0, %v4613_v1 }
  0xa5   :  { %3953 = vmatprep.subr.bf16.mxu0 %v4611_v0 }
  0xa8   :  { %3955 = vmatpush3.bf16.msra.mxu0 %v4827_v15 }
  0xa9   :  { %3962 = vmatprep.subr.bf16.mxu0 %v4611_v0 }
 0x15e   :  { %v327_v35 = vpop.f32.mrb[0].mxu1 }
 0x15f   :  { %v328_v36 = vadd.f32 %v4879_v34, %v327_v35  ;;  %v3651_v37 = vpop.f32.mrb[1].mxu1 }
 0x161   :  { %339 = vrot.lane.b32.xlu0 %v328_v36, %s4614_s0 }
 0x176   :  { %v3640_v38 = vpop.f32.mrb[0].mxu0 }
 0x177   :  { %v4886_v40 = vadd.f32 %v3640_v38, %v3426_v39  ;;  %v237_v41 = vpop.f32.mrb[1].mxu0 }
 0x178   :  { %v4888_v42 = vadd.f32 %v3426_v39, %v237_v41 }
 0x17a   :  { %v331_v43 = vadd.f32 %v328_v36, %v4888_v42 }
 0x17c   :  { %v3428_v44 = vmul.f32 -1.442695, %v331_v43 }
 0x17e   :  { %4329 = vpow2.f32 %v3428_v44 }
 0x188   :  { %v4330_v45 = vpop.eup %4329 }
 0x189   :  { %v335_v46 = vadd.f32 1.0, %v4330_v45 }
 0x18b   :  { %4331 = vrcp.f32 %v335_v46 }
 0x195   :  { %v4332_v47 = vpop.eup %4331 }
 0x196   :  { %v349_v53 = vsub.f32 1.0, %v4332_v47  ;;  %v355_v55 = vmul.f32 0.0, %v4332_v47 }
 0x1d3   :  { %v340_v48 = vpop.permute.xlu0 %339 }
 0x1d4   :  { %v342_v49 = vmul.f32 %v4332_v47, %v340_v48 }
 0x1d6   :  { %344 = vrot.lane.b32.xlu0 %v342_v49, %s4614_s0 }
 0x248   :  { %v345_v50 = vpop.permute.xlu0 %344 }
 0x249   :  { %v347_v51 = vadd.f32 %v345_v50, %v4888_v42 }
 0x24b   :  { %4333 = vtanh.f32 %v347_v51 }
 0x255   :  { %v4334_v52 = vpop.eup %4333 }
 0x256   :  { %351 = vrot.lane.b32.xlu1 %v4334_v52, %s4615_s5 }
 0x2c8   :  { %v352_v54 = vpop.permute.xlu1 %351 }
 0x2c9   :  { %v354_v56 = vmul.f32 %v352_v54, %v349_v53 }
 0x2cb   :  { %v356_v57 = vadd.f32 %v355_v55, %v354_v56 }
 0x2cd   :  { %358 = vrot.lane.b32.xlu1 %v356_v57, %s4615_s5  ;;  %v458_v12 = vrot.slane %v356_v57, 6 }
 0x33f   :  { %v359_v58 = vpop.permute.xlu1 %358 }
 0x340   :  { %3661 = vmatmul.mubr.msk.f32.vlgmr.msra.gmra.mrb[2].mxu1 %vm257_vm1, %v359_v58 }
 0x341   :  { %3940 = vmatpush3.bf16.msra.mxu1 %v4818_v9  ;;  %3671 = vmatprep.mubr.msk.f32.mxu1 %vm4612_vm0, %v4613_v1 }
 0x342   :  { %3941 = vmatprep.subr.bf16.mxu1 %v4611_v0 }
 0x345   :  { %3943 = vmatpush3.bf16.msra.mxu1 %v4827_v15 }
 0x346   :  { %3944 = vmatprep.subr.bf16.mxu1 %v4611_v0 }
 0x413   :  { %v428_v59 = vpop.f32.mrb[2].mxu1 }
 0x414   :  { %v429_v60 = vadd.f32 %v4879_v34, %v428_v59  ;;  %v3662_v61 = vpop.f32.mrb[3].mxu1 }
 0x416   :  { %v433_v62 = vrot.slane %v429_v60, 6 }
 0x418   :  { %442 = vrot.lane.b32.xlu0 %v433_v62, %s4614_s0  ;;  %v435_v63 = vadd.f32 %v433_v62, %v4888_v42 }
 0x41a   :  { %v3430_v2 = vmul.f32 -1.442695, %v435_v63 }
 0x41c   :  { %4335 = vpow2.f32 %v3430_v2 }
 0x426   :  { %v4336_v3 = vpop.eup %4335 }
 0x427   :  { %v439_v4 = vadd.f32 1.0, %v4336_v3 }
 0x429   :  { %4337 = vrcp.f32 %v439_v4 }
 0x433   :  { %v4338_v5 = vpop.eup %4337 }
 0x434   :  { %v452_v13 = vsub.f32 1.0, %v4338_v5  ;;  %v460_v17 = vmul.f32 %v4338_v5, %v458_v12 }
 0x48a   :  { %v443_v6 = vpop.permute.xlu0 %442 }
 0x48b   :  { %v445_v7 = vmul.f32 %v4338_v5, %v443_v6 }
 0x48d   :  { %447 = vrot.lane.b32.xlu1 %v445_v7, %s4614_s0 }
 0x4ff   :  { %v448_v8 = vpop.permute.xlu1 %447 }
 0x500   :  { %v450_v10 = vadd.f32 %v448_v8, %v4888_v42 }
 0x502   :  { %4339 = vtanh.f32 %v450_v10 }
 0x50c   :  { %v4340_v11 = vpop.eup %4339 }
 0x50d   :  { %454 = vrot.lane.b32.xlu0 %v4340_v11, %s4615_s5 }
 0x57f   :  { %v455_v14 = vpop.permute.xlu0 %454 }
 0x580   :  { %v457_v16 = vmul.f32 %v455_v14, %v452_v13 }
 0x582   :  { %v461_v18 = vadd.f32 %v460_v17, %v457_v16 }
 0x584   :  { %v463_v19 = vrot.slane %v461_v18, 2  ;;  %v564_v36 = vrot.slane %v461_v18, 6 }
 0x586   :  { %464 = vrot.lane.b32.xlu1 %v463_v19, %s4615_s5 }
 0x5f8   :  { %v465_v20 = vpop.permute.xlu1 %464 }
 0x5f9   :  { %3672 = vmatmul.mubr.msk.f32.vlgmr.msra.gmra.mrb[4].mxu1 %vm257_vm1, %v465_v20 }
 0x5fa   :  { %3946 = vmatpush3.bf16.msra.mxu1 %v4818_v9  ;;  %3682 = vmatprep.mubr.msk.f32.mxu1 %vm4612_vm0, %v4613_v1 }
 0x5fb   :  { %3947 = vmatprep.subr.bf16.mxu1 %v4611_v0 }
 0x5fe   :  { %3949 = vmatpush3.bf16.msra.mxu1 %v4827_v15 }
 0x5ff   :  { %3956 = vmatprep.subr.bf16.mxu1 %v4611_v0 }
 0x6cc   :  { %v534_v21 = vpop.f32.mrb[4].mxu1 }
 0x6cd   :  { %v535_v22 = vadd.f32 %v4879_v34, %v534_v21  ;;  %v3673_v23 = vpop.f32.mrb[5].mxu1 }
 0x6cf   :  { %v539_v24 = vrot.slane %v535_v22, 4 }
 0x6d1   :  { %548 = vrot.lane.b32.xlu0 %v539_v24, %s4614_s0  ;;  %v541_v25 = vadd.f32 %v539_v24, %v4888_v42 }
 0x6d3   :  { %v3432_v26 = vmul.f32 -1.442695, %v541_v25 }
 0x6d5   :  { %4341 = vpow2.f32 %v3432_v26 }
 0x6df   :  { %v4342_v27 = vpop.eup %4341 }
 0x6e0   :  { %v545_v28 = vadd.f32 1.0, %v4342_v27 }
 0x6e2   :  { %4343 = vrcp.f32 %v545_v28 }
 0x6ec   :  { %v4344_v29 = vpop.eup %4343 }
 0x6ed   :  { %v558_v37 = vsub.f32 1.0, %v4344_v29  ;;  %v566_v39 = vmul.f32 %v4344_v29, %v564_v36 }
 0x743   :  { %v549_v30 = vpop.permute.xlu0 %548 }
 0x744   :  { %v551_v31 = vmul.f32 %v4344_v29, %v549_v30 }
 0x746   :  { %553 = vrot.lane.b32.xlu1 %v551_v31, %s4614_s0 }
 0x7b8   :  { %v554_v32 = vpop.permute.xlu1 %553 }
 0x7b9   :  { %v556_v33 = vadd.f32 %v554_v32, %v4888_v42 }
 0x7bb   :  { %4345 = vtanh.f32 %v556_v33 }
 0x7c5   :  { %v4346_v35 = vpop.eup %4345 }
 0x7c6   :  { %560 = vrot.lane.b32.xlu0 %v4346_v35, %s4615_s5 }
 0x838   :  { %v561_v38 = vpop.permute.xlu0 %560 }
 0x839   :  { %v563_v41 = vmul.f32 %v561_v38, %v558_v37 }
 0x83b   :  { %v567_v43 = vadd.f32 %v566_v39, %v563_v41 }
 0x83d   :  { %v569_v44 = vrot.slane %v567_v43, 4  ;;  %v670_v60 = vrot.slane %v567_v43, 6 }
 0x83f   :  { %570 = vrot.lane.b32.xlu1 %v569_v44, %s4615_s5 }
 0x8b1   :  { %v571_v45 = vpop.permute.xlu1 %570 }
 0x8b2   :  { %3683 = vmatmul.mubr.msk.f32.vlgmr.msra.gmra.mrb[6].mxu1 %vm257_vm1, %v571_v45 }
 0x8b3   :  { %3958 = vmatpush3.bf16.msra.mxu1 %v4818_v9  ;;  %3704 = vmatprep.mubr.msk.f32.mxu1 %vm4612_vm0, %v4613_v1 }
 0x8b4   :  { %3959 = vmatprep.subr.bf16.mxu1 %v4611_v0 }
 0x8b7   :  { %3961 = vmatpush3.bf16.msra.mxu1 %v4827_v15 }
 0x8b8   :  { %3968 = vmatprep.subr.bf16.mxu1 %v4611_v0 }
 0x985   :  { %v640_v46 = vpop.f32.mrb[6].mxu1 }
 0x986   :  { %v641_v47 = vadd.f32 %v4879_v34, %v640_v46  ;;  %v3684_v48 = vpop.f32.mrb[7].mxu1 }
 0x988   :  { %v645_v49 = vrot.slane %v641_v47, 2 }
 0x98a   :  { %654 = vrot.lane.b32.xlu0 %v645_v49, %s4614_s0  ;;  %v647_v50 = vadd.f32 %v645_v49, %v4888_v42 }
 0x98c   :  { %v3434_v51 = vmul.f32 -1.442695, %v647_v50 }
 0x98e   :  { %4347 = vpow2.f32 %v3434_v51 }
 0x998   :  { %v4348_v52 = vpop.eup %4347 }
 0x999   :  { %v651_v53 = vadd.f32 1.0, %v4348_v52 }
 0x99b   :  { %4349 = vrcp.f32 %v651_v53 }
 0x9a5   :  { %v4350_v54 = vpop.eup %4349 }
 0x9a6   :  { %v664_v61 = vsub.f32 1.0, %v4350_v54  ;;  %v672_v63 = vmul.f32 %v4350_v54, %v670_v60 }
 0x9fc   :  { %v655_v55 = vpop.permute.xlu0 %654 }
 0x9fd   :  { %v657_v56 = vmul.f32 %v4350_v54, %v655_v55 }
 0x9ff   :  { %659 = vrot.lane.b32.xlu1 %v657_v56, %s4614_s0 }
 0xa71   :  { %v660_v57 = vpop.permute.xlu1 %659 }
 0xa72   :  { %v662_v58 = vadd.f32 %v660_v57, %v4888_v42 }
 0xa74   :  { %4351 = vtanh.f32 %v662_v58 }
 0xa7e   :  { %v4352_v59 = vpop.eup %4351 }
 0xa7f   :  { %666 = vrot.lane.b32.xlu0 %v4352_v59, %s4615_s5 }
 0xaf1   :  { %v667_v62 = vpop.permute.xlu0 %666 }
 0xaf2   :  { %v669_v2 = vmul.f32 %v667_v62, %v664_v61  ;;  %v989_v62 = vld [vmem:[#allocation8 + $0x8] sm:$0xff] }
 0xaf4   :  { %v673_v3 = vadd.f32 %v672_v63, %v669_v2  ;;  %v1075_v63 = vld [vmem:[#allocation13] sm:$0xff] }
 0xaf6   :  { %v675_v4 = vrot.slane %v673_v3, 6  ;;  %v1076_v3 = vld [vmem:[#allocation13 + $0x8] sm:$0xff] }
 0xaf8   :  { %676 = vrot.lane.b32.xlu1 %v675_v4, %s4615_s5 }
 0xb6a   :  { %v677_v5 = vpop.permute.xlu1 %676 }
 0xb6b   :  { %3694 = vmatmul.mubr.msk.f32.vlgmr.msra.gmra.mrb[2].mxu0 %vm257_vm1, %v677_v5  ;;  %v991_v5 = vld [vmem:[#allocation8 + $0x18] sm:$0xff] }
 0xb6c   :  { %3964 = vmatpush3.bf16.msra.mxu0 %v4818_v9  ;;  %3715 = vmatprep.mubr.msk.f32.mxu0 %vm4612_vm0, %v4613_v1 }
 0xb6d   :  { %3965 = vmatprep.subr.bf16.mxu0 %v4611_v0 }
 0xb70   :  { %3967 = vmatpush3.bf16.msra.mxu0 %v4827_v15 }
 0xb71   :  { %3974 = vmatprep.subr.bf16.mxu0 %v4611_v0 }
 0xc3e   :  { %v746_v42 = vpop.f32.mrb[2].mxu0 }
 0xc3f   :  { %v747_v6 = vadd.f32 %v4879_v34, %v746_v42  ;;  %v3695_v7 = vpop.f32.mrb[3].mxu0  ;;  %v3975_v42 = vpack.c.bf16 %v1076_v3, %v1075_v63  ;;  %v1185_v3 = vld [vmem:[%s5646_s7 + $0xc0] sm:$0xff] }
 0xc40   :  { %v1078_v7 = vld [vmem:[#allocation13 + $0x18] sm:$0xff] }
 0xc41   :  { %758 = vrot.lane.b32.xlu0 %v747_v6, %s4614_s0  ;;  %v750_v8 = vadd.f32 %v747_v6, %v4886_v40  ;;  %v1077_v6 = vld [vmem:[#allocation13 + $0x10] sm:$0xff] }
 0xc43   :  { %v3436_v10 = vmul.f32 -1.442695, %v750_v8  ;;  %v1162_v8 = vld [vmem:[%s5646_s7 + $0x8] sm:$0xff] }
 0xc45   :  { %4353 = vpow2.f32 %v3436_v10 }
 0xc4f   :  { %v4354_v9 = vpop.eup %4353 }
 0xc50   :  { %v754_v11 = vadd.f32 1.0, %v4354_v9  ;;  %v3978_v9 = vpack.c.bf16 %v1078_v7, %v1077_v6 }
 0xc52   :  { %4355 = vrcp.f32 %v754_v11 }
 0xc5c   :  { %v4356_v12 = vpop.eup %4355 }
 0xc5d   :  { %v768_v18 = vsub.f32 1.0, %v4356_v12  ;;  %v775_v20 = vmul.f32 %v4356_v12, %v675_v4  ;;  %v990_v4 = vld [vmem:[#allocation8 + $0x10] sm:$0xff] }
 0xc5e   :  { %v3972_v10 = vpack.c.bf16 %v991_v5, %v990_v4  ;;  %v1187_v4 = vld [vmem:[%s5646_s7 + $0xd0] sm:$0xff]  ;;  %v1190_v5 = vld [vmem:[%s5646_s7 + $0xe8] sm:$0xff] }
 0xc5f   :  { %v5123_v6 = vpack.c.bf16 %v1187_v4, %v1185_v3 }
 0xcb3   :  { %v759_v13 = vpop.permute.xlu0 %758 }
 0xcb4   :  { %v761_v14 = vmul.f32 %v4356_v12, %v759_v13 }
 0xcb6   :  { %763 = vrot.lane.b32.xlu1 %v761_v14, %s4614_s0 }
 0xd28   :  { %v764_v15 = vpop.permute.xlu1 %763 }
 0xd29   :  { %v766_v16 = vadd.f32 %v764_v15, %v4886_v40 }
 0xd2b   :  { %4357 = vtanh.f32 %v766_v16 }
 0xd35   :  { %v4358_v17 = vpop.eup %4357 }
 0xd36   :  { %770 = vrot.lane.b32.xlu0 %v4358_v17, %s4615_s5 }
 0xda8   :  { %v771_v19 = vpop.permute.xlu0 %770 }
 0xda9   :  { %v773_v21 = vmul.f32 %v771_v19, %v768_v18 }
 0xdab   :  { %v776_v22 = vadd.f32 %v775_v20, %v773_v21  ;;  %v1161_v20 = vld [vmem:[%s5646_s7] sm:$0xff]  ;;  %v1163_v21 = vld [vmem:[%s5646_s7 + $0x10] sm:$0xff] }
 0xdad   :  { %778 = vrot.lane.b32.xlu1 %v776_v22, %s4615_s5  ;;  %v878_v39 = vrot.slane %v776_v22, 6  ;;  %v1265_v22 = vld [vmem:[#allocation10] sm:$0xff] }
 0xe1f   :  { %v779_v23 = vpop.permute.xlu1 %778 }
 0xe20   :  { %3705 = vmatmul.mubr.msk.f32.vlgmr.msra.gmra.mrb[8].mxu1 %vm257_vm1, %v779_v23  ;;  %v1266_v23 = vld [vmem:[#allocation10 + $0x8] sm:$0xff] }
 0xe21   :  { %3726 = vmatprep.mubr.msk.f32.mxu1 %vm4612_vm0, %v4613_v1 }
 0xef3   :  { %v848_v24 = vpop.f32.mrb[8].mxu1 }
 0xef4   :  { %v849_v25 = vadd.f32 %v4879_v34, %v848_v24  ;;  %v3706_v26 = vpop.f32.mrb[9].mxu1  ;;  %v1166_v24 = vld [vmem:[%s5646_s7 + $0x28] sm:$0xff] }
 0xef5   :  { %v5000_v26 = vpack.c.bf16 %v1163_v21, %v1161_v20 }
 0xef6   :  { %v853_v27 = vrot.slane %v849_v25, 6  ;;  %v1168_v25 = vld [vmem:[%s5646_s7 + $0x38] sm:$0xff] }
 0xef8   :  { %862 = vrot.lane.b32.xlu0 %v853_v27, %s4614_s0  ;;  %v855_v28 = vadd.f32 %v853_v27, %v4886_v40  ;;  %v5002_v27 = vpack.c.bf16 %v1266_v23, %v1265_v22 }
 0xefa   :  { %v3438_v29 = vmul.f32 -1.442695, %v855_v28  ;;  %v1165_v28 = vld [vmem:[%s5646_s7 + $0x20] sm:$0xff] }
 0xefc   :  { %4359 = vpow2.f32 %v3438_v29  ;;  %v5007_v29 = vpack.c.bf16 %v1168_v25, %v1166_v24  ;;  %v3441_v24 = vld [vmem:[%s5649_s10] ss:$0 sm:$0xff] }
 0xf06   :  { %v4360_v30 = vpop.eup %4359 }
 0xf07   :  { %v859_v31 = vadd.f32 1.0, %v4360_v30  ;;  %v1167_v30 = vld [vmem:[%s5646_s7 + $0x30] sm:$0xff] }
 0xf09   :  { %4361 = vrcp.f32 %v859_v31  ;;  %v1267_v31 = vld [vmem:[#allocation10 + $0x10] sm:$0xff] }
 0xf13   :  { %v4362_v32 = vpop.eup %4361 }
 0xf14   :  { %v872_v41 = vsub.f32 1.0, %v4362_v32  ;;  %v880_v44 = vmul.f32 %v4362_v32, %v878_v39 }
 0xf6a   :  { %v863_v33 = vpop.permute.xlu0 %862 }
 0xf6b   :  { %v865_v35 = vmul.f32 %v4362_v32, %v863_v33  ;;  %v1268_v32 = vld [vmem:[#allocation10 + $0x18] sm:$0xff] }
 0xf6d   :  { %867 = vrot.lane.b32.xlu1 %v865_v35, %s4614_s0  ;;  %v1170_v35 = vld [vmem:[%s5646_s7 + $0x48] sm:$0xff] }
 0xfdf   :  { %v868_v36 = vpop.permute.xlu1 %867 }
 0xfe0   :  { %v870_v37 = vadd.f32 %v868_v36, %v4886_v40  ;;  %v1172_v36 = vld [vmem:[%s5646_s7 + $0x58] sm:$0xff] }
 0xfe1   :  { %v5028_v39 = vpack.c.bf16 %v1172_v36, %v1170_v35 }
 0xfe2   :  { %4363 = vtanh.f32 %v870_v37  ;;  %v5022_v37 = vpack.c.bf16 %v1167_v30, %v1165_v28 }
 0xfec   :  { %v4364_v38 = vpop.eup %4363 }
 0xfed   :  { %874 = vrot.lane.b32.xlu0 %v4364_v38, %s4615_s5  ;;  %v5024_v38 = vpack.c.bf16 %v1268_v32, %v1267_v31 }
0x105f   :  { %v875_v43 = vpop.permute.xlu0 %874 }
0x1060   :  { %v877_v45 = vmul.f32 %v875_v43, %v872_v41  ;;  %v1169_v41 = vld [vmem:[%s5646_s7 + $0x40] sm:$0xff]  ;;  %v1171_v43 = vld [vmem:[%s5646_s7 + $0x50] sm:$0xff] }
0x1062   :  { %v881_v46 = vadd.f32 %v880_v44, %v877_v45  ;;  %v1174_v44 = vld [vmem:[%s5646_s7 + $0x68] sm:$0xff]  ;;  %v1176_v45 = vld [vmem:[%s5646_s7 + $0x78] sm:$0xff] }
0x1064   :  { %v883_v47 = vrot.slane %v881_v46, 2  ;;  %v984_v13 = vrot.slane %v881_v46, 6  ;;  %v5047_v46 = vpack.c.bf16 %v1171_v43, %v1169_v41 }
0x1066   :  { %884 = vrot.lane.b32.xlu1 %v883_v47, %s4615_s5  ;;  %v5050_v47 = vpack.c.bf16 %v1176_v45, %v1174_v44  ;;  %v1372_v45 = vld [vmem:[#allocation11] sm:$0xff] }
0x10d8   :  { %v885_v48 = vpop.permute.xlu1 %884 }
0x10d9   :  { %3716 = vmatmul.mubr.msk.f32.vlgmr.msra.gmra.mrb[4].mxu0 %vm257_vm1, %v885_v48  ;;  %v1173_v48 = vld [vmem:[%s5646_s7 + $0x60] sm:$0xff] }
0x10da   :  { %3737 = vmatprep.mubr.msk.f32.mxu0 %vm4612_vm0, %v4613_v1  ;;  %3976 = vmatpush3.bf16.msra.mxu0 %v3975_v42  ;;  %v1192_v42 = vld [vmem:[%s5646_s7 + $0xf8] sm:$0xff] }
0x10db   :  { %3977 = vmatprep.subr.bf16.mxu0 %v4611_v0  ;;  %v5126_v7 = vpack.c.bf16 %v1192_v42, %v1190_v5 }
0x10de   :  { %3979 = vmatpush3.bf16.msra.mxu0 %v3978_v9  ;;  %v1160_v9 = vld [vmem:[#allocation5] sm:$0x3] }
0x10df   :  { %4012 = vmatprep.subr.bf16.mxu0 %v4611_v0 }
0x11ac   :  { %v954_v49 = vpop.f32.mrb[4].mxu0 }
0x11ad   :  { %v955_v50 = vadd.f32 %v4879_v34, %v954_v49  ;;  %v3717_v51 = vpop.f32.mrb[5].mxu0  ;;  %v988_v34 = vld [vmem:[#allocation8] sm:$0xff]  ;;  %v1175_v49 = vld [vmem:[%s5646_s7 + $0x70] sm:$0xff] }
0x11ae   :  { %v3969_v2 = vpack.c.bf16 %v989_v62, %v988_v34  ;;  %v1180_v51 = vld [vmem:[%s5646_s7 + $0x98] sm:$0xff]  ;;  %v1186_v34 = vld [vmem:[%s5646_s7 + $0xc8] sm:$0xff] }
0x11af   :  { %v959_v52 = vrot.slane %v955_v50, 4  ;;  %v1178_v50 = vld [vmem:[%s5646_s7 + $0x88] sm:$0xff]  ;;  %v1188_v62 = vld [vmem:[%s5646_s7 + $0xd8] sm:$0xff] }
0x11b0   :  { %3970 = vmatpush3.bf16.msra.mxu1 %v3969_v2  ;;  %v5108_v2 = vpack.c.bf16 %v1188_v62, %v1186_v34 }
0x11b1   :  { %968 = vrot.lane.b32.xlu0 %v959_v52, %s4614_s0  ;;  %v961_v53 = vadd.f32 %v959_v52, %v4886_v40  ;;  %3971 = vmatprep.subr.bf16.mxu1 %v4611_v0  ;;  %v5067_v52 = vpack.c.bf16 %v1175_v49, %v1173_v48  ;;  %v1373_v48 = vld [vmem:[#allocation11 + $0x8] sm:$0xff]  ;;  %v1374_v49 = vld [vmem:[#allocation11 + $0x10] sm:$0xff] }
0x11b3   :  { %v3440_v54 = vmul.f32 -1.442695, %v961_v53  ;;  %v5072_v53 = vpack.c.bf16 %v1180_v51, %v1178_v50  ;;  %v5164_v50 = vpack.c.bf16 %v1373_v48, %v1372_v45  ;;  %v1375_v51 = vld [vmem:[#allocation11 + $0x18] sm:$0xff] }
0x11b4   :  { %3973 = vmatpush3.bf16.msra.mxu1 %v3972_v10  ;;  %v1191_v10 = vld [vmem:[%s5646_s7 + $0xf0] sm:$0xff] }
0x11b5   :  { %4365 = vpow2.f32 %v3440_v54  ;;  %v1177_v54 = vld [vmem:[%s5646_s7 + $0x80] sm:$0xff] }
0x11bf   :  { %v4366_v55 = vpop.eup %4365 }
0x11c0   :  { %v965_v56 = vadd.f32 1.0, %v4366_v55  ;;  %v1179_v55 = vld [vmem:[%s5646_s7 + $0x90] sm:$0xff] }
0x11c2   :  { %4367 = vrcp.f32 %v965_v56  ;;  %v1182_v56 = vld [vmem:[%s5646_s7 + $0xa8] sm:$0xff] }
0x11cc   :  { %v4368_v57 = vpop.eup %4367 }
0x11cd   :  { %v978_v14 = vsub.f32 1.0, %v4368_v57  ;;  %v986_v16 = vmul.f32 %v4368_v57, %v984_v13 }
0x1223   :  { %v969_v58 = vpop.permute.xlu0 %968 }
0x1224   :  { %v971_v59 = vmul.f32 %v4368_v57, %v969_v58  ;;  %v1184_v57 = vld [vmem:[%s5646_s7 + $0xb8] sm:$0xff]  ;;  %v5087_v58 = vpack.c.bf16 %v1179_v55, %v1177_v54  ;;  %v5167_v54 = vpack.c.bf16 %v1375_v51, %v1374_v49 }
0x1226   :  { %973 = vrot.lane.b32.xlu1 %v971_v59, %s4614_s0  ;;  %v5090_v59 = vpack.c.bf16 %v1184_v57, %v1182_v56 }
0x1298   :  { %v974_v60 = vpop.permute.xlu1 %973 }
0x1299   :  { %v976_v61 = vadd.f32 %v974_v60, %v4886_v40  ;;  %v1164_v40 = vld [vmem:[%s5646_s7 + $0x18] sm:$0xff]  ;;  %v1181_v60 = vld [vmem:[%s5646_s7 + $0xa0] sm:$0xff] }
0x129a   :  { %v4976_v11 = vpack.c.bf16 %v1164_v40, %v1162_v8  ;;  %v1189_v8 = vld [vmem:[%s5646_s7 + $0xe0] sm:$0xff] }
0x129b   :  { %4369 = vtanh.f32 %v976_v61  ;;  %v1183_v61 = vld [vmem:[%s5646_s7 + $0xb0] sm:$0xff]  ;;  %v5135_v40 = vpack.c.bf16 %v1191_v10, %v1189_v8 }
0x129c   :  { %3981 = vmatprep.subr.bf16.mxu1 %v4976_v11  ;;  %v5105_v63 = vpack.c.bf16 %v1183_v61, %v1181_v60 }
0x12a5   :  { %v4370_v12 = vpop.eup %4369 }
0x12a6   :  { %980 = vrot.lane.b32.xlu0 %v4370_v12, %s4615_s5 }
0x1318   :  { %v981_v15 = vpop.permute.xlu0 %980 }
0x1319   :  { %v983_v17 = vmul.f32 %v981_v15, %v978_v14 }
0x131b   :  { %v4982_v18 = vadd.f32 %v986_v16, %v983_v17  ;;  %v5151_v16 = vld [vmem:[%s5650_s11] ss:$0 sm:$0xff] }
0x131d   :  { %v1000_v19 = vrot.slane %v4982_v18, 4  ;;  %v3443_v18 = vld [vmem:[%s5653_s14] ss:$0 sm:$0xff] }
0x131f   :  { %1001 = vrot.lane.b32.xlu1 %v1000_v19, %s4615_s5 }
0x1391   :  { %v1002_v33 = vpop.permute.xlu1 %1001 }
0x1392   :  { %3727 = vmatmul.mubr.msk.f32.vlgmr.msra.gmra.mrb[10].mxu1 %vm257_vm1, %v1002_v33  ;;  %3738 = vmatmul.mubr.msk.f32.vlgmr.msra.gmra.mrb[6].mxu0 %vm257_vm1, %v1002_v33 }
0x1393   :  { %3983 = vmatpush1.bf16.msra.mxu1 %v5000_v26  ;;  %4014 = vmatpush3.bf16.msra.mxu0 %v5002_v27 }
0x1394   :  { %3985 = vmatprep.subr.bf16.mxu1 %v5007_v29  ;;  %4015 = vmatprep.subr.bf16.mxu0 %v4611_v0 }
0x1395   :  { %3748 = vmatprep.mubr.msk.f32.mxu0 %vm4612_vm0, %v4613_v1  ;;  %1257 = vmatprep.mubr.f32.mxu1 %v4613_v1 }
0x1397   :  { %3987 = vmatpush1.bf16.msra.mxu1 %v5022_v37  ;;  %4017 = vmatpush3.bf16.msra.mxu0 %v5024_v38 }
0x1398   :  { %3989 = vmatprep.subr.bf16.mxu1 %v5028_v39  ;;  %4018 = vmatprep.subr.bf16.mxu0 %v4611_v0 }
0x139a   :  { %3749 = vmatmul.mubr.msk.f32.vlgmr.msra.gmra.mrb[8].mxu0 %vm257_vm1, %v1002_v33 }
0x139b   :  { %3991 = vmatpush1.bf16.msra.mxu1 %v5047_v46  ;;  %3759 = vmatprep.mubr.msk.f32.mxu0 %vm4612_vm0, %v4613_v1 }
0x139c   :  { %3993 = vmatprep.subr.bf16.mxu1 %v5050_v47  ;;  %4020 = vmatpush3.bf16.msra.mxu0 %v5164_v50 }
0x139d   :  { %4021 = vmatprep.subr.bf16.mxu0 %v4611_v0 }
0x139f   :  { %3995 = vmatpush1.bf16.msra.mxu1 %v5067_v52 }
0x13a0   :  { %3997 = vmatprep.subr.bf16.mxu1 %v5072_v53  ;;  %4023 = vmatpush3.bf16.msra.mxu0 %v5167_v54 }
0x13a1   :  { %4025 = vmatprep.subr.bf16.mxu0 %v4976_v11 }
0x13a3   :  { %3999 = vmatpush1.bf16.msra.mxu1 %v5087_v58 }
0x13a4   :  { %4001 = vmatprep.subr.bf16.mxu1 %v5090_v59 }
0x13a7   :  { %4003 = vmatpush1.bf16.msra.mxu1 %v5105_v63 }
0x13a8   :  { %4005 = vmatprep.subr.bf16.mxu1 %v5108_v2 }
0x13ab   :  { %4007 = vmatpush1.bf16.msra.mxu1 %v5123_v6 }
0x13ac   :  { %4009 = vmatprep.subr.bf16.mxu1 %v5126_v7 }
0x13af   :  { %4011 = vmatpush1.bf16.msra.mxu1 %v5135_v40 }
0x13b0   :  { %4056 = vmatprep.subr.bf16.mxu1 %v4611_v0 }
0x13b2   :  { %1258 = vmatmul.mubr.f32.vlgmr.msra.gmra.mrb[12].mxu1 %v1160_v9 }
0x13b3   :  { %4058 = vmatpush3.bf16.msra.mxu1 %v5002_v27  ;;  %3770 = vmatprep.mubr.msk.f32.mxu1 %vm4612_vm0, %v4613_v1 }
0x13b4   :  { %4059 = vmatprep.subr.bf16.mxu1 %v4611_v0 }
0x13b7   :  { %4061 = vmatpush3.bf16.msra.mxu1 %v5024_v38 }
0x13b8   :  { %4062 = vmatprep.subr.bf16.mxu1 %v4611_v0 }
0x1465   :  { %v1071_v12 = vpop.f32.mrb[10].mxu1  ;;  %v5146_v13 = vpop.f32.mrb[6].mxu0 }
0x1466   :  { %v3728_v14 = vpop.f32.mrb[11].mxu1  ;;  %v3739_v15 = vpop.f32.mrb[7].mxu0  ;;  %v5160_v25 = vadd.f32 %v3441_v24, %v1071_v12  ;;  %v5208_v4 = vadd.f32 %v3443_v18, %v5146_v13  ;;  %v1157_v12 = vlaneseq }
0x1468   :  { %v5213_v14 = vand.u32 127, %v1157_v12 }
0x146d   :  { %v1341_v17 = vpop.f32.mrb[8].mxu0 }
0x146e   :  { %v1342_v20 = vadd.f32 %v5151_v16, %v1341_v17  ;;  %v3750_v21 = vpop.f32.mrb[9].mxu0 }
0x1470   :  { %1353 = vrot.lane.b32.xlu0 %v1342_v20, %s4614_s0 }
0x1485   :  { %v1259_v22 = vpop.f32.mrb[12].mxu1 }
0x1486   :  { %v5155_v23 = vpop.f32.mrb[13].mxu1  ;;  %v1264_v28 = vadd.f32 %v1259_v22, %v5160_v25  ;;  %v1479_v22 = vld [vmem:[%s5641_s2 + $0x1] sm:$0x1] }
0x1487   :  { %4288 = vpush %v1479_v22 }
0x1488   :  { %v1345_v30 = vadd.f32 %v1342_v20, %v1264_v28 }
0x148a   :  { %v3447_v31 = vmul.f32 -1.442695, %v1345_v30 }
0x148c   :  { %4371 = vpow2.f32 %v3447_v31 }
0x1496   :  { %v4372_v32 = vpop.eup %4371 }
0x1497   :  { %v1349_v33 = vadd.f32 1.0, %v4372_v32 }
0x1499   :  { %4373 = vrcp.f32 %v1349_v33 }
0x14a3   :  { %v4374_v35 = vpop.eup %4373 }
0x14a4   :  { %v1363_v56 = vsub.f32 1.0, %v4374_v35  ;;  %v1370_v60 = vmul.f32 %v4374_v35, %v1000_v19 }
0x14b8   :  { %s4289_s1 = spop %4288 }
0x14e2   :  { %v1354_v36 = vpop.permute.xlu0 %1353 }
0x14e3   :  { %v1356_v41 = vmul.f32 %v4374_v35, %v1354_v36 }
0x14e5   :  { %1358 = vrot.lane.b32.xlu1 %v1356_v41, %s4614_s0 }
0x1557   :  { %v1359_v43 = vpop.permute.xlu1 %1358 }
0x1558   :  { %v1361_v44 = vadd.f32 %v1359_v43, %v1264_v28  ;;  %v1481_v43 = vld [vmem:[#allocation5 + $0x2] sm:$0x3] }
0x155a   :  { %4375 = vtanh.f32 %v1361_v44  ;;  %v1484_v44 = vstv %s4289_s1 }
0x155b   :  { %v1486_v49 = vmul.f32 %v1484_v44, %v1481_v43  ;;  %v1804_v44 = vld [vmem:[%s5641_s2 + $0x2] sm:$0x1] }
0x1564   :  { %v4376_v55 = vpop.eup %4375 }
0x1565   :  { %1365 = vrot.lane.b32.xlu0 %v4376_v55, %s4615_s5 }
0x15d7   :  { %v1366_v57 = vpop.permute.xlu0 %1365 }
0x15d8   :  { %v1368_v61 = vmul.f32 %v1366_v57, %v1363_v56 }
0x15da   :  { %v5175_v34 = vadd.f32 %v1370_v60, %v1368_v61 }
0x15dc   :  { %1377 = vrot.lane.b32.xlu1 %v5175_v34, %s4615_s5 }
0x164e   :  { %v1378_v62 = vpop.permute.xlu1 %1377 }
0x164f   :  { %3760 = vmatmul.mubr.msk.f32.vlgmr.msra.gmra.mrb[10].mxu0 %vm257_vm1, %v1378_v62  ;;  %3771 = vmatmul.mubr.msk.f32.vlgmr.msra.gmra.mrb[14].mxu1 %vm257_vm1, %v1378_v62 }
0x1650   :  { %4027 = vmatpush1.bf16.msra.mxu0 %v5000_v26  ;;  %1590 = vmatprep.mubr.f32.mxu0 %v4613_v1 }
0x1651   :  { %4029 = vmatprep.subr.bf16.mxu0 %v5007_v29  ;;  %4064 = vmatpush3.bf16.msra.mxu1 %v5164_v50 }
0x1652   :  { %4065 = vmatprep.subr.bf16.mxu1 %v4611_v0  ;;  %3781 = vmatprep.mubr.msk.f32.mxu1 %vm4612_vm0, %v4613_v1 }
0x1654   :  { %4031 = vmatpush1.bf16.msra.mxu0 %v5022_v37 }
0x1655   :  { %4033 = vmatprep.subr.bf16.mxu0 %v5028_v39  ;;  %4067 = vmatpush3.bf16.msra.mxu1 %v5167_v54 }
0x1656   :  { %4069 = vmatprep.subr.bf16.mxu1 %v4976_v11 }
0x1658   :  { %4035 = vmatpush1.bf16.msra.mxu0 %v5047_v46 }
0x1659   :  { %4037 = vmatprep.subr.bf16.mxu0 %v5050_v47 }
0x165c   :  { %4039 = vmatpush1.bf16.msra.mxu0 %v5067_v52 }
0x165d   :  { %4041 = vmatprep.subr.bf16.mxu0 %v5072_v53 }
0x1660   :  { %4043 = vmatpush1.bf16.msra.mxu0 %v5087_v58 }
0x1661   :  { %4045 = vmatprep.subr.bf16.mxu0 %v5090_v59 }
0x1664   :  { %4047 = vmatpush1.bf16.msra.mxu0 %v5105_v63 }
0x1665   :  { %4049 = vmatprep.subr.bf16.mxu0 %v5108_v2 }
0x1668   :  { %4051 = vmatpush1.bf16.msra.mxu0 %v5123_v6 }
0x1669   :  { %4053 = vmatprep.subr.bf16.mxu0 %v5126_v7 }
0x166c   :  { %4055 = vmatpush1.bf16.msra.mxu0 %v5135_v40 }
0x166d   :  { %4100 = vmatprep.subr.bf16.mxu0 %v4611_v0 }
0x1722   :  { %v1447_v19 = vpop.f32.mrb[10].mxu0  ;;  %v1668_v3 = vpop.f32.mrb[14].mxu1 }
0x1723   :  { %v1451_v5 = vadd.f32 %v1447_v19, %v5155_v23  ;;  %v3761_v42 = vpop.f32.mrb[11].mxu0  ;;  %v3772_v8 = vpop.f32.mrb[15].mxu1  ;;  %v1487_v23 = vsub.f32 1.0, %v1479_v22  ;;  %v1669_v32 = vadd.f32 %v5151_v16, %v1668_v3 }
0x1725   :  { %v1452_v10 = vadd.f32 %v1451_v5, %v5208_v4  ;;  %4290 = vpush %v1487_v23 }
0x1726   :  { %4292 = vpush %v1804_v44 }
0x1727   :  { %1454 = vst [vmem:[#allocation14 + $0x2] sm:$0x3] %v1452_v10  ;;  %v1456_v9 = vsel %vm1455_vm2, %v1452_v10, -inf }
0x1728   :  { %1457 = vmax.xlane.f32.xlu0 %v1456_v9 }
0x1756   :  { %s4291_s9 = spop %4290 }
0x1757   :  { %v1490_v48 = vstv %s4291_s9  ;;  %s4293_s13 = spop %4292 }
0x17b5   :  { %v1458_v15 = vpop.xlane.xlu0 %1457 }
0x17b6   :  { %vm1459_vm3 = vcmp.eq.f32.partialorder %v1452_v10, %v1458_v15 }
0x17b7   :  { %v1460_v17 = vsel %vm1459_vm3, %v5213_v14, 128 }
0x17b8   :  { %v1461_v13 = vsel %vm1455_vm2, %v1460_v17, 2147483647 }
0x17b9   :  { %v1463_v20 = vshra.s32 %v1461_v13, 16  ;;  %v1462_v24 = vand.u32 65535, %v1461_v13 }
0x17bb   :  { %v1465_v21 = vcvt.s32.f32 %v1463_v20  ;;  %v1464_v30 = vcvt.s32.f32 %v1462_v24 }
0x17bd   :  { %1466 = vmin.xlane.f32.xlu1 %v1465_v21 }
0x184a   :  { %v1467_v28 = vpop.xlane.xlu1 %1466 }
0x184b   :  { %vm1468_vm4 = vcmp.eq.f32.partialorder %v1465_v21, %v1467_v28  ;;  %v1473_v33 = vcvt.f32.s32 %v1467_v28 }
0x184c   :  { %v1469_v31 = vsel %vm1468_vm4, %v1464_v30, inf }
0x184d   :  { %1470 = vmin.xlane.f32.xlu0 %v1469_v31  ;;  %v1474_v36 = vshll.u32 %v1473_v33, 16 }
0x1863   :  { %1680 = vrot.lane.b32.xlu0 %v1669_v32, %s4614_s0 }
0x18da   :  { %v1471_v35 = vpop.xlane.xlu0 %1470 }
0x18db   :  { %v1472_v41 = vcvt.f32.s32 %v1471_v35 }
0x18dd   :  { %v1475_v45 = vadd.s32 %v1474_v36, %v1472_v41 }
0x18de   :  { %v1681_v42 = vpop.permute.xlu0 %1680 }
0x18df   :  { %vm1476_vm5 = vcmp.eq.s32.totalorder %v5213_v14, %v1475_v45  ;;  %v1812_v45 = vsub.f32 1.0, %v1804_v44 }
0x18e0   :  { %v3449_v51 = vsel %vm1476_vm5, 1.0, %v4613_v1 }
0x18e1   :  { %v1492_v55 = vmul.f32 %v3449_v51, %v1490_v48  ;;  %4294 = vpush %v1812_v45 }
0x18e3   :  { %v1493_v56 = vadd.f32 %v1492_v55, %v1486_v49 }
0x18e5   :  { %1591 = vmatmul.mubr.f32.vlgmr.msra.gmra.mrb[12].mxu0 %v1493_v56 }
0x18e6   :  { %4102 = vmatpush3.bf16.msra.mxu0 %v5002_v27  ;;  %3792 = vmatprep.mubr.msk.f32.mxu0 %vm4612_vm0, %v4613_v1 }
0x18e7   :  { %4103 = vmatprep.subr.bf16.mxu0 %v4611_v0 }
0x18ea   :  { %4105 = vmatpush3.bf16.msra.mxu0 %v5024_v38 }
0x18eb   :  { %4106 = vmatprep.subr.bf16.mxu0 %v4611_v0 }
0x1912   :  { %s4295_s19 = spop %4294 }
0x19b8   :  { %v1592_v57 = vpop.f32.mrb[12].mxu0 }
0x19b9   :  { %v1597_v60 = vadd.f32 %v1592_v57, %v5160_v25  ;;  %v1594_v61 = vpop.f32.mrb[13].mxu0 }
0x19bb   :  { %v1672_v62 = vadd.f32 %v1669_v32, %v1597_v60 }
0x19bd   :  { %v3451_v18 = vmul.f32 -1.442695, %v1672_v62  ;;  %v1806_v62 = vld [vmem:[#allocation5 + $0x4] sm:$0x3] }
0x19bf   :  { %4377 = vpow2.f32 %v3451_v18  ;;  %v1809_v18 = vstv %s4293_s13 }
0x19c9   :  { %v4378_v19 = vpop.eup %4377 }
0x19ca   :  { %v1676_v3 = vadd.f32 1.0, %v4378_v19 }
0x19cc   :  { %4379 = vrcp.f32 %v1676_v3  ;;  %v1815_v3 = vstv %s4295_s19 }
0x19d6   :  { %v4380_v5 = vpop.eup %4379 }
0x19d7   :  { %v1683_v8 = vmul.f32 %v4380_v5, %v1681_v42  ;;  %v1690_v15 = vsub.f32 1.0, %v4380_v5  ;;  %v1696_v13 = vmul.f32 %v4380_v5, %v5175_v34  ;;  %v1811_v5 = vmul.f32 %v1809_v18, %v1806_v62 }
0x19d9   :  { %1685 = vrot.lane.b32.xlu1 %v1683_v8, %s4614_s0 }
0x1a4b   :  { %v1686_v10 = vpop.permute.xlu1 %1685 }
0x1a4c   :  { %v1688_v9 = vadd.f32 %v1686_v10, %v1597_v60 }
0x1a4e   :  { %4381 = vtanh.f32 %v1688_v9 }
0x1a58   :  { %v4382_v12 = vpop.eup %4381 }
0x1a59   :  { %1692 = vrot.lane.b32.xlu1 %v4382_v12, %s4615_s5 }
0x1acb   :  { %v1693_v17 = vpop.permute.xlu1 %1692 }
0x1acc   :  { %v1695_v20 = vmul.f32 %v1693_v17, %v1690_v15 }
0x1ace   :  { %v5234_v21 = vadd.f32 %v1696_v13, %v1695_v20 }
0x1ad0   :  { %1703 = vrot.lane.b32.xlu0 %v5234_v21, %s4615_s5 }
0x1b42   :  { %v1704_v22 = vpop.permute.xlu0 %1703 }
0x1b43   :  { %3782 = vmatmul.mubr.msk.f32.vlgmr.msra.gmra.mrb[16].mxu1 %vm257_vm1, %v1704_v22  ;;  %3793 = vmatmul.mubr.msk.f32.vlgmr.msra.gmra.mrb[14].mxu0 %vm257_vm1, %v1704_v22 }
0x1b44   :  { %4071 = vmatpush1.bf16.msra.mxu1 %v5000_v26  ;;  %1915 = vmatprep.mubr.f32.mxu1 %v4613_v1 }
0x1b45   :  { %4073 = vmatprep.subr.bf16.mxu1 %v5007_v29  ;;  %4108 = vmatpush3.bf16.msra.mxu0 %v5164_v50 }
0x1b46   :  { %4109 = vmatprep.subr.bf16.mxu0 %v4611_v0  ;;  %3803 = vmatprep.mubr.msk.f32.mxu0 %vm4612_vm0, %v4613_v1 }
0x1b48   :  { %4075 = vmatpush1.bf16.msra.mxu1 %v5022_v37 }
0x1b49   :  { %4077 = vmatprep.subr.bf16.mxu1 %v5028_v39  ;;  %4111 = vmatpush3.bf16.msra.mxu0 %v5167_v54 }
0x1b4a   :  { %4113 = vmatprep.subr.bf16.mxu0 %v4976_v11 }
0x1b4c   :  { %4079 = vmatpush1.bf16.msra.mxu1 %v5047_v46 }
0x1b4d   :  { %4081 = vmatprep.subr.bf16.mxu1 %v5050_v47 }
0x1b50   :  { %4083 = vmatpush1.bf16.msra.mxu1 %v5067_v52 }
0x1b51   :  { %4085 = vmatprep.subr.bf16.mxu1 %v5072_v53 }
0x1b54   :  { %4087 = vmatpush1.bf16.msra.mxu1 %v5087_v58 }
0x1b55   :  { %4089 = vmatprep.subr.bf16.mxu1 %v5090_v59 }
0x1b58   :  { %4091 = vmatpush1.bf16.msra.mxu1 %v5105_v63 }
0x1b59   :  { %4093 = vmatprep.subr.bf16.mxu1 %v5108_v2 }
0x1b5c   :  { %4095 = vmatpush1.bf16.msra.mxu1 %v5123_v6 }
0x1b5d   :  { %4097 = vmatprep.subr.bf16.mxu1 %v5126_v7 }
0x1b60   :  { %4099 = vmatpush1.bf16.msra.mxu1 %v5135_v40 }
0x1b61   :  { %4144 = vmatprep.subr.bf16.mxu1 %v4611_v0 }
0x1c16   :  { %v1773_v11 = vpop.f32.mrb[16].mxu1  ;;  %v1993_v34 = vpop.f32.mrb[14].mxu0 }
0x1c17   :  { %v1777_v23 = vadd.f32 %v1773_v11, %v1594_v61  ;;  %v3783_v24 = vpop.f32.mrb[17].mxu1  ;;  %v3794_v28 = vpop.f32.mrb[15].mxu0  ;;  %v1994_v32 = vadd.f32 %v5151_v16, %v1993_v34 }
0x1c19   :  { %v1778_v30 = vadd.f32 %v1777_v23, %v5208_v4 }
0x1c1b   :  { %1780 = vst [vmem:[#allocation14 + $0x4] sm:$0x3] %v1778_v30  ;;  %v1781_v31 = vsel %vm1455_vm2, %v1778_v30, -inf }
0x1c1c   :  { %1782 = vmax.xlane.f32.xlu1 %v1781_v31 }
0x1c2d   :  { %2005 = vrot.lane.b32.xlu1 %v1994_v32, %s4614_s0 }
0x1ca9   :  { %v1783_v33 = vpop.xlane.xlu1 %1782 }
0x1caa   :  { %vm1784_vm6 = vcmp.eq.f32.partialorder %v1778_v30, %v1783_v33 }
0x1cab   :  { %v1785_v35 = vsel %vm1784_vm6, %v5213_v14, 128 }
0x1cac   :  { %v1786_v36 = vsel %vm1455_vm2, %v1785_v35, 2147483647 }
0x1cad   :  { %v1788_v41 = vshra.s32 %v1786_v36, 16  ;;  %v1787_v48 = vand.u32 65535, %v1786_v36  ;;  %v2006_v11 = vpop.permute.xlu1 %2005 }
0x1caf   :  { %v1790_v43 = vcvt.s32.f32 %v1788_v41  ;;  %v1789_v51 = vcvt.s32.f32 %v1787_v48  ;;  %v2131_v48 = vld [vmem:[#allocation5 + $0x6] sm:$0x3] }
0x1cb1   :  { %1791 = vmin.xlane.f32.xlu0 %v1790_v43 }
0x1d3e   :  { %v1792_v49 = vpop.xlane.xlu0 %1791 }
0x1d3f   :  { %vm1793_vm7 = vcmp.eq.f32.partialorder %v1790_v43, %v1792_v49  ;;  %v1798_v56 = vcvt.f32.s32 %v1792_v49 }
0x1d40   :  { %v1794_v55 = vsel %vm1793_vm7, %v1789_v51, inf }
0x1d41   :  { %1795 = vmin.xlane.f32.xlu0 %v1794_v55  ;;  %v1799_v60 = vshll.u32 %v1798_v56, 16 }
0x1dce   :  { %v1796_v57 = vpop.xlane.xlu0 %1795 }
0x1dcf   :  { %v1797_v61 = vcvt.f32.s32 %v1796_v57 }
0x1dd1   :  { %v1800_v19 = vadd.s32 %v1799_v60, %v1797_v61 }
0x1dd3   :  { %vm1801_vm8 = vcmp.eq.s32.totalorder %v5213_v14, %v1800_v19 }
0x1dd4   :  { %v3453_v42 = vsel %vm1801_vm8, 1.0, %v4613_v1 }
0x1dd5   :  { %v1817_v8 = vmul.f32 %v3453_v42, %v1815_v3 }
0x1dd7   :  { %v1818_v10 = vadd.f32 %v1817_v8, %v1811_v5 }
0x1dd9   :  { %1916 = vmatmul.mubr.f32.vlgmr.msra.gmra.mrb[18].mxu1 %v1818_v10 }
0x1dda   :  { %4146 = vmatpush3.bf16.msra.mxu1 %v5002_v27  ;;  %3814 = vmatprep.mubr.msk.f32.mxu1 %vm4612_vm0, %v4613_v1 }
0x1ddb   :  { %4147 = vmatprep.subr.bf16.mxu1 %v4611_v0 }
0x1dde   :  { %4149 = vmatpush3.bf16.msra.mxu1 %v5024_v38 }
0x1ddf   :  { %4150 = vmatprep.subr.bf16.mxu1 %v4611_v0 }
0x1eac   :  { %v1917_v9 = vpop.f32.mrb[18].mxu1 }
0x1ead   :  { %v1922_v12 = vadd.f32 %v1917_v9, %v5160_v25  ;;  %v1919_v15 = vpop.f32.mrb[19].mxu1 }
0x1eaf   :  { %v1997_v17 = vadd.f32 %v1994_v32, %v1922_v12 }
0x1eb1   :  { %v3455_v13 = vmul.f32 -1.442695, %v1997_v17 }
0x1eb3   :  { %4383 = vpow2.f32 %v3455_v13  ;;  %v2573_v13 = vld [vmem:[#allocation10] sm:$0xff] }
0x1ebd   :  { %v4384_v20 = vpop.eup %4383 }
0x1ebe   :  { %v2001_v22 = vadd.f32 1.0, %v4384_v20  ;;  %v2574_v20 = vld [vmem:[#allocation10 + $0x8] sm:$0xff] }
0x1ec0   :  { %4385 = vrcp.f32 %v2001_v22  ;;  %v2575_v22 = vld [vmem:[#allocation10 + $0x10] sm:$0xff] }
0x1eca   :  { %v4386_v27 = vpop.eup %4385 }
0x1ecb   :  { %v2008_v34 = vmul.f32 %v4386_v27, %v2006_v11  ;;  %v2015_v28 = vsub.f32 1.0, %v4386_v27  ;;  %v2021_v31 = vmul.f32 %v4386_v27, %v5234_v21  ;;  %v5327_v27 = vpack.c.bf16 %v2574_v20, %v2573_v13  ;;  %v2576_v11 = vld [vmem:[#allocation10 + $0x18] sm:$0xff] }
0x1ecd   :  { %2010 = vrot.lane.b32.xlu0 %v2008_v34, %s4614_s0  ;;  %v5330_v34 = vpack.c.bf16 %v2576_v11, %v2575_v22  ;;  %v2489_v22 = vld [vmem:[%s5646_s7 + $0xa0] sm:$0xff]  ;;  %v2491_v11 = vld [vmem:[%s5646_s7 + $0xb0] sm:$0xff] }
0x1f3f   :  { %v2011_v23 = vpop.permute.xlu0 %2010 }
0x1f40   :  { %v2013_v24 = vadd.f32 %v2011_v23, %v1922_v12 }
0x1f42   :  { %4387 = vtanh.f32 %v2013_v24 }
0x1f4c   :  { %v4388_v38 = vpop.eup %4387 }
0x1f4d   :  { %2017 = vrot.lane.b32.xlu1 %v4388_v38, %s4615_s5 }
0x1fbf   :  { %v2018_v30 = vpop.permute.xlu1 %2017 }
0x1fc0   :  { %v2020_v32 = vmul.f32 %v2018_v30, %v2015_v28 }
0x1fc2   :  { %v5284_v33 = vadd.f32 %v2021_v31, %v2020_v32 }
0x1fc4   :  { %2028 = vrot.lane.b32.xlu1 %v5284_v33, %s4615_s5 }
0x2036   :  { %v2029_v35 = vpop.permute.xlu1 %2028 }
0x2037   :  { %3804 = vmatmul.mubr.msk.f32.vlgmr.msra.gmra.mrb[16].mxu0 %vm257_vm1, %v2029_v35  ;;  %3815 = vmatmul.mubr.msk.f32.vlgmr.msra.gmra.mrb[20].mxu1 %vm257_vm1, %v2029_v35 }
0x2038   :  { %4115 = vmatpush1.bf16.msra.mxu0 %v5000_v26  ;;  %2240 = vmatprep.mubr.f32.mxu0 %v4613_v1 }
0x2039   :  { %4117 = vmatprep.subr.bf16.mxu0 %v5007_v29  ;;  %4152 = vmatpush3.bf16.msra.mxu1 %v5164_v50 }
0x203a   :  { %4153 = vmatprep.subr.bf16.mxu1 %v4611_v0  ;;  %3825 = vmatprep.mubr.msk.f32.mxu1 %vm4612_vm0, %v4613_v1 }
0x203c   :  { %4119 = vmatpush1.bf16.msra.mxu0 %v5022_v37 }
0x203d   :  { %4121 = vmatprep.subr.bf16.mxu0 %v5028_v39  ;;  %4155 = vmatpush3.bf16.msra.mxu1 %v5167_v54 }
0x2040   :  { %4123 = vmatpush1.bf16.msra.mxu0 %v5047_v46 }
0x2041   :  { %4125 = vmatprep.subr.bf16.mxu0 %v5050_v47 }
0x2044   :  { %4127 = vmatpush1.bf16.msra.mxu0 %v5067_v52 }
0x2045   :  { %4129 = vmatprep.subr.bf16.mxu0 %v5072_v53 }
0x2048   :  { %4131 = vmatpush1.bf16.msra.mxu0 %v5087_v58 }
0x2049   :  { %4133 = vmatprep.subr.bf16.mxu0 %v5090_v59 }
0x204c   :  { %4135 = vmatpush1.bf16.msra.mxu0 %v5105_v63 }
0x204d   :  { %4137 = vmatprep.subr.bf16.mxu0 %v5108_v2 }
0x2050   :  { %4139 = vmatpush1.bf16.msra.mxu0 %v5123_v6  ;;  %v2129_v6 = vld [vmem:[%s5641_s2 + $0x3] sm:$0x1] }
0x2051   :  { %4141 = vmatprep.subr.bf16.mxu0 %v5126_v7  ;;  %4296 = vpush %v2129_v6  ;;  %v2137_v7 = vsub.f32 1.0, %v2129_v6  ;;  %v2472_v6 = vld [vmem:[%s5646_s7 + $0x18] sm:$0xff] }
0x2053   :  { %4298 = vpush %v2137_v7 }
0x2054   :  { %4143 = vmatpush1.bf16.msra.mxu0 %v5135_v40 }
0x2055   :  { %4188 = vmatprep.subr.bf16.mxu0 %v4611_v0 }
0x2082   :  { %s4297_s20 = spop %4296 }
0x2083   :  { %v2134_v49 = vstv %s4297_s20 }
0x2084   :  { %s4299_s22 = spop %4298  ;;  %v2136_v56 = vmul.f32 %v2134_v49, %v2131_v48  ;;  %v2478_v48 = vld [vmem:[%s5646_s7 + $0x48] sm:$0xff]  ;;  %v2480_v49 = vld [vmem:[%s5646_s7 + $0x58] sm:$0xff] }
0x2085   :  { %v2140_v55 = vstv %s4299_s22 }
0x210a   :  { %v2098_v26 = vpop.f32.mrb[16].mxu0  ;;  %v2318_v29 = vpop.f32.mrb[20].mxu1 }
0x210b   :  { %v2102_v37 = vadd.f32 %v2098_v26, %v1919_v15  ;;  %v3805_v39 = vpop.f32.mrb[17].mxu0  ;;  %v3816_v46 = vpop.f32.mrb[21].mxu1  ;;  %v2319_v36 = vadd.f32 %v5151_v16, %v2318_v29 }
0x210d   :  { %v2103_v47 = vadd.f32 %v2102_v37, %v5208_v4 }
0x210f   :  { %2105 = vst [vmem:[#allocation14 + $0x6] sm:$0x3] %v2103_v47  ;;  %v2106_v52 = vsel %vm1455_vm2, %v2103_v47, -inf }
0x2110   :  { %2107 = vmax.xlane.f32.xlu0 %v2106_v52 }
0x219d   :  { %v2108_v53 = vpop.xlane.xlu0 %2107 }
0x219e   :  { %vm2109_vm9 = vcmp.eq.f32.partialorder %v2103_v47, %v2108_v53 }
0x219f   :  { %v2110_v58 = vsel %vm2109_vm9, %v5213_v14, 128 }
0x21a0   :  { %v2111_v59 = vsel %vm1455_vm2, %v2110_v58, 2147483647 }
0x21a1   :  { %v2113_v63 = vshra.s32 %v2111_v59, 16  ;;  %v2112_v40 = vand.u32 65535, %v2111_v59 }
0x21a3   :  { %v2115_v2 = vcvt.s32.f32 %v2113_v63  ;;  %v2114_v54 = vcvt.s32.f32 %v2112_v40 }
0x21a5   :  { %2116 = vmin.xlane.f32.xlu1 %v2115_v2 }
0x2232   :  { %v2117_v50 = vpop.xlane.xlu1 %2116 }
0x2233   :  { %vm2118_vm10 = vcmp.eq.f32.partialorder %v2115_v2, %v2117_v50  ;;  %v2123_v41 = vcvt.f32.s32 %v2117_v50  ;;  %v2454_v2 = vld [vmem:[%s5641_s2 + $0x4] sm:$0x1] }
0x2234   :  { %v2119_v21 = vsel %vm2118_vm10, %v2114_v54, inf  ;;  %4300 = vpush %v2454_v2  ;;  %v2462_v7 = vsub.f32 1.0, %v2454_v2  ;;  %v2469_v50 = vld [vmem:[%s5646_s7] sm:$0xff]  ;;  %v2471_v54 = vld [vmem:[%s5646_s7 + $0x10] sm:$0xff] }
0x2235   :  { %2120 = vmin.xlane.f32.xlu0 %v2119_v21  ;;  %v2124_v44 = vshll.u32 %v2123_v41, 16  ;;  %v2474_v21 = vld [vmem:[%s5646_s7 + $0x28] sm:$0xff]  ;;  %v2476_v41 = vld [vmem:[%s5646_s7 + $0x38] sm:$0xff] }
0x2236   :  { %4302 = vpush %v2462_v7  ;;  %v2456_v7 = vld [vmem:[#allocation5 + $0x8] sm:$0x3] }
0x224b   :  { %2330 = vrot.lane.b32.xlu0 %v2319_v36, %s4614_s0 }
0x2265   :  { %s4301_s13 = spop %4300 }
0x2267   :  { %s4303_s19 = spop %4302 }
0x22c2   :  { %v2121_v43 = vpop.xlane.xlu0 %2120 }
0x22c3   :  { %v2122_v45 = vcvt.f32.s32 %v2121_v43  ;;  %v2473_v43 = vld [vmem:[%s5646_s7 + $0x20] sm:$0xff] }
0x22c5   :  { %v2125_v51 = vadd.s32 %v2124_v44, %v2122_v45  ;;  %v2475_v44 = vld [vmem:[%s5646_s7 + $0x30] sm:$0xff]  ;;  %v5387_v45 = vpack.c.bf16 %v2476_v41, %v2474_v21  ;;  %v2465_v21 = vstv %s4303_s19 }
0x22c6   :  { %v2331_v9 = vpop.permute.xlu0 %2330 }
0x22c7   :  { %vm2126_vm11 = vcmp.eq.s32.totalorder %v5213_v14, %v2125_v51  ;;  %v5396_v51 = vpack.c.bf16 %v2475_v44, %v2473_v43 }
0x22c8   :  { %v3457_v57 = vsel %vm2126_vm11, 1.0, %v4613_v1 }
0x22c9   :  { %v2142_v60 = vmul.f32 %v3457_v57, %v2140_v55  ;;  %v5399_v55 = vpack.c.bf16 %v2480_v49, %v2478_v48  ;;  %v2479_v57 = vld [vmem:[%s5646_s7 + $0x50] sm:$0xff] }
0x22cb   :  { %v2143_v61 = vadd.f32 %v2142_v60, %v2136_v56  ;;  %v2477_v56 = vld [vmem:[%s5646_s7 + $0x40] sm:$0xff]  ;;  %v2482_v60 = vld [vmem:[%s5646_s7 + $0x68] sm:$0xff] }
0x22cd   :  { %2241 = vmatmul.mubr.f32.vlgmr.msra.gmra.mrb[18].mxu0 %v2143_v61  ;;  %v2484_v61 = vld [vmem:[%s5646_s7 + $0x78] sm:$0xff] }
0x22ce   :  { %3836 = vmatprep.mubr.msk.f32.mxu0 %vm4612_vm0, %v4613_v1  ;;  %4190 = vmatpush3.bf16.msra.mxu0 %v5327_v27 }
0x22cf   :  { %4191 = vmatprep.subr.bf16.mxu0 %v4611_v0 }
0x22d2   :  { %4193 = vmatpush3.bf16.msra.mxu0 %v5330_v34 }
0x22d3   :  { %4194 = vmatprep.subr.bf16.mxu0 %v4611_v0 }
0x23a0   :  { %v2242_v62 = vpop.f32.mrb[18].mxu0 }
0x23a1   :  { %v2247_v18 = vadd.f32 %v2242_v62, %v5160_v25  ;;  %v2244_v19 = vpop.f32.mrb[19].mxu0  ;;  %v5414_v62 = vpack.c.bf16 %v2479_v57, %v2477_v56 }
0x23a3   :  { %v2322_v3 = vadd.f32 %v2319_v36, %v2247_v18  ;;  %v5375_v36 = vpack.c.bf16 %v2471_v54, %v2469_v50  ;;  %v2459_v50 = vstv %s4301_s13 }
0x23a4   :  { %v2461_v41 = vmul.f32 %v2459_v50, %v2456_v7 }
0x23a5   :  { %v3459_v5 = vmul.f32 -1.442695, %v2322_v3  ;;  %v2483_v3 = vld [vmem:[%s5646_s7 + $0x70] sm:$0xff] }
0x23a7   :  { %4389 = vpow2.f32 %v3459_v5  ;;  %v2486_v5 = vld [vmem:[%s5646_s7 + $0x88] sm:$0xff] }
0x23b1   :  { %v4390_v42 = vpop.eup %4389 }
0x23b2   :  { %v2326_v8 = vadd.f32 1.0, %v4390_v42  ;;  %v2488_v42 = vld [vmem:[%s5646_s7 + $0x98] sm:$0xff] }
0x23b4   :  { %4391 = vrcp.f32 %v2326_v8 }
0x23be   :  { %v4392_v10 = vpop.eup %4391 }
0x23bf   :  { %v2333_v12 = vmul.f32 %v4392_v10, %v2331_v9  ;;  %v2340_v24 = vsub.f32 1.0, %v4392_v10  ;;  %v2346_v28 = vmul.f32 %v4392_v10, %v5284_v33  ;;  %v5435_v10 = vpack.c.bf16 %v2488_v42, %v2486_v5  ;;  %v2485_v9 = vld [vmem:[%s5646_s7 + $0x80] sm:$0xff] }
0x23c1   :  { %2335 = vrot.lane.b32.xlu1 %v2333_v12, %s4614_s0  ;;  %v2487_v12 = vld [vmem:[%s5646_s7 + $0x90] sm:$0xff] }
0x23c2   :  { %v5450_v13 = vpack.c.bf16 %v2487_v12, %v2485_v9 }
0x2433   :  { %v2336_v15 = vpop.permute.xlu1 %2335 }
0x2434   :  { %v2338_v17 = vadd.f32 %v2336_v15, %v2247_v18  ;;  %v5417_v18 = vpack.c.bf16 %v2484_v61, %v2482_v60  ;;  %v2490_v15 = vld [vmem:[%s5646_s7 + $0xa8] sm:$0xff] }
0x2436   :  { %4393 = vtanh.f32 %v2338_v17  ;;  %v2492_v17 = vld [vmem:[%s5646_s7 + $0xb8] sm:$0xff] }
0x2437   :  { %v5453_v20 = vpack.c.bf16 %v2492_v17, %v2490_v15  ;;  %v2673_v17 = vld [vmem:[#allocation11] sm:$0xff] }
0x2440   :  { %v4394_v23 = vpop.eup %4393 }
0x2441   :  { %2342 = vrot.lane.b32.xlu1 %v4394_v23, %s4615_s5  ;;  %v5462_v23 = vpack.c.bf16 %v2491_v11, %v2489_v22  ;;  %v2674_v22 = vld [vmem:[#allocation11 + $0x8] sm:$0xff]  ;;  %v2675_v11 = vld [vmem:[#allocation11 + $0x10] sm:$0xff] }
0x24b3   :  { %v2343_v38 = vpop.permute.xlu1 %2342 }
0x24b4   :  { %v2345_v30 = vmul.f32 %v2343_v38, %v2340_v24 }
0x24b6   :  { %v5337_v31 = vadd.f32 %v2346_v28, %v2345_v30 }
0x24b8   :  { %2353 = vrot.lane.b32.xlu0 %v5337_v31, %s4615_s5 }
0x252a   :  { %v2354_v32 = vpop.permute.xlu0 %2353 }
0x252b   :  { %3826 = vmatmul.mubr.msk.f32.vlgmr.msra.gmra.mrb[22].mxu1 %vm257_vm1, %v2354_v32  ;;  %3837 = vmatmul.mubr.msk.f32.vlgmr.msra.gmra.mrb[20].mxu0 %vm257_vm1, %v2354_v32  ;;  %v2494_v32 = vld [vmem:[%s5646_s7 + $0xc8] sm:$0xff] }
0x252c   :  { %2565 = vmatprep.mubr.f32.mxu1 %v4613_v1  ;;  %3847 = vmatprep.mubr.msk.f32.mxu0 %vm4612_vm0, %v4613_v1 }
0x25fe   :  { %v2423_v35 = vpop.f32.mrb[22].mxu1  ;;  %v2643_v26 = vpop.f32.mrb[20].mxu0 }
0x25ff   :  { %v2427_v29 = vadd.f32 %v2423_v35, %v2244_v19  ;;  %v3827_v33 = vpop.f32.mrb[23].mxu1  ;;  %v3838_v37 = vpop.f32.mrb[21].mxu0  ;;  %v5349_v47 = vadd.f32 %v5151_v16, %v2643_v26  ;;  %v2470_v16 = vld [vmem:[%s5646_s7 + $0x8] sm:$0xff]  ;;  %v2481_v19 = vld [vmem:[%s5646_s7 + $0x60] sm:$0xff]  ;;  %v2496_v35 = vld [vmem:[%s5646_s7 + $0xd8] sm:$0xff] }
0x2600   :  { %v5364_v40 = vpack.c.bf16 %v2472_v6, %v2470_v16  ;;  %v5432_v8 = vpack.c.bf16 %v2483_v3, %v2481_v19  ;;  %v5472_v26 = vpack.c.bf16 %v2496_v35, %v2494_v32  ;;  %v2495_v33 = vld [vmem:[%s5646_s7 + $0xd0] sm:$0xff] }
0x2601   :  { %v2428_v39 = vadd.f32 %v2427_v29, %v5208_v4  ;;  %v2493_v29 = vld [vmem:[%s5646_s7 + $0xc0] sm:$0xff] }
0x2602   :  { %4157 = vmatprep.subr.bf16.mxu1 %v5364_v40  ;;  %v5480_v37 = vpack.c.bf16 %v2495_v33, %v2493_v29 }
0x2603   :  { %2430 = vst [vmem:[#allocation14 + $0x8] sm:$0x3] %v2428_v39  ;;  %v2431_v46 = vsel %vm1455_vm2, %v2428_v39, -inf  ;;  %4159 = vmatpush1.bf16.msra.mxu1 %v5375_v36 }
0x2604   :  { %2432 = vmax.xlane.f32.xlu1 %v2431_v46  ;;  %4161 = vmatprep.subr.bf16.mxu1 %v5387_v45  ;;  %v2500_v46 = vld [vmem:[%s5646_s7 + $0xf8] sm:$0xff] }
0x2607   :  { %4163 = vmatpush1.bf16.msra.mxu1 %v5396_v51 }
0x2608   :  { %4165 = vmatprep.subr.bf16.mxu1 %v5399_v55 }
0x260b   :  { %4167 = vmatpush1.bf16.msra.mxu1 %v5414_v62 }
0x260c   :  { %4169 = vmatprep.subr.bf16.mxu1 %v5417_v18 }
0x260f   :  { %4171 = vmatpush1.bf16.msra.mxu1 %v5432_v8 }
0x2610   :  { %4173 = vmatprep.subr.bf16.mxu1 %v5435_v10 }
0x2613   :  { %4175 = vmatpush1.bf16.msra.mxu1 %v5450_v13 }
0x2614   :  { %4177 = vmatprep.subr.bf16.mxu1 %v5453_v20 }
0x2615   :  { %2655 = vrot.lane.b32.xlu1 %v5349_v47, %s4614_s0 }
0x2617   :  { %4179 = vmatpush1.bf16.msra.mxu1 %v5462_v23 }
0x2618   :  { %4181 = vmatprep.subr.bf16.mxu1 %v5472_v26 }
0x261b   :  { %4183 = vmatpush1.bf16.msra.mxu1 %v5480_v37 }
0x2691   :  { %v2433_v52 = vpop.xlane.xlu1 %2432 }
0x2692   :  { %vm2434_vm12 = vcmp.eq.f32.partialorder %v2428_v39, %v2433_v52  ;;  %v2498_v39 = vld [vmem:[%s5646_s7 + $0xe8] sm:$0xff] }
0x2693   :  { %v2435_v53 = vsel %vm2434_vm12, %v5213_v14, 128  ;;  %v5490_v52 = vpack.c.bf16 %v2500_v46, %v2498_v39 }
0x2694   :  { %v2436_v58 = vsel %vm1455_vm2, %v2435_v53, 2147483647  ;;  %v2497_v53 = vld [vmem:[%s5646_s7 + $0xe0] sm:$0xff] }
0x2695   :  { %v2438_v59 = vshra.s32 %v2436_v58, 16  ;;  %v2437_v24 = vand.u32 65535, %v2436_v58  ;;  %v2499_v58 = vld [vmem:[%s5646_s7 + $0xf0] sm:$0xff]  ;;  %4185 = vmatprep.subr.bf16.mxu1 %v5490_v52  ;;  %v2656_v42 = vpop.permute.xlu1 %2655 }
0x2697   :  { %v2440_v63 = vcvt.s32.f32 %v2438_v59  ;;  %v2439_v28 = vcvt.s32.f32 %v2437_v24  ;;  %v5498_v59 = vpack.c.bf16 %v2499_v58, %v2497_v53  ;;  %v5514_v24 = vpack.c.bf16 %v2674_v22, %v2673_v17 }
0x2699   :  { %2441 = vmin.xlane.f32.xlu0 %v2440_v63  ;;  %4187 = vmatpush1.bf16.msra.mxu1 %v5498_v59 }
0x269a   :  { %4232 = vmatprep.subr.bf16.mxu1 %v4611_v0  ;;  %4196 = vmatpush3.bf16.msra.mxu0 %v5514_v24 }
0x269b   :  { %4197 = vmatprep.subr.bf16.mxu0 %v4611_v0 }
0x2726   :  { %v2442_v38 = vpop.xlane.xlu0 %2441 }
0x2727   :  { %vm2443_vm13 = vcmp.eq.f32.partialorder %v2440_v63, %v2442_v38  ;;  %v2448_v63 = vcvt.f32.s32 %v2442_v38  ;;  %v2676_v38 = vld [vmem:[#allocation11 + $0x18] sm:$0xff] }
0x2728   :  { %v2444_v30 = vsel %vm2443_vm13, %v2439_v28, inf }
0x2729   :  { %2445 = vmin.xlane.f32.xlu0 %v2444_v30  ;;  %v2449_v16 = vshll.u32 %v2448_v63, 16 }
0x27b6   :  { %v2446_v2 = vpop.xlane.xlu0 %2445 }
0x27b7   :  { %v2447_v6 = vcvt.f32.s32 %v2446_v2 }
0x27b9   :  { %v2450_v54 = vadd.s32 %v2449_v16, %v2447_v6 }
0x27bb   :  { %vm2451_vm14 = vcmp.eq.s32.totalorder %v5213_v14, %v2450_v54 }
0x27bc   :  { %v3461_v43 = vsel %vm2451_vm14, 1.0, %v4613_v1 }
0x27bd   :  { %v2467_v44 = vmul.f32 %v3461_v43, %v2465_v21  ;;  %v2779_v21 = vld [vmem:[%s5641_s2 + $0x5] sm:$0x1] }
0x27be   :  { %4304 = vpush %v2779_v21 }
0x27bf   :  { %v2468_v48 = vadd.f32 %v2467_v44, %v2461_v41  ;;  %v2787_v41 = vsub.f32 1.0, %v2779_v21 }
0x27c1   :  { %2566 = vmatmul.mubr.f32.vlgmr.msra.gmra.mrb[24].mxu1 %v2468_v48  ;;  %4306 = vpush %v2787_v41 }
0x27c2   :  { %4234 = vmatpush3.bf16.msra.mxu1 %v5327_v27  ;;  %3858 = vmatprep.mubr.msk.f32.mxu1 %vm4612_vm0, %v4613_v1 }
0x27c3   :  { %4235 = vmatprep.subr.bf16.mxu1 %v4611_v0 }
0x27c6   :  { %4237 = vmatpush3.bf16.msra.mxu1 %v5330_v34 }
0x27c7   :  { %4238 = vmatprep.subr.bf16.mxu1 %v4611_v0 }
0x27ef   :  { %s4305_s22 = spop %4304 }
0x27f2   :  { %s4307_s23 = spop %4306 }
0x2894   :  { %v2567_v49 = vpop.f32.mrb[24].mxu1 }
0x2895   :  { %v2572_v56 = vadd.f32 %v2567_v49, %v5160_v25  ;;  %v2569_v57 = vpop.f32.mrb[25].mxu1 }
0x2897   :  { %v2647_v60 = vadd.f32 %v5349_v47, %v2572_v56  ;;  %v5517_v47 = vpack.c.bf16 %v2676_v38, %v2675_v11 }
0x2899   :  { %v3463_v61 = vmul.f32 -1.442695, %v2647_v60  ;;  %4199 = vmatpush3.bf16.msra.mxu0 %v5517_v47 }
0x289a   :  { %4201 = vmatprep.subr.bf16.mxu0 %v5364_v40 }
0x289b   :  { %4395 = vpow2.f32 %v3463_v61 }
0x28a5   :  { %v4396_v19 = vpop.eup %4395 }
0x28a6   :  { %v2651_v3 = vadd.f32 1.0, %v4396_v19 }
0x28a8   :  { %4397 = vrcp.f32 %v2651_v3 }
0x28b2   :  { %v4398_v5 = vpop.eup %4397 }
0x28b3   :  { %v2658_v9 = vmul.f32 %v4398_v5, %v2656_v42  ;;  %v2665_v30 = vsub.f32 1.0, %v4398_v5  ;;  %v2671_v35 = vmul.f32 %v4398_v5, %v5337_v31  ;;  %v2781_v5 = vld [vmem:[#allocation5 + $0xa] sm:$0x3]  ;;  %v2784_v42 = vstv %s4305_s22 }
0x28b5   :  { %2660 = vrot.lane.b32.xlu0 %v2658_v9, %s4614_s0 }
0x2927   :  { %v2661_v12 = vpop.permute.xlu0 %2660 }
0x2928   :  { %v2663_v15 = vadd.f32 %v2661_v12, %v2572_v56  ;;  %v5563_v56 = vld [vmem:[%s5650_s11] ss:$0 sm:$0xff]  ;;  %v2790_v12 = vstv %s4307_s23 }
0x292a   :  { %4399 = vtanh.f32 %v2663_v15  ;;  %v2786_v15 = vmul.f32 %v2784_v42, %v2781_v5 }
0x2934   :  { %v4400_v28 = vpop.eup %4399 }
0x2935   :  { %2667 = vrot.lane.b32.xlu1 %v4400_v28, %s4615_s5 }
0x29a7   :  { %v2668_v32 = vpop.permute.xlu1 %2667 }
0x29a8   :  { %v2670_v29 = vmul.f32 %v2668_v32, %v2665_v30 }
0x29aa   :  { %v5524_v33 = vadd.f32 %v2671_v35, %v2670_v29 }
0x29ac   :  { %2678 = vrot.lane.b32.xlu1 %v5524_v33, %s4615_s5 }
0x2a1e   :  { %v2679_v39 = vpop.permute.xlu1 %2678 }
0x2a1f   :  { %3848 = vmatmul.mubr.msk.f32.vlgmr.msra.gmra.mrb[22].mxu0 %vm257_vm1, %v2679_v39  ;;  %3859 = vmatmul.mubr.msk.f32.vlgmr.msra.gmra.mrb[26].mxu1 %vm257_vm1, %v2679_v39 }
0x2a20   :  { %4203 = vmatpush1.bf16.msra.mxu0 %v5375_v36  ;;  %2890 = vmatprep.mubr.f32.mxu0 %v4613_v1 }
0x2a21   :  { %4205 = vmatprep.subr.bf16.mxu0 %v5387_v45  ;;  %4240 = vmatpush3.bf16.msra.mxu1 %v5514_v24 }
0x2a22   :  { %4241 = vmatprep.subr.bf16.mxu1 %v4611_v0  ;;  %3869 = vmatprep.mubr.msk.f32.mxu1 %vm4612_vm0, %v4613_v1 }
0x2a24   :  { %4207 = vmatpush1.bf16.msra.mxu0 %v5396_v51 }
0x2a25   :  { %4209 = vmatprep.subr.bf16.mxu0 %v5399_v55  ;;  %4243 = vmatpush3.bf16.msra.mxu1 %v5517_v47 }
0x2a26   :  { %4245 = vmatprep.subr.bf16.mxu1 %v5364_v40 }
0x2a28   :  { %4211 = vmatpush1.bf16.msra.mxu0 %v5414_v62 }
0x2a29   :  { %4213 = vmatprep.subr.bf16.mxu0 %v5417_v18 }
0x2a2c   :  { %4215 = vmatpush1.bf16.msra.mxu0 %v5432_v8 }
0x2a2d   :  { %4217 = vmatprep.subr.bf16.mxu0 %v5435_v10 }
0x2a30   :  { %4219 = vmatpush1.bf16.msra.mxu0 %v5450_v13 }
0x2a31   :  { %4221 = vmatprep.subr.bf16.mxu0 %v5453_v20 }
0x2a34   :  { %4223 = vmatpush1.bf16.msra.mxu0 %v5462_v23 }
0x2a35   :  { %4225 = vmatprep.subr.bf16.mxu0 %v5472_v26 }
0x2a38   :  { %4227 = vmatpush1.bf16.msra.mxu0 %v5480_v37 }
0x2a39   :  { %4229 = vmatprep.subr.bf16.mxu0 %v5490_v52 }
0x2a3c   :  { %4231 = vmatpush1.bf16.msra.mxu0 %v5498_v59 }
0x2a3d   :  { %4276 = vmatprep.subr.bf16.mxu0 %v4611_v0 }
0x2af2   :  { %v2748_v31 = vpop.f32.mrb[22].mxu0  ;;  %v2968_v40 = vpop.f32.mrb[26].mxu1 }
0x2af3   :  { %v2752_v46 = vadd.f32 %v2748_v31, %v2569_v57  ;;  %v3849_v53 = vpop.f32.mrb[23].mxu0  ;;  %v3860_v58 = vpop.f32.mrb[27].mxu1  ;;  %v2969_v57 = vadd.f32 %v5563_v56, %v2968_v40 }
0x2af5   :  { %v2753_v63 = vadd.f32 %v2752_v46, %v5208_v4 }
0x2af7   :  { %2755 = vst [vmem:[#allocation14 + $0xa] sm:$0x3] %v2753_v63  ;;  %v2756_v2 = vsel %vm1455_vm2, %v2753_v63, -inf }
0x2af8   :  { %2757 = vmax.xlane.f32.xlu0 %v2756_v2 }
0x2b85   :  { %v2758_v16 = vpop.xlane.xlu0 %2757 }
0x2b86   :  { %vm2759_vm15 = vcmp.eq.f32.partialorder %v2753_v63, %v2758_v16 }
0x2b87   :  { %v2760_v6 = vsel %vm2759_vm15, %v5213_v14, 128 }
0x2b88   :  { %v2761_v7 = vsel %vm1455_vm2, %v2760_v6, 2147483647 }
0x2b89   :  { %v2763_v50 = vshra.s32 %v2761_v7, 16  ;;  %v2762_v43 = vand.u32 65535, %v2761_v7 }
0x2b8b   :  { %v2765_v54 = vcvt.s32.f32 %v2763_v50  ;;  %v2764_v48 = vcvt.s32.f32 %v2762_v43  ;;  %v3106_v43 = vld [vmem:[#allocation5 + $0xc] sm:$0x3] }
0x2b8d   :  { %2766 = vmin.xlane.f32.xlu1 %v2765_v54 }
0x2c1a   :  { %v2767_v44 = vpop.xlane.xlu1 %2766 }
0x2c1b   :  { %vm2768_vm3 = vcmp.eq.f32.partialorder %v2765_v54, %v2767_v44  ;;  %v2773_v60 = vcvt.f32.s32 %v2767_v44 }
0x2c1c   :  { %v2769_v49 = vsel %vm2768_vm3, %v2764_v48, inf }
0x2c1d   :  { %2770 = vmin.xlane.f32.xlu0 %v2769_v49  ;;  %v2774_v19 = vshll.u32 %v2773_v60, 16 }
0x2c33   :  { %2980 = vrot.lane.b32.xlu0 %v2969_v57, %s4614_s0 }
0x2caa   :  { %v2771_v61 = vpop.xlane.xlu0 %2770 }
0x2cab   :  { %v2772_v3 = vcvt.f32.s32 %v2771_v61 }
0x2cad   :  { %v2775_v9 = vadd.s32 %v2774_v19, %v2772_v3 }
0x2cae   :  { %v2981_v31 = vpop.permute.xlu0 %2980 }
0x2caf   :  { %vm2776_vm4 = vcmp.eq.s32.totalorder %v5213_v14, %v2775_v9 }
0x2cb0   :  { %v3465_v17 = vsel %vm2776_vm4, 1.0, %v4613_v1 }
0x2cb1   :  { %v2792_v22 = vmul.f32 %v3465_v17, %v2790_v12 }
0x2cb3   :  { %v2793_v11 = vadd.f32 %v2792_v22, %v2786_v15 }
0x2cb5   :  { %2891 = vmatmul.mubr.f32.vlgmr.msra.gmra.mrb[24].mxu0 %v2793_v11 }
0x2cb6   :  { %4278 = vmatpush3.bf16.msra.mxu0 %v5327_v27  ;;  %3880 = vmatprep.mubr.msk.f32.mxu0 %vm4612_vm0, %v4613_v1 }
0x2cb7   :  { %4279 = vmatprep.subr.bf16.mxu0 %v4611_v0 }
0x2cba   :  { %4281 = vmatpush3.bf16.msra.mxu0 %v5330_v34 }
0x2cbb   :  { %4282 = vmatprep.subr.bf16.mxu0 %v4611_v0 }
0x2d88   :  { %v2892_v38 = vpop.f32.mrb[24].mxu0 }
0x2d89   :  { %v2897_v28 = vadd.f32 %v2892_v38, %v5160_v25  ;;  %v2894_v30 = vpop.f32.mrb[25].mxu0 }
0x2d8b   :  { %v2972_v32 = vadd.f32 %v2969_v57, %v2897_v28 }
0x2d8d   :  { %v3467_v35 = vmul.f32 -1.442695, %v2972_v32 }
0x2d8f   :  { %4401 = vpow2.f32 %v3467_v35 }
0x2d99   :  { %v4402_v29 = vpop.eup %4401 }
0x2d9a   :  { %v2976_v39 = vadd.f32 1.0, %v4402_v29 }
0x2d9c   :  { %4403 = vrcp.f32 %v2976_v39 }
0x2da6   :  { %v4404_v27 = vpop.eup %4403 }
0x2da7   :  { %v2983_v40 = vmul.f32 %v4404_v27, %v2981_v31  ;;  %v2990_v58 = vsub.f32 1.0, %v4404_v27  ;;  %v2996_v2 = vmul.f32 %v4404_v27, %v5524_v33 }
0x2da9   :  { %2985 = vrot.lane.b32.xlu1 %v2983_v40, %s4614_s0 }
0x2e1b   :  { %v2986_v46 = vpop.permute.xlu1 %2985 }
0x2e1c   :  { %v2988_v53 = vadd.f32 %v2986_v46, %v2897_v28 }
0x2e1e   :  { %4405 = vtanh.f32 %v2988_v53 }
0x2e28   :  { %v4406_v34 = vpop.eup %4405 }
0x2e29   :  { %2992 = vrot.lane.b32.xlu1 %v4406_v34, %s4615_s5 }
0x2e9b   :  { %v2993_v63 = vpop.permute.xlu1 %2992 }
0x2e9c   :  { %v2995_v16 = vmul.f32 %v2993_v63, %v2990_v58 }
0x2e9e   :  { %v5579_v6 = vadd.f32 %v2996_v2, %v2995_v16 }
0x2ea0   :  { %3003 = vrot.lane.b32.xlu0 %v5579_v6, %s4615_s5 }
0x2f12   :  { %v3004_v7 = vpop.permute.xlu0 %3003 }
0x2f13   :  { %3870 = vmatmul.mubr.msk.f32.vlgmr.msra.gmra.mrb[28].mxu1 %vm257_vm1, %v3004_v7  ;;  %3881 = vmatmul.mubr.msk.f32.vlgmr.msra.gmra.mrb[26].mxu0 %vm257_vm1, %v3004_v7 }
0x2f14   :  { %4247 = vmatpush1.bf16.msra.mxu1 %v5375_v36  ;;  %3215 = vmatprep.mubr.f32.mxu1 %v4613_v1 }
0x2f15   :  { %4249 = vmatprep.subr.bf16.mxu1 %v5387_v45  ;;  %4284 = vmatpush3.bf16.msra.mxu0 %v5514_v24 }
0x2f16   :  { %4285 = vmatprep.subr.bf16.mxu0 %v4611_v0  ;;  %3891 = vmatprep.mubr.msk.f32.mxu0 %vm4612_vm0, %v4613_v1 }
0x2f18   :  { %4251 = vmatpush1.bf16.msra.mxu1 %v5396_v51 }
0x2f19   :  { %4253 = vmatprep.subr.bf16.mxu1 %v5399_v55  ;;  %4287 = vmatpush3.bf16.msra.mxu0 %v5517_v47 }
0x2f1c   :  { %4255 = vmatpush1.bf16.msra.mxu1 %v5414_v62 }
0x2f1d   :  { %4257 = vmatprep.subr.bf16.mxu1 %v5417_v18 }
0x2f20   :  { %4259 = vmatpush1.bf16.msra.mxu1 %v5432_v8 }
0x2f21   :  { %4261 = vmatprep.subr.bf16.mxu1 %v5435_v10 }
0x2f24   :  { %4263 = vmatpush1.bf16.msra.mxu1 %v5450_v13 }
0x2f25   :  { %4265 = vmatprep.subr.bf16.mxu1 %v5453_v20 }
0x2f28   :  { %4267 = vmatpush1.bf16.msra.mxu1 %v5462_v23 }
0x2f29   :  { %4269 = vmatprep.subr.bf16.mxu1 %v5472_v26 }
0x2f2c   :  { %4271 = vmatpush1.bf16.msra.mxu1 %v5480_v37  ;;  %v3104_v37 = vld [vmem:[%s5641_s2 + $0x6] sm:$0x1]  ;;  %s4616_s2 = smov [#allocation14]  }
0x2f2d   :  { %4273 = vmatprep.subr.bf16.mxu1 %v5490_v52  ;;  %4308 = vpush %v3104_v37  ;;  %v3112_v52 = vsub.f32 1.0, %v3104_v37 }
0x2f2f   :  { %4310 = vpush %v3112_v52 }
0x2f30   :  { %4275 = vmatpush1.bf16.msra.mxu1 %v5498_v59 }
0x2f5e   :  { %s4309_s15 = spop %4308 }
0x2f5f   :  { %v3109_v44 = vstv %s4309_s15 }
0x2f60   :  { %s4311_s24 = spop %4310 }
0x2f61   :  { %v3115_v49 = vstv %s4311_s24 }
0x2fe6   :  { %v3073_v0 = vpop.f32.mrb[28].mxu1  ;;  %v3293_v36 = vpop.f32.mrb[26].mxu0 }
0x2fe7   :  { %v3077_v45 = vadd.f32 %v3073_v0, %v2894_v30  ;;  %v3871_v51 = vpop.f32.mrb[29].mxu1  ;;  %v3882_v55 = vpop.f32.mrb[27].mxu0  ;;  %v3294_v8 = vadd.f32 %v5563_v56, %v3293_v36  ;;  %v3111_v56 = vmul.f32 %v3109_v44, %v3106_v43 }
0x2fe9   :  { %v3078_v62 = vadd.f32 %v3077_v45, %v5208_v4 }
0x2feb   :  { %3080 = vst [vmem:[#allocation14 + $0xc] sm:$0x3] %v3078_v62  ;;  %v3081_v18 = vsel %vm1455_vm2, %v3078_v62, -inf }
0x2fec   :  { %3082 = vmax.xlane.f32.xlu1 %v3081_v18 }
0x2ffd   :  { %3305 = vrot.lane.b32.xlu1 %v3294_v8, %s4614_s0 }
0x3079   :  { %v3083_v10 = vpop.xlane.xlu1 %3082 }
0x307a   :  { %vm3084_vm0 = vcmp.eq.f32.partialorder %v3078_v62, %v3083_v10 }
0x307b   :  { %v3085_v13 = vsel %vm3084_vm0, %v5213_v14, 128 }
0x307c   :  { %v3086_v20 = vsel %vm1455_vm2, %v3085_v13, 2147483647 }
0x307d   :  { %v3088_v23 = vshra.s32 %v3086_v20, 16  ;;  %v3087_v59 = vand.u32 65535, %v3086_v20  ;;  %v3306_v22 = vpop.permute.xlu1 %3305 }
0x307f   :  { %v3090_v26 = vcvt.s32.f32 %v3088_v23  ;;  %v3089_v47 = vcvt.s32.f32 %v3087_v59 }
0x3081   :  { %3091 = vmin.xlane.f32.xlu0 %v3090_v26 }
0x310e   :  { %v3092_v24 = vpop.xlane.xlu0 %3091 }
0x310f   :  { %vm3093_vm5 = vcmp.eq.f32.partialorder %v3090_v26, %v3092_v24  ;;  %v3098_v50 = vcvt.f32.s32 %v3092_v24 }
0x3110   :  { %v3094_v33 = vsel %vm3093_vm5, %v3089_v47, inf }
0x3111   :  { %3095 = vmin.xlane.f32.xlu0 %v3094_v33  ;;  %v3099_v21 = vshll.u32 %v3098_v50, 16 }
0x319e   :  { %v3096_v54 = vpop.xlane.xlu0 %3095 }
0x319f   :  { %v3097_v41 = vcvt.f32.s32 %v3096_v54 }
0x31a1   :  { %v3100_v48 = vadd.s32 %v3099_v21, %v3097_v41 }
0x31a3   :  { %vm3101_vm2 = vcmp.eq.s32.totalorder %v5213_v14, %v3100_v48 }
0x31a4   :  { %v3469_v57 = vsel %vm3101_vm2, 1.0, %v4613_v1 }
0x31a5   :  { %v3117_v60 = vmul.f32 %v3469_v57, %v3115_v49 }
0x31a7   :  { %v3118_v61 = vadd.f32 %v3117_v60, %v3111_v56 }
0x31a9   :  { %3216 = vmatmul.mubr.f32.vlgmr.msra.gmra.mrb[30].mxu1 %v3118_v61 }
0x327c   :  { %v3217_v19 = vpop.f32.mrb[30].mxu1 }
0x327d   :  { %v3222_v3 = vadd.f32 %v3217_v19, %v5160_v25  ;;  %v3219_v5 = vpop.f32.mrb[31].mxu1 }
0x327f   :  { %v3297_v42 = vadd.f32 %v3294_v8, %v3222_v3 }
0x3281   :  { %v3471_v9 = vmul.f32 -1.442695, %v3297_v42 }
0x3283   :  { %4407 = vpow2.f32 %v3471_v9 }
0x328d   :  { %v4408_v12 = vpop.eup %4407 }
0x328e   :  { %v3301_v15 = vadd.f32 1.0, %v4408_v12 }
0x3290   :  { %4409 = vrcp.f32 %v3301_v15 }
0x329a   :  { %v4410_v17 = vpop.eup %4409 }
0x329b   :  { %v3308_v11 = vmul.f32 %v4410_v17, %v3306_v22  ;;  %v3315_v28 = vsub.f32 1.0, %v4410_v17  ;;  %v3321_v30 = vmul.f32 %v4410_v17, %v5579_v6 }
0x329d   :  { %3310 = vrot.lane.b32.xlu0 %v3308_v11, %s4614_s0  ;;  %s3411_s0 = sshll.u32 %s4616_s2, 4  ;;  %s3412_s0 = int_to_ptr.vmem [resolvable:$true] %s3411_s0 }
0x329e   :  { %s4568_s3 = scalar_lea.vmem %s3412_s0, 256  ;;  %p4573_p1 = scmp.lt.s32.totalorder %s3412_s0, %s3412_s0 }
0x329f   :  { %p4569_p0 = scmp.ne.s32.totalorder %s3412_s0, %s4568_s3  ;;  %p4574_p2 = scmp.lt.s32.totalorder %s4568_s3, %s4568_s3 }
0x32a1   :  { %p4575_p3 = por %p4574_p2, %p4573_p1 }
0x32a3   :  { %p4576_p4 = pnand %p4575_p3, %p4569_p0 }
0x330f   :  { %v3311_v14 = vpop.permute.xlu0 %3310 }
0x3310   :  { %v3313_v1 = vadd.f32 %v3311_v14, %v3222_v3 }
0x3312   :  { %4411 = vtanh.f32 %v3313_v1 }
0x331c   :  { %v4412_v38 = vpop.eup %4411 }
0x331d   :  { %3317 = vrot.lane.b32.xlu1 %v4412_v38, %s4615_s5 }
0x338f   :  { %v3318_v25 = vpop.permute.xlu1 %3317 }
0x3390   :  { %v3320_v32 = vmul.f32 %v3318_v25, %v3315_v28 }
0x3392   :  { %v3322_v35 = vadd.f32 %v3321_v30, %v3320_v32 }
0x3394   :  { %3328 = vrot.lane.b32.xlu1 %v3322_v35, %s4615_s5 }
0x3406   :  { %v3329_v29 = vpop.permute.xlu1 %3328 }
0x3407   :  { %3892 = vmatmul.mubr.msk.f32.vlgmr.msra.gmra.mrb[28].mxu0 %vm257_vm1, %v3329_v29 }
0x34da   :  { %v3398_v39 = vpop.f32.mrb[28].mxu0 }
0x34db   :  { %v3402_v27 = vadd.f32 %v3398_v39, %v3219_v5  ;;  %v3893_v31 = vpop.f32.mrb[29].mxu0 }
0x34dd   :  { %v3403_v40 = vadd.f32 %v3402_v27, %v5208_v4 }
0x34df   :  { %3405 = vst [vmem:[#allocation14 + $0xe] sm:$0x3] %v3403_v40 }
0x34e0   :  { %4579 = shalt.err (!%p4576_p4)
}
0x34e1   :  { %s5657_s16 = sld [smem:[#allocation20_spill]] }
0x34e7   :  { %s4580_s26 = scalar_lea.hbm %s5657_s16, 256 }
0x34e8   :  { %p4581_p5 = scmp.ne.s32.totalorder %s5657_s16, %s4580_s26  ;;  %p4584_p6 = scmp.lt.u32.totalorder %s4580_s26, %s5657_s16 }
0x34ea   :  { %p4586_p7 = pnand %p4584_p6, %p4581_p5 }
0x34ec   :  { %4589 = shalt.err (!%p4586_p7)
}
0x34ed   :  { %3417 = dma.vmem_to_hbm [thread:$0]  %s3412_s0, 256, %s5657_s16, [#allocation4], %s4601_s28, %s4601_s28, %s4602_s29  }
0x34ee   :  { %4598 = dma.done.wait [#allocation4], 256  }
0x34ef   :  { %4599 = vsyncadd [#allocation4], 4294967040 }
0x34f0   :  { %3421 = vsyncpa [#allocation3], 1 }
0x34f1   :  { %3422 = vsyncpa [#allocation6], 1 }
0x34f2   :  { %3423 = vsyncpa [#allocation9], 1 }
0x34f3   :  { %3424 = vsyncpa [#allocation12], 1 }
0x34f4   :  { %3425 = vsyncpa [#allocation4], 1 }

</bundles_post_ra>
